<compile_context>
chip_gen: v7x
topology: tpu7x:2x2x1
jax: 0.10.0
libtpu: 0.0.40
codegen_flags: <defaults>
</compile_context>

<pallas_src>
import jax
import jax.numpy as jnp
from jax.experimental import pallas as pl
from jax.experimental.pallas import tpu as pltpu

# ----- model hyper-parameters (small, consistent with the PyTorch module) -----
N_EMBED = 32          # n_embed
N_HEAD = 4            # n_head
HEAD_SIZE = N_EMBED // N_HEAD
NUM_LAYER = 2         # num_layer (small for the demo)
TOKEN_SIZE = 64       # token_size (vocab)
EPS = 1e-5            # nn.LayerNorm default eps
NEG_INF = -1e30       # finite "minus infinity" for the additive causal mask
# dropout = 0.0 in the reference -> identity, omitted.


def _recip(x):
    """Softmax denominator on the (otherwise idle) EUP slot when available."""
    if hasattr(pl, "reciprocal"):
        return pl.reciprocal(x, approx=True)
    return 1.0 / x


# =============================== fused Pallas kernel ===============================

def _decoder_kernel(x_ref, wqkv_ref, bqkv_ref, wproj_ref, bproj_ref,
                    lng_ref, lnb_ref, w1_ref, b1_ref, w2_ref, b2_ref,
                    cos_ref, ssin_ref, mask_ref, o_ref):
    """One batch element: the full decoder stack, fused in a single kernel.

    wqkv : (L, 2, C, 5C) fused [Wq | Wq@perm | Wk | Wk@perm | Wv], heads concatenated
    bqkv : (L, 2, 1, 5C)
    wproj: (L, 2, C, C), bproj: (L, 2, 1, C)
    lng/lnb: (L, 3, 1, C)   LayerNorm gamma/beta for the 3 AddNorms per layer
    w1/b1/w2/b2: FFN params
    cos/ssin: (T, C) rotary tables (per-head tables tiled over heads)
    mask: (T, T) additive causal mask (0 / NEG_INF), hoisted out of the kernel
    """
    C = N_EMBED
    hs = HEAD_SIZE
    # NOTE: the PyTorch code scales by n_embed**-0.5 (C of the *input*), not head_size.
    scale = 1.0 / jnp.sqrt(jnp.float32(C))

    x = x_ref[0]                        # (T, C)
    cosC = cos_ref[...]                 # (T, C)
    ssinC = ssin_ref[...]               # (T, C)
    neg_mask = mask_ref[...]            # (T, T)

    def mha(h_in, l, s):
        # Single fused projection: q, q@perm, k, k@perm, v for all heads at once
        # (the rotary pair-swap permutation is pre-folded into the weights).
        qkv = jnp.dot(h_in, wqkv_ref[l, s],
                      preferred_element_type=jnp.float32) + bqkv_ref[l, s]   # (T, 5C)
        q = qkv[:, 0 * C:1 * C] * cosC + qkv[:, 1 * C:2 * C] * ssinC         # rotary
        k = qkv[:, 2 * C:3 * C] * cosC + qkv[:, 3 * C:4 * C] * ssinC
        v = qkv[:, 4 * C:5 * C]
        w_p = wproj_ref[l, s]                                                # (C, C)
        acc = jnp.zeros(h_in.shape, jnp.float32)
        for hh in range(N_HEAD):                                             # static unroll
            lo, hi = hh * hs, (hh + 1) * hs
            wei = jnp.dot(q[:, lo:hi], k[:, lo:hi].T,
                          preferred_element_type=jnp.float32) * scale + neg_mask
            m = jnp.max(wei, axis=-1, keepdims=True)
            p = jnp.exp(wei - m)
            p = p * _recip(jnp.sum(p, axis=-1, keepdims=True))
            oh = jnp.dot(p, v[:, lo:hi], preferred_element_type=jnp.float32)  # (T, hs)
            # concat-over-heads followed by proj == sum_h out_h @ Wproj[h*hs:(h+1)*hs]
            acc = acc + jnp.dot(oh, w_p[lo:hi, :], preferred_element_type=jnp.float32)
        return acc + bproj_ref[l, s]

    def addnorm(a, b, l, i):
        su = a + b
        mean = jnp.mean(su, axis=-1, keepdims=True)
        d = su - mean
        var = jnp.mean(d * d, axis=-1, keepdims=True)
        return d * jax.lax.rsqrt(var + EPS) * lng_ref[l, i] + lnb_ref[l, i]

    def ffn(h_in, l):
        h1 = jnp.dot(h_in, w1_ref[l], preferred_element_type=jnp.float32) + b1_ref[l]
        h1 = jnp.maximum(h1, 0.0)
        return jnp.dot(h1, w2_ref[l], preferred_element_type=jnp.float32) + b2_ref[l]

    for l in range(NUM_LAYER):          # static unroll: whole stack in one kernel
        x1 = addnorm(x, mha(x, l, 0), l, 0)
        x2 = addnorm(x1, mha(x1, l, 1), l, 1)
        x = addnorm(x2, ffn(x2, l), l, 2)

    o_ref[0] = x


# ========================= packing & pallas_call wrapper =========================

def _pair_swap_perm(hs):
    idx = jnp.arange(hs)
    swap = jnp.where(idx % 2 == 0, idx + 1, idx - 1)
    return jnp.eye(hs, dtype=jnp.float32)[swap]      # x @ perm swaps (even, odd) pairs


def rotary_tables(T, hs):
    """cos / signed-sin tables, tiled over heads to full width C.
    In the reference, fres = 1/1000**(arange(0,hs,2)//hs) == 1 (integer floor div),
    so every pair rotates by angle t."""
    theta = jnp.arange(T, dtype=jnp.float32)[:, None] * jnp.ones((hs // 2,), jnp.float32)
    cos = jnp.repeat(jnp.cos(theta), 2, axis=-1)     # (T, hs) interleaved
    sin = jnp.repeat(jnp.sin(theta), 2, axis=-1)
    sign = jnp.tile(jnp.array([-1.0, 1.0], jnp.float32), hs // 2)
    ssin = sin * sign[None, :]
    return jnp.tile(cos, (1, N_HEAD)), jnp.tile(ssin, (1, N_HEAD))   # (T, C) each


def pack_params(params):
    """Stack per-layer weights and fold the rotary pair-swap permutation into the
    fused QKV projection so the kernel never multiplies by `perm`."""
    perm = _pair_swap_perm(HEAD_SIZE)

    def cat(w):      # (H, *, hs) -> (*, C), heads concatenated on the last axis
        return jnp.concatenate([w[h] for h in range(N_HEAD)], axis=-1)

    def catp(w):     # same, with the pair-swap permutation folded in
        return jnp.concatenate([w[h] @ perm for h in range(N_HEAD)], axis=-1)

    def pack_mha(p):
        w_f = jnp.concatenate([cat(p['wq']), catp(p['wq']),
                               cat(p['wk']), catp(p['wk']),
                               cat(p['wv'])], axis=-1)          # (C, 5C)
        b_f = jnp.concatenate([cat(p['bq']), catp(p['bq']),
                               cat(p['bk']), catp(p['bk']),
                               cat(p['bv'])], axis=-1)          # (1, 5C)
        return w_f, b_f

    wqkv, bqkv, wproj, bproj, lng, lnb = [], [], [], [], [], []
    w1, b1, w2, b2 = [], [], [], []
    for lp in params['layers']:
        wf1, bf1 = pack_mha(lp['sa1'])
        wf2, bf2 = pack_mha(lp['sa2'])
        wqkv.append(jnp.stack([wf1, wf2]))
        bqkv.append(jnp.stack([bf1, bf2]))
        wproj.append(jnp.stack([lp['sa1']['wproj'], lp['sa2']['wproj']]))
        bproj.append(jnp.stack([lp['sa1']['bproj'], lp['sa2']['bproj']]))
        lng.append(jnp.stack([lp['ln1']['gamma'], lp['ln2']['gamma'], lp['ln3']['gamma']]))
        lnb.append(jnp.stack([lp['ln1']['beta'], lp['ln2']['beta'], lp['ln3']['beta']]))
        w1.append(lp['ffn']['w1']); b1.append(lp['ffn']['b1'])
        w2.append(lp['ffn']['w2']); b2.append(lp['ffn']['b2'])
    st = jnp.stack
    return (st(wqkv), st(bqkv), st(wproj), st(bproj), st(lng), st(lnb),
            st(w1), st(b1), st(w2), st(b2))


def _full_spec(shape):
    n = len(shape)
    return pl.BlockSpec(shape, lambda b, n=n: (0,) * n)


def _compiler_params():
    cls = getattr(pltpu, "CompilerParams", None) or getattr(pltpu, "TPUCompilerParams", None)
    if cls is None:
        return None
    # Batch axis is embarrassingly parallel -> shards the grid over v7x's 2 TensorCores.
    return cls(dimension_semantics=("parallel",))


def decoder_pallas(tokens, params):
    # Token-embedding lookup is a data-dependent gather; done in plain JAX as glue.
    x = jnp.take(params['emb'], tokens, axis=0)            # (B, T, C)
    B, T = tokens.shape
    C = N_EMBED

    cosC, ssinC = rotary_tables(T, HEAD_SIZE)
    row = jnp.arange(T)[:, None]
    col = jnp.arange(T)[None, :]
    neg_mask = jnp.where(col <= row, 0.0, NEG_INF).astype(jnp.float32)   # (T, T)

    packed = pack_params(params)
    args = (x, *packed, cosC, ssinC, neg_mask)

    seq_spec = pl.BlockSpec((1, T, C), lambda b: (b, 0, 0))
    in_specs = [seq_spec] + [_full_spec(a.shape) for a in args[1:]]

    return pl.pallas_call(
        _decoder_kernel,
        out_shape=jax.ShapeDtypeStruct((B, T, C), jnp.float32),
        grid=(B,),
        in_specs=in_specs,
        out_specs=seq_spec,
        compiler_params=_compiler_params(),
    )(*args)


# ======================= deterministic parameter init ========================

def init_params(key):
    keys = iter(jax.random.split(key, 256))

    def nrm(shape, s=0.05):
        return jax.random.normal(next(keys), shape, jnp.float32) * s

    def mha_params():
        return dict(
            wq=nrm((N_HEAD, N_EMBED, HEAD_SIZE)), bq=nrm((N_HEAD, 1, HEAD_SIZE)),
            wk=nrm((N_HEAD, N_EMBED, HEAD_SIZE)), bk=nrm((N_HEAD, 1, HEAD_SIZE)),
            wv=nrm((N_HEAD, N_EMBED, HEAD_SIZE)), bv=nrm((N_HEAD, 1, HEAD_SIZE)),
            wproj=nrm((N_EMBED, N_EMBED)), bproj=nrm((1, N_EMBED)),
        )

    def ln_params():
        return dict(gamma=1.0 + nrm((1, N_EMBED)), beta=nrm((1, N_EMBED)))

    def ffn_params():
        return dict(w1=nrm((N_EMBED, 4 * N_EMBED)), b1=nrm((1, 4 * N_EMBED)),
                    w2=nrm((4 * N_EMBED, N_EMBED)), b2=nrm((1, N_EMBED)))

    layers = [dict(sa1=mha_params(), ln1=ln_params(),
                   sa2=mha_params(), ln2=ln_params(),
                   ffn=ffn_params(), ln3=ln_params())
              for _ in range(NUM_LAYER)]
    return dict(emb=nrm((TOKEN_SIZE, N_EMBED), 0.1), layers=layers)


# ========================= pure-JAX reference (check) ========================

def _rotary_ref(x):
    B, T, dim = x.shape
    theta = jnp.arange(T, dtype=jnp.float32)[:, None] * jnp.ones((dim // 2,), jnp.float32)
    xr = x.reshape(B, T, dim // 2, 2)
    a, b = xr[..., 0], xr[..., 1]
    c, s = jnp.cos(theta), jnp.sin(theta)
    return jnp.stack([a * c - b * s, a * s + b * c], axis=-1).reshape(B, T, dim)


def _mha_ref(x, p):
    B, T, C = x.shape
    outs = []
    mask = jnp.tril(jnp.ones((T, T), bool))
    for h in range(N_HEAD):
        q = _rotary_ref(x @ p['wq'][h] + p['bq'][h])
        k = _rotary_ref(x @ p['wk'][h] + p['bk'][h])
        v = x @ p['wv'][h] + p['bv'][h]
        wei = jnp.einsum('btd,bsd->bts', q, k) * (C ** -0.5)
        wei = jax.nn.softmax(jnp.where(mask, wei, -jnp.inf), axis=-1)
        outs.append(wei @ v)
    return jnp.concatenate(outs, axis=-1) @ p['wproj'] + p['bproj']


def _addnorm_ref(a, b, p):
    s = a + b
    mean = s.mean(-1, keepdims=True)
    var = ((s - mean) ** 2).mean(-1, keepdims=True)
    return (s - mean) / jnp.sqrt(var + EPS) * p['gamma'] + p['beta']


def _ffn_ref(x, p):
    return jax.nn.relu(x @ p['w1'] + p['b1']) @ p['w2'] + p['b2']


def decoder_ref(tokens, params):
    x = params['emb'][tokens]
    for lp in params['layers']:
        x1 = _addnorm_ref(x, _mha_ref(x, lp['sa1']), lp['ln1'])
        x2 = _addnorm_ref(x1, _mha_ref(x1, lp['sa2']), lp['ln2'])
        x = _addnorm_ref(x2, _ffn_ref(x2, lp['ffn']), lp['ln3'])
    return x


# ==================================== main ====================================

if __name__ == "__main__":
    key = jax.random.PRNGKey(0)
    pkey, tkey = jax.random.split(key)
    params = init_params(pkey)

    B, T = 2, 8
    tokens = jax.random.randint(tkey, (B, T), 0, TOKEN_SIZE, dtype=jnp.int32)

    out = decoder_pallas(tokens, params)
    out = jax.block_until_ready(out)

    assert out.shape == (B, T, N_EMBED), out.shape
    assert bool(jnp.all(jnp.isfinite(out)))

    ref = decoder_ref(tokens, params)
    err = float(jnp.max(jnp.abs(out - ref)))
    assert err < 5e-2, f"max abs error vs reference: {err}"

    print("KERNEL_OK")
</pallas_src>

<mosaic_0001>
module attributes {stable_mosaic.version = 11 : i64} {
  func.func @_decoder_kernel(%arg0: i32, %arg1: memref<1x8x32xf32, #tpu.memory_space<vmem>>, %arg2: memref<2x2x32x160xf32, #tpu.memory_space<vmem>>, %arg3: memref<2x2x1x160xf32, #tpu.memory_space<vmem>>, %arg4: memref<2x2x32x32xf32, #tpu.memory_space<vmem>>, %arg5: memref<2x2x1x32xf32, #tpu.memory_space<vmem>>, %arg6: memref<2x3x1x32xf32, #tpu.memory_space<vmem>>, %arg7: memref<2x3x1x32xf32, #tpu.memory_space<vmem>>, %arg8: memref<2x32x128xf32, #tpu.memory_space<vmem>>, %arg9: memref<2x1x128xf32, #tpu.memory_space<vmem>>, %arg10: memref<2x128x32xf32, #tpu.memory_space<vmem>>, %arg11: memref<2x1x32xf32, #tpu.memory_space<vmem>>, %arg12: memref<8x32xf32, #tpu.memory_space<vmem>>, %arg13: memref<8x32xf32, #tpu.memory_space<vmem>>, %arg14: memref<8x8xf32, #tpu.memory_space<vmem>>, %arg15: memref<1x8x32xf32, #tpu.memory_space<vmem>>) attributes {dimension_semantics = [#tpu.dimension_semantics<parallel>], iteration_bounds = array<i64: 2>, scalar_prefetch = 0 : i64, scratch_operands = 0 : i64, tpu.core_type = #tpu.core_type<tc>, window_params = [{transform_indices = @transform_0, window_bounds = array<i64: 1, 8, 32>}, {pipeline_mode = #tpu.pipeline_mode<synchronous>, transform_indices = @transform_1, window_bounds = array<i64: 2, 2, 32, 160>}, {pipeline_mode = #tpu.pipeline_mode<synchronous>, transform_indices = @transform_2, window_bounds = array<i64: 2, 2, 1, 160>}, {pipeline_mode = #tpu.pipeline_mode<synchronous>, transform_indices = @transform_3, window_bounds = array<i64: 2, 2, 32, 32>}, {pipeline_mode = #tpu.pipeline_mode<synchronous>, transform_indices = @transform_4, window_bounds = array<i64: 2, 2, 1, 32>}, {pipeline_mode = #tpu.pipeline_mode<synchronous>, transform_indices = @transform_5, window_bounds = array<i64: 2, 3, 1, 32>}, {pipeline_mode = #tpu.pipeline_mode<synchronous>, transform_indices = @transform_6, window_bounds = array<i64: 2, 3, 1, 32>}, {pipeline_mode = #tpu.pipeline_mode<synchronous>, transform_indices = @transform_7, window_bounds = array<i64: 2, 32, 128>}, {pipeline_mode = #tpu.pipeline_mode<synchronous>, transform_indices = @transform_8, window_bounds = array<i64: 2, 1, 128>}, {pipeline_mode = #tpu.pipeline_mode<synchronous>, transform_indices = @transform_9, window_bounds = array<i64: 2, 128, 32>}, {pipeline_mode = #tpu.pipeline_mode<synchronous>, transform_indices = @transform_10, window_bounds = array<i64: 2, 1, 32>}, {pipeline_mode = #tpu.pipeline_mode<synchronous>, transform_indices = @transform_11, window_bounds = array<i64: 8, 32>}, {pipeline_mode = #tpu.pipeline_mode<synchronous>, transform_indices = @transform_12, window_bounds = array<i64: 8, 32>}, {pipeline_mode = #tpu.pipeline_mode<synchronous>, transform_indices = @transform_13, window_bounds = array<i64: 8, 8>}, {transform_indices = @transform_14, window_bounds = array<i64: 1, 8, 32>}]} {
    %cst = arith.constant 3.200000e+01 : f32
    %0 = math.sqrt %cst : f32
    %cst_0 = arith.constant 1.000000e+00 : f32
    %1 = arith.divf %cst_0, %0 : f32
    %c0 = arith.constant 0 : index
    %c0_1 = arith.constant 0 : index
    %c0_2 = arith.constant 0 : index
    %2 = vector.load %arg1[%c0, %c0_1, %c0_2] : memref<1x8x32xf32, #tpu.memory_space<vmem>>, vector<1x8x32xf32>
    %3 = vector.shape_cast %2 : vector<1x8x32xf32> to vector<8x32xf32>
    %c0_3 = arith.constant 0 : index
    %c0_4 = arith.constant 0 : index
    %4 = vector.load %arg12[%c0_3, %c0_4] : memref<8x32xf32, #tpu.memory_space<vmem>>, vector<8x32xf32>
    %c0_5 = arith.constant 0 : index
    %c0_6 = arith.constant 0 : index
    %5 = vector.load %arg13[%c0_5, %c0_6] : memref<8x32xf32, #tpu.memory_space<vmem>>, vector<8x32xf32>
    %c0_7 = arith.constant 0 : index
    %c0_8 = arith.constant 0 : index
    %6 = vector.load %arg14[%c0_7, %c0_8] : memref<8x8xf32, #tpu.memory_space<vmem>>, vector<8x8xf32>
    %c0_9 = arith.constant 0 : index
    %c0_10 = arith.constant 0 : index
    %c0_11 = arith.constant 0 : index
    %c0_12 = arith.constant 0 : index
    %7 = vector.load %arg2[%c0_9, %c0_10, %c0_11, %c0_12] : memref<2x2x32x160xf32, #tpu.memory_space<vmem>>, vector<1x1x32x160xf32>
    %8 = vector.shape_cast %7 : vector<1x1x32x160xf32> to vector<32x160xf32>
    %cst_13 = arith.constant dense<0.000000e+00> : vector<8x160xf32>
    %9 = tpu.matmul %3, %8, %cst_13 {dimension_numbers = #tpu.dot_dimension_numbers<[1], [0], [0], [1], [0, 0, 1, 1], [], []>} : vector<8x32xf32>, vector<32x160xf32>, vector<8x160xf32> -> vector<8x160xf32>
    %c0_14 = arith.constant 0 : index
    %c0_15 = arith.constant 0 : index
    %c0_16 = arith.constant 0 : index
    %c0_17 = arith.constant 0 : index
    %10 = vector.load %arg3[%c0_14, %c0_15, %c0_16, %c0_17] : memref<2x2x1x160xf32, #tpu.memory_space<vmem>>, vector<1x1x1x160xf32>
    %11 = vector.shape_cast %10 : vector<1x1x1x160xf32> to vector<1x160xf32>
    %12 = vector.broadcast %11 : vector<1x160xf32> to vector<8x160xf32>
    %13 = arith.addf %9, %12 : vector<8x160xf32>
    %14 = vector.extract_strided_slice %13 {offsets = [0, 0], sizes = [8, 32], strides = [1, 1]} : vector<8x160xf32> to vector<8x32xf32>
    %15 = arith.mulf %14, %4 : vector<8x32xf32>
    %16 = vector.extract_strided_slice %13 {offsets = [0, 32], sizes = [8, 32], strides = [1, 1]} : vector<8x160xf32> to vector<8x32xf32>
    %17 = arith.mulf %16, %5 : vector<8x32xf32>
    %18 = arith.addf %15, %17 : vector<8x32xf32>
    %19 = vector.extract_strided_slice %13 {offsets = [0, 64], sizes = [8, 32], strides = [1, 1]} : vector<8x160xf32> to vector<8x32xf32>
    %20 = arith.mulf %19, %4 : vector<8x32xf32>
    %21 = vector.extract_strided_slice %13 {offsets = [0, 96], sizes = [8, 32], strides = [1, 1]} : vector<8x160xf32> to vector<8x32xf32>
    %22 = arith.mulf %21, %5 : vector<8x32xf32>
    %23 = arith.addf %20, %22 : vector<8x32xf32>
    %24 = vector.extract_strided_slice %13 {offsets = [0, 128], sizes = [8, 32], strides = [1, 1]} : vector<8x160xf32> to vector<8x32xf32>
    %c0_18 = arith.constant 0 : index
    %c0_19 = arith.constant 0 : index
    %c0_20 = arith.constant 0 : index
    %c0_21 = arith.constant 0 : index
    %25 = vector.load %arg4[%c0_18, %c0_19, %c0_20, %c0_21] : memref<2x2x32x32xf32, #tpu.memory_space<vmem>>, vector<1x1x32x32xf32>
    %26 = vector.shape_cast %25 : vector<1x1x32x32xf32> to vector<32x32xf32>
    %cst_22 = arith.constant 0.000000e+00 : f32
    %27 = vector.broadcast %cst_22 : f32 to vector<8x32xf32>
    %28 = vector.extract_strided_slice %18 {offsets = [0, 0], sizes = [8, 8], strides = [1, 1]} : vector<8x32xf32> to vector<8x8xf32>
    %29 = vector.extract_strided_slice %23 {offsets = [0, 0], sizes = [8, 8], strides = [1, 1]} : vector<8x32xf32> to vector<8x8xf32>
    %30 = tpu.transpose %29, [1, 0] : vector<8x8xf32> -> vector<8x8xf32>
    %cst_23 = arith.constant dense<0.000000e+00> : vector<8x8xf32>
    %31 = tpu.matmul %28, %30, %cst_23 {dimension_numbers = #tpu.dot_dimension_numbers<[1], [0], [0], [1], [0, 0, 1, 1], [], []>} : vector<8x8xf32>, vector<8x8xf32>, vector<8x8xf32> -> vector<8x8xf32>
    %32 = vector.broadcast %1 : f32 to vector<8x8xf32>
    %33 = arith.mulf %31, %32 : vector<8x8xf32>
    %34 = arith.addf %33, %6 : vector<8x8xf32>
    %cst_24 = arith.constant dense<0xFF800000> : vector<8xf32>
    %35 = vector.multi_reduction <maximumf>, %34, %cst_24 [1] : vector<8x8xf32> to vector<8xf32>
    %36 = vector.shape_cast %35 : vector<8xf32> to vector<8x1xf32>
    %37 = vector.broadcast %36 : vector<8x1xf32> to vector<8x8xf32>
    %38 = arith.subf %34, %37 : vector<8x8xf32>
    %39 = math.exp %38 : vector<8x8xf32>
    %cst_25 = arith.constant dense<0.000000e+00> : vector<8xf32>
    %40 = vector.multi_reduction <add>, %39, %cst_25 [1] : vector<8x8xf32> to vector<8xf32>
    %41 = vector.shape_cast %40 : vector<8xf32> to vector<8x1xf32>
    %42 = tpu.reciprocal %41 {approx = true} : vector<8x1xf32> -> vector<8x1xf32>
    %43 = vector.broadcast %42 : vector<8x1xf32> to vector<8x8xf32>
    %44 = arith.mulf %39, %43 : vector<8x8xf32>
    %45 = vector.extract_strided_slice %24 {offsets = [0, 0], sizes = [8, 8], strides = [1, 1]} : vector<8x32xf32> to vector<8x8xf32>
    %cst_26 = arith.constant dense<0.000000e+00> : vector<8x8xf32>
    %46 = tpu.matmul %44, %45, %cst_26 {dimension_numbers = #tpu.dot_dimension_numbers<[1], [0], [0], [1], [0, 0, 1, 1], [], []>} : vector<8x8xf32>, vector<8x8xf32>, vector<8x8xf32> -> vector<8x8xf32>
    %47 = vector.extract_strided_slice %26 {offsets = [0, 0], sizes = [8, 32], strides = [1, 1]} : vector<32x32xf32> to vector<8x32xf32>
    %cst_27 = arith.constant dense<0.000000e+00> : vector<8x32xf32>
    %48 = tpu.matmul %46, %47, %cst_27 {dimension_numbers = #tpu.dot_dimension_numbers<[1], [0], [0], [1], [0, 0, 1, 1], [], []>} : vector<8x8xf32>, vector<8x32xf32>, vector<8x32xf32> -> vector<8x32xf32>
    %49 = arith.addf %27, %48 : vector<8x32xf32>
    %50 = vector.extract_strided_slice %18 {offsets = [0, 8], sizes = [8, 8], strides = [1, 1]} : vector<8x32xf32> to vector<8x8xf32>
    %51 = vector.extract_strided_slice %23 {offsets = [0, 8], sizes = [8, 8], strides = [1, 1]} : vector<8x32xf32> to vector<8x8xf32>
    %52 = tpu.transpose %51, [1, 0] : vector<8x8xf32> -> vector<8x8xf32>
    %cst_28 = arith.constant dense<0.000000e+00> : vector<8x8xf32>
    %53 = tpu.matmul %50, %52, %cst_28 {dimension_numbers = #tpu.dot_dimension_numbers<[1], [0], [0], [1], [0, 0, 1, 1], [], []>} : vector<8x8xf32>, vector<8x8xf32>, vector<8x8xf32> -> vector<8x8xf32>
    %54 = vector.broadcast %1 : f32 to vector<8x8xf32>
    %55 = arith.mulf %53, %54 : vector<8x8xf32>
    %56 = arith.addf %55, %6 : vector<8x8xf32>
    %cst_29 = arith.constant dense<0xFF800000> : vector<8xf32>
    %57 = vector.multi_reduction <maximumf>, %56, %cst_29 [1] : vector<8x8xf32> to vector<8xf32>
    %58 = vector.shape_cast %57 : vector<8xf32> to vector<8x1xf32>
    %59 = vector.broadcast %58 : vector<8x1xf32> to vector<8x8xf32>
    %60 = arith.subf %56, %59 : vector<8x8xf32>
    %61 = math.exp %60 : vector<8x8xf32>
    %cst_30 = arith.constant dense<0.000000e+00> : vector<8xf32>
    %62 = vector.multi_reduction <add>, %61, %cst_30 [1] : vector<8x8xf32> to vector<8xf32>
    %63 = vector.shape_cast %62 : vector<8xf32> to vector<8x1xf32>
    %64 = tpu.reciprocal %63 {approx = true} : vector<8x1xf32> -> vector<8x1xf32>
    %65 = vector.broadcast %64 : vector<8x1xf32> to vector<8x8xf32>
    %66 = arith.mulf %61, %65 : vector<8x8xf32>
    %67 = vector.extract_strided_slice %24 {offsets = [0, 8], sizes = [8, 8], strides = [1, 1]} : vector<8x32xf32> to vector<8x8xf32>
    %cst_31 = arith.constant dense<0.000000e+00> : vector<8x8xf32>
    %68 = tpu.matmul %66, %67, %cst_31 {dimension_numbers = #tpu.dot_dimension_numbers<[1], [0], [0], [1], [0, 0, 1, 1], [], []>} : vector<8x8xf32>, vector<8x8xf32>, vector<8x8xf32> -> vector<8x8xf32>
    %69 = vector.extract_strided_slice %26 {offsets = [8, 0], sizes = [8, 32], strides = [1, 1]} : vector<32x32xf32> to vector<8x32xf32>
    %cst_32 = arith.constant dense<0.000000e+00> : vector<8x32xf32>
    %70 = tpu.matmul %68, %69, %cst_32 {dimension_numbers = #tpu.dot_dimension_numbers<[1], [0], [0], [1], [0, 0, 1, 1], [], []>} : vector<8x8xf32>, vector<8x32xf32>, vector<8x32xf32> -> vector<8x32xf32>
    %71 = arith.addf %49, %70 : vector<8x32xf32>
    %72 = vector.extract_strided_slice %18 {offsets = [0, 16], sizes = [8, 8], strides = [1, 1]} : vector<8x32xf32> to vector<8x8xf32>
    %73 = vector.extract_strided_slice %23 {offsets = [0, 16], sizes = [8, 8], strides = [1, 1]} : vector<8x32xf32> to vector<8x8xf32>
    %74 = tpu.transpose %73, [1, 0] : vector<8x8xf32> -> vector<8x8xf32>
    %cst_33 = arith.constant dense<0.000000e+00> : vector<8x8xf32>
    %75 = tpu.matmul %72, %74, %cst_33 {dimension_numbers = #tpu.dot_dimension_numbers<[1], [0], [0], [1], [0, 0, 1, 1], [], []>} : vector<8x8xf32>, vector<8x8xf32>, vector<8x8xf32> -> vector<8x8xf32>
    %76 = vector.broadcast %1 : f32 to vector<8x8xf32>
    %77 = arith.mulf %75, %76 : vector<8x8xf32>
    %78 = arith.addf %77, %6 : vector<8x8xf32>
    %cst_34 = arith.constant dense<0xFF800000> : vector<8xf32>
    %79 = vector.multi_reduction <maximumf>, %78, %cst_34 [1] : vector<8x8xf32> to vector<8xf32>
    %80 = vector.shape_cast %79 : vector<8xf32> to vector<8x1xf32>
    %81 = vector.broadcast %80 : vector<8x1xf32> to vector<8x8xf32>
    %82 = arith.subf %78, %81 : vector<8x8xf32>
    %83 = math.exp %82 : vector<8x8xf32>
    %cst_35 = arith.constant dense<0.000000e+00> : vector<8xf32>
    %84 = vector.multi_reduction <add>, %83, %cst_35 [1] : vector<8x8xf32> to vector<8xf32>
    %85 = vector.shape_cast %84 : vector<8xf32> to vector<8x1xf32>
    %86 = tpu.reciprocal %85 {approx = true} : vector<8x1xf32> -> vector<8x1xf32>
    %87 = vector.broadcast %86 : vector<8x1xf32> to vector<8x8xf32>
    %88 = arith.mulf %83, %87 : vector<8x8xf32>
    %89 = vector.extract_strided_slice %24 {offsets = [0, 16], sizes = [8, 8], strides = [1, 1]} : vector<8x32xf32> to vector<8x8xf32>
    %cst_36 = arith.constant dense<0.000000e+00> : vector<8x8xf32>
    %90 = tpu.matmul %88, %89, %cst_36 {dimension_numbers = #tpu.dot_dimension_numbers<[1], [0], [0], [1], [0, 0, 1, 1], [], []>} : vector<8x8xf32>, vector<8x8xf32>, vector<8x8xf32> -> vector<8x8xf32>
    %91 = vector.extract_strided_slice %26 {offsets = [16, 0], sizes = [8, 32], strides = [1, 1]} : vector<32x32xf32> to vector<8x32xf32>
    %cst_37 = arith.constant dense<0.000000e+00> : vector<8x32xf32>
    %92 = tpu.matmul %90, %91, %cst_37 {dimension_numbers = #tpu.dot_dimension_numbers<[1], [0], [0], [1], [0, 0, 1, 1], [], []>} : vector<8x8xf32>, vector<8x32xf32>, vector<8x32xf32> -> vector<8x32xf32>
    %93 = arith.addf %71, %92 : vector<8x32xf32>
    %94 = vector.extract_strided_slice %18 {offsets = [0, 24], sizes = [8, 8], strides = [1, 1]} : vector<8x32xf32> to vector<8x8xf32>
    %95 = vector.extract_strided_slice %23 {offsets = [0, 24], sizes = [8, 8], strides = [1, 1]} : vector<8x32xf32> to vector<8x8xf32>
    %96 = tpu.transpose %95, [1, 0] : vector<8x8xf32> -> vector<8x8xf32>
    %cst_38 = arith.constant dense<0.000000e+00> : vector<8x8xf32>
    %97 = tpu.matmul %94, %96, %cst_38 {dimension_numbers = #tpu.dot_dimension_numbers<[1], [0], [0], [1], [0, 0, 1, 1], [], []>} : vector<8x8xf32>, vector<8x8xf32>, vector<8x8xf32> -> vector<8x8xf32>
    %98 = vector.broadcast %1 : f32 to vector<8x8xf32>
    %99 = arith.mulf %97, %98 : vector<8x8xf32>
    %100 = arith.addf %99, %6 : vector<8x8xf32>
    %cst_39 = arith.constant dense<0xFF800000> : vector<8xf32>
    %101 = vector.multi_reduction <maximumf>, %100, %cst_39 [1] : vector<8x8xf32> to vector<8xf32>
    %102 = vector.shape_cast %101 : vector<8xf32> to vector<8x1xf32>
    %103 = vector.broadcast %102 : vector<8x1xf32> to vector<8x8xf32>
    %104 = arith.subf %100, %103 : vector<8x8xf32>
    %105 = math.exp %104 : vector<8x8xf32>
    %cst_40 = arith.constant dense<0.000000e+00> : vector<8xf32>
    %106 = vector.multi_reduction <add>, %105, %cst_40 [1] : vector<8x8xf32> to vector<8xf32>
    %107 = vector.shape_cast %106 : vector<8xf32> to vector<8x1xf32>
    %108 = tpu.reciprocal %107 {approx = true} : vector<8x1xf32> -> vector<8x1xf32>
    %109 = vector.broadcast %108 : vector<8x1xf32> to vector<8x8xf32>
    %110 = arith.mulf %105, %109 : vector<8x8xf32>
    %111 = vector.extract_strided_slice %24 {offsets = [0, 24], sizes = [8, 8], strides = [1, 1]} : vector<8x32xf32> to vector<8x8xf32>
    %cst_41 = arith.constant dense<0.000000e+00> : vector<8x8xf32>
    %112 = tpu.matmul %110, %111, %cst_41 {dimension_numbers = #tpu.dot_dimension_numbers<[1], [0], [0], [1], [0, 0, 1, 1], [], []>} : vector<8x8xf32>, vector<8x8xf32>, vector<8x8xf32> -> vector<8x8xf32>
    %113 = vector.extract_strided_slice %26 {offsets = [24, 0], sizes = [8, 32], strides = [1, 1]} : vector<32x32xf32> to vector<8x32xf32>
    %cst_42 = arith.constant dense<0.000000e+00> : vector<8x32xf32>
    %114 = tpu.matmul %112, %113, %cst_42 {dimension_numbers = #tpu.dot_dimension_numbers<[1], [0], [0], [1], [0, 0, 1, 1], [], []>} : vector<8x8xf32>, vector<8x32xf32>, vector<8x32xf32> -> vector<8x32xf32>
    %115 = arith.addf %93, %114 : vector<8x32xf32>
    %c0_43 = arith.constant 0 : index
    %c0_44 = arith.constant 0 : index
    %c0_45 = arith.constant 0 : index
    %c0_46 = arith.constant 0 : index
    %116 = vector.load %arg5[%c0_43, %c0_44, %c0_45, %c0_46] : memref<2x2x1x32xf32, #tpu.memory_space<vmem>>, vector<1x1x1x32xf32>
    %117 = vector.shape_cast %116 : vector<1x1x1x32xf32> to vector<1x32xf32>
    %118 = vector.broadcast %117 : vector<1x32xf32> to vector<8x32xf32>
    %119 = arith.addf %115, %118 : vector<8x32xf32>
    %120 = arith.addf %3, %119 : vector<8x32xf32>
    %cst_47 = arith.constant dense<0.000000e+00> : vector<8xf32>
    %121 = vector.multi_reduction <add>, %120, %cst_47 [1] : vector<8x32xf32> to vector<8xf32>
    %122 = vector.shape_cast %121 : vector<8xf32> to vector<8x1xf32>
    %cst_48 = arith.constant 3.200000e+01 : f32
    %123 = vector.broadcast %cst_48 : f32 to vector<8x1xf32>
    %124 = arith.divf %122, %123 : vector<8x1xf32>
    %125 = vector.broadcast %124 : vector<8x1xf32> to vector<8x32xf32>
    %126 = arith.subf %120, %125 : vector<8x32xf32>
    %127 = arith.mulf %126, %126 : vector<8x32xf32>
    %cst_49 = arith.constant dense<0.000000e+00> : vector<8xf32>
    %128 = vector.multi_reduction <add>, %127, %cst_49 [1] : vector<8x32xf32> to vector<8xf32>
    %129 = vector.shape_cast %128 : vector<8xf32> to vector<8x1xf32>
    %cst_50 = arith.constant 3.200000e+01 : f32
    %130 = vector.broadcast %cst_50 : f32 to vector<8x1xf32>
    %131 = arith.divf %129, %130 : vector<8x1xf32>
    %cst_51 = arith.constant 9.99999974E-6 : f32
    %132 = vector.broadcast %cst_51 : f32 to vector<8x1xf32>
    %133 = arith.addf %131, %132 : vector<8x1xf32>
    %134 = math.rsqrt %133 : vector<8x1xf32>
    %135 = vector.broadcast %134 : vector<8x1xf32> to vector<8x32xf32>
    %136 = arith.mulf %126, %135 : vector<8x32xf32>
    %c0_52 = arith.constant 0 : index
    %c0_53 = arith.constant 0 : index
    %c0_54 = arith.constant 0 : index
    %c0_55 = arith.constant 0 : index
    %137 = vector.load %arg6[%c0_52, %c0_53, %c0_54, %c0_55] : memref<2x3x1x32xf32, #tpu.memory_space<vmem>>, vector<1x1x1x32xf32>
    %138 = vector.shape_cast %137 : vector<1x1x1x32xf32> to vector<1x32xf32>
    %139 = vector.broadcast %138 : vector<1x32xf32> to vector<8x32xf32>
    %140 = arith.mulf %136, %139 : vector<8x32xf32>
    %c0_56 = arith.constant 0 : index
    %c0_57 = arith.constant 0 : index
    %c0_58 = arith.constant 0 : index
    %c0_59 = arith.constant 0 : index
    %141 = vector.load %arg7[%c0_56, %c0_57, %c0_58, %c0_59] : memref<2x3x1x32xf32, #tpu.memory_space<vmem>>, vector<1x1x1x32xf32>
    %142 = vector.shape_cast %141 : vector<1x1x1x32xf32> to vector<1x32xf32>
    %143 = vector.broadcast %142 : vector<1x32xf32> to vector<8x32xf32>
    %144 = arith.addf %140, %143 : vector<8x32xf32>
    %c0_60 = arith.constant 0 : index
    %c1 = arith.constant 1 : index
    %c0_61 = arith.constant 0 : index
    %c0_62 = arith.constant 0 : index
    %145 = vector.load %arg2[%c0_60, %c1, %c0_61, %c0_62] : memref<2x2x32x160xf32, #tpu.memory_space<vmem>>, vector<1x1x32x160xf32>
    %146 = vector.shape_cast %145 : vector<1x1x32x160xf32> to vector<32x160xf32>
    %cst_63 = arith.constant dense<0.000000e+00> : vector<8x160xf32>
    %147 = tpu.matmul %144, %146, %cst_63 {dimension_numbers = #tpu.dot_dimension_numbers<[1], [0], [0], [1], [0, 0, 1, 1], [], []>} : vector<8x32xf32>, vector<32x160xf32>, vector<8x160xf32> -> vector<8x160xf32>
    %c0_64 = arith.constant 0 : index
    %c1_65 = arith.constant 1 : index
    %c0_66 = arith.constant 0 : index
    %c0_67 = arith.constant 0 : index
    %148 = vector.load %arg3[%c0_64, %c1_65, %c0_66, %c0_67] : memref<2x2x1x160xf32, #tpu.memory_space<vmem>>, vector<1x1x1x160xf32>
    %149 = vector.shape_cast %148 : vector<1x1x1x160xf32> to vector<1x160xf32>
    %150 = vector.broadcast %149 : vector<1x160xf32> to vector<8x160xf32>
    %151 = arith.addf %147, %150 : vector<8x160xf32>
    %152 = vector.extract_strided_slice %151 {offsets = [0, 0], sizes = [8, 32], strides = [1, 1]} : vector<8x160xf32> to vector<8x32xf32>
    %153 = arith.mulf %152, %4 : vector<8x32xf32>
    %154 = vector.extract_strided_slice %151 {offsets = [0, 32], sizes = [8, 32], strides = [1, 1]} : vector<8x160xf32> to vector<8x32xf32>
    %155 = arith.mulf %154, %5 : vector<8x32xf32>
    %156 = arith.addf %153, %155 : vector<8x32xf32>
    %157 = vector.extract_strided_slice %151 {offsets = [0, 64], sizes = [8, 32], strides = [1, 1]} : vector<8x160xf32> to vector<8x32xf32>
    %158 = arith.mulf %157, %4 : vector<8x32xf32>
    %159 = vector.extract_strided_slice %151 {offsets = [0, 96], sizes = [8, 32], strides = [1, 1]} : vector<8x160xf32> to vector<8x32xf32>
    %160 = arith.mulf %159, %5 : vector<8x32xf32>
    %161 = arith.addf %158, %160 : vector<8x32xf32>
    %162 = vector.extract_strided_slice %151 {offsets = [0, 128], sizes = [8, 32], strides = [1, 1]} : vector<8x160xf32> to vector<8x32xf32>
    %c0_68 = arith.constant 0 : index
    %c1_69 = arith.constant 1 : index
    %c0_70 = arith.constant 0 : index
    %c0_71 = arith.constant 0 : index
    %163 = vector.load %arg4[%c0_68, %c1_69, %c0_70, %c0_71] : memref<2x2x32x32xf32, #tpu.memory_space<vmem>>, vector<1x1x32x32xf32>
    %164 = vector.shape_cast %163 : vector<1x1x32x32xf32> to vector<32x32xf32>
    %cst_72 = arith.constant 0.000000e+00 : f32
    %165 = vector.broadcast %cst_72 : f32 to vector<8x32xf32>
    %166 = vector.extract_strided_slice %156 {offsets = [0, 0], sizes = [8, 8], strides = [1, 1]} : vector<8x32xf32> to vector<8x8xf32>
    %167 = vector.extract_strided_slice %161 {offsets = [0, 0], sizes = [8, 8], strides = [1, 1]} : vector<8x32xf32> to vector<8x8xf32>
    %168 = tpu.transpose %167, [1, 0] : vector<8x8xf32> -> vector<8x8xf32>
    %cst_73 = arith.constant dense<0.000000e+00> : vector<8x8xf32>
    %169 = tpu.matmul %166, %168, %cst_73 {dimension_numbers = #tpu.dot_dimension_numbers<[1], [0], [0], [1], [0, 0, 1, 1], [], []>} : vector<8x8xf32>, vector<8x8xf32>, vector<8x8xf32> -> vector<8x8xf32>
    %170 = vector.broadcast %1 : f32 to vector<8x8xf32>
    %171 = arith.mulf %169, %170 : vector<8x8xf32>
    %172 = arith.addf %171, %6 : vector<8x8xf32>
    %cst_74 = arith.constant dense<0xFF800000> : vector<8xf32>
    %173 = vector.multi_reduction <maximumf>, %172, %cst_74 [1] : vector<8x8xf32> to vector<8xf32>
    %174 = vector.shape_cast %173 : vector<8xf32> to vector<8x1xf32>
    %175 = vector.broadcast %174 : vector<8x1xf32> to vector<8x8xf32>
    %176 = arith.subf %172, %175 : vector<8x8xf32>
    %177 = math.exp %176 : vector<8x8xf32>
    %cst_75 = arith.constant dense<0.000000e+00> : vector<8xf32>
    %178 = vector.multi_reduction <add>, %177, %cst_75 [1] : vector<8x8xf32> to vector<8xf32>
    %179 = vector.shape_cast %178 : vector<8xf32> to vector<8x1xf32>
    %180 = tpu.reciprocal %179 {approx = true} : vector<8x1xf32> -> vector<8x1xf32>
    %181 = vector.broadcast %180 : vector<8x1xf32> to vector<8x8xf32>
    %182 = arith.mulf %177, %181 : vector<8x8xf32>
    %183 = vector.extract_strided_slice %162 {offsets = [0, 0], sizes = [8, 8], strides = [1, 1]} : vector<8x32xf32> to vector<8x8xf32>
    %cst_76 = arith.constant dense<0.000000e+00> : vector<8x8xf32>
    %184 = tpu.matmul %182, %183, %cst_76 {dimension_numbers = #tpu.dot_dimension_numbers<[1], [0], [0], [1], [0, 0, 1, 1], [], []>} : vector<8x8xf32>, vector<8x8xf32>, vector<8x8xf32> -> vector<8x8xf32>
    %185 = vector.extract_strided_slice %164 {offsets = [0, 0], sizes = [8, 32], strides = [1, 1]} : vector<32x32xf32> to vector<8x32xf32>
    %cst_77 = arith.constant dense<0.000000e+00> : vector<8x32xf32>
    %186 = tpu.matmul %184, %185, %cst_77 {dimension_numbers = #tpu.dot_dimension_numbers<[1], [0], [0], [1], [0, 0, 1, 1], [], []>} : vector<8x8xf32>, vector<8x32xf32>, vector<8x32xf32> -> vector<8x32xf32>
    %187 = arith.addf %165, %186 : vector<8x32xf32>
    %188 = vector.extract_strided_slice %156 {offsets = [0, 8], sizes = [8, 8], strides = [1, 1]} : vector<8x32xf32> to vector<8x8xf32>
    %189 = vector.extract_strided_slice %161 {offsets = [0, 8], sizes = [8, 8], strides = [1, 1]} : vector<8x32xf32> to vector<8x8xf32>
    %190 = tpu.transpose %189, [1, 0] : vector<8x8xf32> -> vector<8x8xf32>
    %cst_78 = arith.constant dense<0.000000e+00> : vector<8x8xf32>
    %191 = tpu.matmul %188, %190, %cst_78 {dimension_numbers = #tpu.dot_dimension_numbers<[1], [0], [0], [1], [0, 0, 1, 1], [], []>} : vector<8x8xf32>, vector<8x8xf32>, vector<8x8xf32> -> vector<8x8xf32>
    %192 = vector.broadcast %1 : f32 to vector<8x8xf32>
    %193 = arith.mulf %191, %192 : vector<8x8xf32>
    %194 = arith.addf %193, %6 : vector<8x8xf32>
    %cst_79 = arith.constant dense<0xFF800000> : vector<8xf32>
    %195 = vector.multi_reduction <maximumf>, %194, %cst_79 [1] : vector<8x8xf32> to vector<8xf32>
    %196 = vector.shape_cast %195 : vector<8xf32> to vector<8x1xf32>
    %197 = vector.broadcast %196 : vector<8x1xf32> to vector<8x8xf32>
    %198 = arith.subf %194, %197 : vector<8x8xf32>
    %199 = math.exp %198 : vector<8x8xf32>
    %cst_80 = arith.constant dense<0.000000e+00> : vector<8xf32>
    %200 = vector.multi_reduction <add>, %199, %cst_80 [1] : vector<8x8xf32> to vector<8xf32>
    %201 = vector.shape_cast %200 : vector<8xf32> to vector<8x1xf32>
    %202 = tpu.reciprocal %201 {approx = true} : vector<8x1xf32> -> vector<8x1xf32>
    %203 = vector.broadcast %202 : vector<8x1xf32> to vector<8x8xf32>
    %204 = arith.mulf %199, %203 : vector<8x8xf32>
    %205 = vector.extract_strided_slice %162 {offsets = [0, 8], sizes = [8, 8], strides = [1, 1]} : vector<8x32xf32> to vector<8x8xf32>
    %cst_81 = arith.constant dense<0.000000e+00> : vector<8x8xf32>
    %206 = tpu.matmul %204, %205, %cst_81 {dimension_numbers = #tpu.dot_dimension_numbers<[1], [0], [0], [1], [0, 0, 1, 1], [], []>} : vector<8x8xf32>, vector<8x8xf32>, vector<8x8xf32> -> vector<8x8xf32>
    %207 = vector.extract_strided_slice %164 {offsets = [8, 0], sizes = [8, 32], strides = [1, 1]} : vector<32x32xf32> to vector<8x32xf32>
    %cst_82 = arith.constant dense<0.000000e+00> : vector<8x32xf32>
    %208 = tpu.matmul %206, %207, %cst_82 {dimension_numbers = #tpu.dot_dimension_numbers<[1], [0], [0], [1], [0, 0, 1, 1], [], []>} : vector<8x8xf32>, vector<8x32xf32>, vector<8x32xf32> -> vector<8x32xf32>
    %209 = arith.addf %187, %208 : vector<8x32xf32>
    %210 = vector.extract_strided_slice %156 {offsets = [0, 16], sizes = [8, 8], strides = [1, 1]} : vector<8x32xf32> to vector<8x8xf32>
    %211 = vector.extract_strided_slice %161 {offsets = [0, 16], sizes = [8, 8], strides = [1, 1]} : vector<8x32xf32> to vector<8x8xf32>
    %212 = tpu.transpose %211, [1, 0] : vector<8x8xf32> -> vector<8x8xf32>
    %cst_83 = arith.constant dense<0.000000e+00> : vector<8x8xf32>
    %213 = tpu.matmul %210, %212, %cst_83 {dimension_numbers = #tpu.dot_dimension_numbers<[1], [0], [0], [1], [0, 0, 1, 1], [], []>} : vector<8x8xf32>, vector<8x8xf32>, vector<8x8xf32> -> vector<8x8xf32>
    %214 = vector.broadcast %1 : f32 to vector<8x8xf32>
    %215 = arith.mulf %213, %214 : vector<8x8xf32>
    %216 = arith.addf %215, %6 : vector<8x8xf32>
    %cst_84 = arith.constant dense<0xFF800000> : vector<8xf32>
    %217 = vector.multi_reduction <maximumf>, %216, %cst_84 [1] : vector<8x8xf32> to vector<8xf32>
    %218 = vector.shape_cast %217 : vector<8xf32> to vector<8x1xf32>
    %219 = vector.broadcast %218 : vector<8x1xf32> to vector<8x8xf32>
    %220 = arith.subf %216, %219 : vector<8x8xf32>
    %221 = math.exp %220 : vector<8x8xf32>
    %cst_85 = arith.constant dense<0.000000e+00> : vector<8xf32>
    %222 = vector.multi_reduction <add>, %221, %cst_85 [1] : vector<8x8xf32> to vector<8xf32>
    %223 = vector.shape_cast %222 : vector<8xf32> to vector<8x1xf32>
    %224 = tpu.reciprocal %223 {approx = true} : vector<8x1xf32> -> vector<8x1xf32>
    %225 = vector.broadcast %224 : vector<8x1xf32> to vector<8x8xf32>
    %226 = arith.mulf %221, %225 : vector<8x8xf32>
    %227 = vector.extract_strided_slice %162 {offsets = [0, 16], sizes = [8, 8], strides = [1, 1]} : vector<8x32xf32> to vector<8x8xf32>
    %cst_86 = arith.constant dense<0.000000e+00> : vector<8x8xf32>
    %228 = tpu.matmul %226, %227, %cst_86 {dimension_numbers = #tpu.dot_dimension_numbers<[1], [0], [0], [1], [0, 0, 1, 1], [], []>} : vector<8x8xf32>, vector<8x8xf32>, vector<8x8xf32> -> vector<8x8xf32>
    %229 = vector.extract_strided_slice %164 {offsets = [16, 0], sizes = [8, 32], strides = [1, 1]} : vector<32x32xf32> to vector<8x32xf32>
    %cst_87 = arith.constant dense<0.000000e+00> : vector<8x32xf32>
    %230 = tpu.matmul %228, %229, %cst_87 {dimension_numbers = #tpu.dot_dimension_numbers<[1], [0], [0], [1], [0, 0, 1, 1], [], []>} : vector<8x8xf32>, vector<8x32xf32>, vector<8x32xf32> -> vector<8x32xf32>
    %231 = arith.addf %209, %230 : vector<8x32xf32>
    %232 = vector.extract_strided_slice %156 {offsets = [0, 24], sizes = [8, 8], strides = [1, 1]} : vector<8x32xf32> to vector<8x8xf32>
    %233 = vector.extract_strided_slice %161 {offsets = [0, 24], sizes = [8, 8], strides = [1, 1]} : vector<8x32xf32> to vector<8x8xf32>
    %234 = tpu.transpose %233, [1, 0] : vector<8x8xf32> -> vector<8x8xf32>
    %cst_88 = arith.constant dense<0.000000e+00> : vector<8x8xf32>
    %235 = tpu.matmul %232, %234, %cst_88 {dimension_numbers = #tpu.dot_dimension_numbers<[1], [0], [0], [1], [0, 0, 1, 1], [], []>} : vector<8x8xf32>, vector<8x8xf32>, vector<8x8xf32> -> vector<8x8xf32>
    %236 = vector.broadcast %1 : f32 to vector<8x8xf32>
    %237 = arith.mulf %235, %236 : vector<8x8xf32>
    %238 = arith.addf %237, %6 : vector<8x8xf32>
    %cst_89 = arith.constant dense<0xFF800000> : vector<8xf32>
    %239 = vector.multi_reduction <maximumf>, %238, %cst_89 [1] : vector<8x8xf32> to vector<8xf32>
    %240 = vector.shape_cast %239 : vector<8xf32> to vector<8x1xf32>
    %241 = vector.broadcast %240 : vector<8x1xf32> to vector<8x8xf32>
    %242 = arith.subf %238, %241 : vector<8x8xf32>
    %243 = math.exp %242 : vector<8x8xf32>
    %cst_90 = arith.constant dense<0.000000e+00> : vector<8xf32>
    %244 = vector.multi_reduction <add>, %243, %cst_90 [1] : vector<8x8xf32> to vector<8xf32>
    %245 = vector.shape_cast %244 : vector<8xf32> to vector<8x1xf32>
    %246 = tpu.reciprocal %245 {approx = true} : vector<8x1xf32> -> vector<8x1xf32>
    %247 = vector.broadcast %246 : vector<8x1xf32> to vector<8x8xf32>
    %248 = arith.mulf %243, %247 : vector<8x8xf32>
    %249 = vector.extract_strided_slice %162 {offsets = [0, 24], sizes = [8, 8], strides = [1, 1]} : vector<8x32xf32> to vector<8x8xf32>
    %cst_91 = arith.constant dense<0.000000e+00> : vector<8x8xf32>
    %250 = tpu.matmul %248, %249, %cst_91 {dimension_numbers = #tpu.dot_dimension_numbers<[1], [0], [0], [1], [0, 0, 1, 1], [], []>} : vector<8x8xf32>, vector<8x8xf32>, vector<8x8xf32> -> vector<8x8xf32>
    %251 = vector.extract_strided_slice %164 {offsets = [24, 0], sizes = [8, 32], strides = [1, 1]} : vector<32x32xf32> to vector<8x32xf32>
    %cst_92 = arith.constant dense<0.000000e+00> : vector<8x32xf32>
    %252 = tpu.matmul %250, %251, %cst_92 {dimension_numbers = #tpu.dot_dimension_numbers<[1], [0], [0], [1], [0, 0, 1, 1], [], []>} : vector<8x8xf32>, vector<8x32xf32>, vector<8x32xf32> -> vector<8x32xf32>
    %253 = arith.addf %231, %252 : vector<8x32xf32>
    %c0_93 = arith.constant 0 : index
    %c1_94 = arith.constant 1 : index
    %c0_95 = arith.constant 0 : index
    %c0_96 = arith.constant 0 : index
    %254 = vector.load %arg5[%c0_93, %c1_94, %c0_95, %c0_96] : memref<2x2x1x32xf32, #tpu.memory_space<vmem>>, vector<1x1x1x32xf32>
    %255 = vector.shape_cast %254 : vector<1x1x1x32xf32> to vector<1x32xf32>
    %256 = vector.broadcast %255 : vector<1x32xf32> to vector<8x32xf32>
    %257 = arith.addf %253, %256 : vector<8x32xf32>
    %258 = arith.addf %144, %257 : vector<8x32xf32>
    %cst_97 = arith.constant dense<0.000000e+00> : vector<8xf32>
    %259 = vector.multi_reduction <add>, %258, %cst_97 [1] : vector<8x32xf32> to vector<8xf32>
    %260 = vector.shape_cast %259 : vector<8xf32> to vector<8x1xf32>
    %cst_98 = arith.constant 3.200000e+01 : f32
    %261 = vector.broadcast %cst_98 : f32 to vector<8x1xf32>
    %262 = arith.divf %260, %261 : vector<8x1xf32>
    %263 = vector.broadcast %262 : vector<8x1xf32> to vector<8x32xf32>
    %264 = arith.subf %258, %263 : vector<8x32xf32>
    %265 = arith.mulf %264, %264 : vector<8x32xf32>
    %cst_99 = arith.constant dense<0.000000e+00> : vector<8xf32>
    %266 = vector.multi_reduction <add>, %265, %cst_99 [1] : vector<8x32xf32> to vector<8xf32>
    %267 = vector.shape_cast %266 : vector<8xf32> to vector<8x1xf32>
    %cst_100 = arith.constant 3.200000e+01 : f32
    %268 = vector.broadcast %cst_100 : f32 to vector<8x1xf32>
    %269 = arith.divf %267, %268 : vector<8x1xf32>
    %cst_101 = arith.constant 9.99999974E-6 : f32
    %270 = vector.broadcast %cst_101 : f32 to vector<8x1xf32>
    %271 = arith.addf %269, %270 : vector<8x1xf32>
    %272 = math.rsqrt %271 : vector<8x1xf32>
    %273 = vector.broadcast %272 : vector<8x1xf32> to vector<8x32xf32>
    %274 = arith.mulf %264, %273 : vector<8x32xf32>
    %c0_102 = arith.constant 0 : index
    %c1_103 = arith.constant 1 : index
    %c0_104 = arith.constant 0 : index
    %c0_105 = arith.constant 0 : index
    %275 = vector.load %arg6[%c0_102, %c1_103, %c0_104, %c0_105] : memref<2x3x1x32xf32, #tpu.memory_space<vmem>>, vector<1x1x1x32xf32>
    %276 = vector.shape_cast %275 : vector<1x1x1x32xf32> to vector<1x32xf32>
    %277 = vector.broadcast %276 : vector<1x32xf32> to vector<8x32xf32>
    %278 = arith.mulf %274, %277 : vector<8x32xf32>
    %c0_106 = arith.constant 0 : index
    %c1_107 = arith.constant 1 : index
    %c0_108 = arith.constant 0 : index
    %c0_109 = arith.constant 0 : index
    %279 = vector.load %arg7[%c0_106, %c1_107, %c0_108, %c0_109] : memref<2x3x1x32xf32, #tpu.memory_space<vmem>>, vector<1x1x1x32xf32>
    %280 = vector.shape_cast %279 : vector<1x1x1x32xf32> to vector<1x32xf32>
    %281 = vector.broadcast %280 : vector<1x32xf32> to vector<8x32xf32>
    %282 = arith.addf %278, %281 : vector<8x32xf32>
    %c0_110 = arith.constant 0 : index
    %c0_111 = arith.constant 0 : index
    %c0_112 = arith.constant 0 : index
    %283 = vector.load %arg8[%c0_110, %c0_111, %c0_112] : memref<2x32x128xf32, #tpu.memory_space<vmem>>, vector<1x32x128xf32>
    %284 = vector.shape_cast %283 : vector<1x32x128xf32> to vector<32x128xf32>
    %cst_113 = arith.constant dense<0.000000e+00> : vector<8x128xf32>
    %285 = tpu.matmul %282, %284, %cst_113 {dimension_numbers = #tpu.dot_dimension_numbers<[1], [0], [0], [1], [0, 0, 1, 1], [], []>} : vector<8x32xf32>, vector<32x128xf32>, vector<8x128xf32> -> vector<8x128xf32>
    %c0_114 = arith.constant 0 : index
    %c0_115 = arith.constant 0 : index
    %c0_116 = arith.constant 0 : index
    %286 = vector.load %arg9[%c0_114, %c0_115, %c0_116] : memref<2x1x128xf32, #tpu.memory_space<vmem>>, vector<1x1x128xf32>
    %287 = vector.shape_cast %286 : vector<1x1x128xf32> to vector<1x128xf32>
    %288 = vector.broadcast %287 : vector<1x128xf32> to vector<8x128xf32>
    %289 = arith.addf %285, %288 : vector<8x128xf32>
    %cst_117 = arith.constant 0.000000e+00 : f32
    %290 = vector.broadcast %cst_117 : f32 to vector<8x128xf32>
    %291 = arith.maximumf %289, %290 : vector<8x128xf32>
    %c0_118 = arith.constant 0 : index
    %c0_119 = arith.constant 0 : index
    %c0_120 = arith.constant 0 : index
    %292 = vector.load %arg10[%c0_118, %c0_119, %c0_120] : memref<2x128x32xf32, #tpu.memory_space<vmem>>, vector<1x128x32xf32>
    %293 = vector.shape_cast %292 : vector<1x128x32xf32> to vector<128x32xf32>
    %cst_121 = arith.constant dense<0.000000e+00> : vector<8x32xf32>
    %294 = tpu.matmul %291, %293, %cst_121 {dimension_numbers = #tpu.dot_dimension_numbers<[1], [0], [0], [1], [0, 0, 1, 1], [], []>} : vector<8x128xf32>, vector<128x32xf32>, vector<8x32xf32> -> vector<8x32xf32>
    %c0_122 = arith.constant 0 : index
    %c0_123 = arith.constant 0 : index
    %c0_124 = arith.constant 0 : index
    %295 = vector.load %arg11[%c0_122, %c0_123, %c0_124] : memref<2x1x32xf32, #tpu.memory_space<vmem>>, vector<1x1x32xf32>
    %296 = vector.shape_cast %295 : vector<1x1x32xf32> to vector<1x32xf32>
    %297 = vector.broadcast %296 : vector<1x32xf32> to vector<8x32xf32>
    %298 = arith.addf %294, %297 : vector<8x32xf32>
    %299 = arith.addf %282, %298 : vector<8x32xf32>
    %cst_125 = arith.constant dense<0.000000e+00> : vector<8xf32>
    %300 = vector.multi_reduction <add>, %299, %cst_125 [1] : vector<8x32xf32> to vector<8xf32>
    %301 = vector.shape_cast %300 : vector<8xf32> to vector<8x1xf32>
    %cst_126 = arith.constant 3.200000e+01 : f32
    %302 = vector.broadcast %cst_126 : f32 to vector<8x1xf32>
    %303 = arith.divf %301, %302 : vector<8x1xf32>
    %304 = vector.broadcast %303 : vector<8x1xf32> to vector<8x32xf32>
    %305 = arith.subf %299, %304 : vector<8x32xf32>
    %306 = arith.mulf %305, %305 : vector<8x32xf32>
    %cst_127 = arith.constant dense<0.000000e+00> : vector<8xf32>
    %307 = vector.multi_reduction <add>, %306, %cst_127 [1] : vector<8x32xf32> to vector<8xf32>
    %308 = vector.shape_cast %307 : vector<8xf32> to vector<8x1xf32>
    %cst_128 = arith.constant 3.200000e+01 : f32
    %309 = vector.broadcast %cst_128 : f32 to vector<8x1xf32>
    %310 = arith.divf %308, %309 : vector<8x1xf32>
    %cst_129 = arith.constant 9.99999974E-6 : f32
    %311 = vector.broadcast %cst_129 : f32 to vector<8x1xf32>
    %312 = arith.addf %310, %311 : vector<8x1xf32>
    %313 = math.rsqrt %312 : vector<8x1xf32>
    %314 = vector.broadcast %313 : vector<8x1xf32> to vector<8x32xf32>
    %315 = arith.mulf %305, %314 : vector<8x32xf32>
    %c0_130 = arith.constant 0 : index
    %c2 = arith.constant 2 : index
    %c0_131 = arith.constant 0 : index
    %c0_132 = arith.constant 0 : index
    %316 = vector.load %arg6[%c0_130, %c2, %c0_131, %c0_132] : memref<2x3x1x32xf32, #tpu.memory_space<vmem>>, vector<1x1x1x32xf32>
    %317 = vector.shape_cast %316 : vector<1x1x1x32xf32> to vector<1x32xf32>
    %318 = vector.broadcast %317 : vector<1x32xf32> to vector<8x32xf32>
    %319 = arith.mulf %315, %318 : vector<8x32xf32>
    %c0_133 = arith.constant 0 : index
    %c2_134 = arith.constant 2 : index
    %c0_135 = arith.constant 0 : index
    %c0_136 = arith.constant 0 : index
    %320 = vector.load %arg7[%c0_133, %c2_134, %c0_135, %c0_136] : memref<2x3x1x32xf32, #tpu.memory_space<vmem>>, vector<1x1x1x32xf32>
    %321 = vector.shape_cast %320 : vector<1x1x1x32xf32> to vector<1x32xf32>
    %322 = vector.broadcast %321 : vector<1x32xf32> to vector<8x32xf32>
    %323 = arith.addf %319, %322 : vector<8x32xf32>
    %c1_137 = arith.constant 1 : index
    %c0_138 = arith.constant 0 : index
    %c0_139 = arith.constant 0 : index
    %c0_140 = arith.constant 0 : index
    %324 = vector.load %arg2[%c1_137, %c0_138, %c0_139, %c0_140] : memref<2x2x32x160xf32, #tpu.memory_space<vmem>>, vector<1x1x32x160xf32>
    %325 = vector.shape_cast %324 : vector<1x1x32x160xf32> to vector<32x160xf32>
    %cst_141 = arith.constant dense<0.000000e+00> : vector<8x160xf32>
    %326 = tpu.matmul %323, %325, %cst_141 {dimension_numbers = #tpu.dot_dimension_numbers<[1], [0], [0], [1], [0, 0, 1, 1], [], []>} : vector<8x32xf32>, vector<32x160xf32>, vector<8x160xf32> -> vector<8x160xf32>
    %c1_142 = arith.constant 1 : index
    %c0_143 = arith.constant 0 : index
    %c0_144 = arith.constant 0 : index
    %c0_145 = arith.constant 0 : index
    %327 = vector.load %arg3[%c1_142, %c0_143, %c0_144, %c0_145] : memref<2x2x1x160xf32, #tpu.memory_space<vmem>>, vector<1x1x1x160xf32>
    %328 = vector.shape_cast %327 : vector<1x1x1x160xf32> to vector<1x160xf32>
    %329 = vector.broadcast %328 : vector<1x160xf32> to vector<8x160xf32>
    %330 = arith.addf %326, %329 : vector<8x160xf32>
    %331 = vector.extract_strided_slice %330 {offsets = [0, 0], sizes = [8, 32], strides = [1, 1]} : vector<8x160xf32> to vector<8x32xf32>
    %332 = arith.mulf %331, %4 : vector<8x32xf32>
    %333 = vector.extract_strided_slice %330 {offsets = [0, 32], sizes = [8, 32], strides = [1, 1]} : vector<8x160xf32> to vector<8x32xf32>
    %334 = arith.mulf %333, %5 : vector<8x32xf32>
    %335 = arith.addf %332, %334 : vector<8x32xf32>
    %336 = vector.extract_strided_slice %330 {offsets = [0, 64], sizes = [8, 32], strides = [1, 1]} : vector<8x160xf32> to vector<8x32xf32>
    %337 = arith.mulf %336, %4 : vector<8x32xf32>
    %338 = vector.extract_strided_slice %330 {offsets = [0, 96], sizes = [8, 32], strides = [1, 1]} : vector<8x160xf32> to vector<8x32xf32>
    %339 = arith.mulf %338, %5 : vector<8x32xf32>
    %340 = arith.addf %337, %339 : vector<8x32xf32>
    %341 = vector.extract_strided_slice %330 {offsets = [0, 128], sizes = [8, 32], strides = [1, 1]} : vector<8x160xf32> to vector<8x32xf32>
    %c1_146 = arith.constant 1 : index
    %c0_147 = arith.constant 0 : index
    %c0_148 = arith.constant 0 : index
    %c0_149 = arith.constant 0 : index
    %342 = vector.load %arg4[%c1_146, %c0_147, %c0_148, %c0_149] : memref<2x2x32x32xf32, #tpu.memory_space<vmem>>, vector<1x1x32x32xf32>
    %343 = vector.shape_cast %342 : vector<1x1x32x32xf32> to vector<32x32xf32>
    %cst_150 = arith.constant 0.000000e+00 : f32
    %344 = vector.broadcast %cst_150 : f32 to vector<8x32xf32>
    %345 = vector.extract_strided_slice %335 {offsets = [0, 0], sizes = [8, 8], strides = [1, 1]} : vector<8x32xf32> to vector<8x8xf32>
    %346 = vector.extract_strided_slice %340 {offsets = [0, 0], sizes = [8, 8], strides = [1, 1]} : vector<8x32xf32> to vector<8x8xf32>
    %347 = tpu.transpose %346, [1, 0] : vector<8x8xf32> -> vector<8x8xf32>
    %cst_151 = arith.constant dense<0.000000e+00> : vector<8x8xf32>
    %348 = tpu.matmul %345, %347, %cst_151 {dimension_numbers = #tpu.dot_dimension_numbers<[1], [0], [0], [1], [0, 0, 1, 1], [], []>} : vector<8x8xf32>, vector<8x8xf32>, vector<8x8xf32> -> vector<8x8xf32>
    %349 = vector.broadcast %1 : f32 to vector<8x8xf32>
    %350 = arith.mulf %348, %349 : vector<8x8xf32>
    %351 = arith.addf %350, %6 : vector<8x8xf32>
    %cst_152 = arith.constant dense<0xFF800000> : vector<8xf32>
    %352 = vector.multi_reduction <maximumf>, %351, %cst_152 [1] : vector<8x8xf32> to vector<8xf32>
    %353 = vector.shape_cast %352 : vector<8xf32> to vector<8x1xf32>
    %354 = vector.broadcast %353 : vector<8x1xf32> to vector<8x8xf32>
    %355 = arith.subf %351, %354 : vector<8x8xf32>
    %356 = math.exp %355 : vector<8x8xf32>
    %cst_153 = arith.constant dense<0.000000e+00> : vector<8xf32>
    %357 = vector.multi_reduction <add>, %356, %cst_153 [1] : vector<8x8xf32> to vector<8xf32>
    %358 = vector.shape_cast %357 : vector<8xf32> to vector<8x1xf32>
    %359 = tpu.reciprocal %358 {approx = true} : vector<8x1xf32> -> vector<8x1xf32>
    %360 = vector.broadcast %359 : vector<8x1xf32> to vector<8x8xf32>
    %361 = arith.mulf %356, %360 : vector<8x8xf32>
    %362 = vector.extract_strided_slice %341 {offsets = [0, 0], sizes = [8, 8], strides = [1, 1]} : vector<8x32xf32> to vector<8x8xf32>
    %cst_154 = arith.constant dense<0.000000e+00> : vector<8x8xf32>
    %363 = tpu.matmul %361, %362, %cst_154 {dimension_numbers = #tpu.dot_dimension_numbers<[1], [0], [0], [1], [0, 0, 1, 1], [], []>} : vector<8x8xf32>, vector<8x8xf32>, vector<8x8xf32> -> vector<8x8xf32>
    %364 = vector.extract_strided_slice %343 {offsets = [0, 0], sizes = [8, 32], strides = [1, 1]} : vector<32x32xf32> to vector<8x32xf32>
    %cst_155 = arith.constant dense<0.000000e+00> : vector<8x32xf32>
    %365 = tpu.matmul %363, %364, %cst_155 {dimension_numbers = #tpu.dot_dimension_numbers<[1], [0], [0], [1], [0, 0, 1, 1], [], []>} : vector<8x8xf32>, vector<8x32xf32>, vector<8x32xf32> -> vector<8x32xf32>
    %366 = arith.addf %344, %365 : vector<8x32xf32>
    %367 = vector.extract_strided_slice %335 {offsets = [0, 8], sizes = [8, 8], strides = [1, 1]} : vector<8x32xf32> to vector<8x8xf32>
    %368 = vector.extract_strided_slice %340 {offsets = [0, 8], sizes = [8, 8], strides = [1, 1]} : vector<8x32xf32> to vector<8x8xf32>
    %369 = tpu.transpose %368, [1, 0] : vector<8x8xf32> -> vector<8x8xf32>
    %cst_156 = arith.constant dense<0.000000e+00> : vector<8x8xf32>
    %370 = tpu.matmul %367, %369, %cst_156 {dimension_numbers = #tpu.dot_dimension_numbers<[1], [0], [0], [1], [0, 0, 1, 1], [], []>} : vector<8x8xf32>, vector<8x8xf32>, vector<8x8xf32> -> vector<8x8xf32>
    %371 = vector.broadcast %1 : f32 to vector<8x8xf32>
    %372 = arith.mulf %370, %371 : vector<8x8xf32>
    %373 = arith.addf %372, %6 : vector<8x8xf32>
    %cst_157 = arith.constant dense<0xFF800000> : vector<8xf32>
    %374 = vector.multi_reduction <maximumf>, %373, %cst_157 [1] : vector<8x8xf32> to vector<8xf32>
    %375 = vector.shape_cast %374 : vector<8xf32> to vector<8x1xf32>
    %376 = vector.broadcast %375 : vector<8x1xf32> to vector<8x8xf32>
    %377 = arith.subf %373, %376 : vector<8x8xf32>
    %378 = math.exp %377 : vector<8x8xf32>
    %cst_158 = arith.constant dense<0.000000e+00> : vector<8xf32>
    %379 = vector.multi_reduction <add>, %378, %cst_158 [1] : vector<8x8xf32> to vector<8xf32>
    %380 = vector.shape_cast %379 : vector<8xf32> to vector<8x1xf32>
    %381 = tpu.reciprocal %380 {approx = true} : vector<8x1xf32> -> vector<8x1xf32>
    %382 = vector.broadcast %381 : vector<8x1xf32> to vector<8x8xf32>
    %383 = arith.mulf %378, %382 : vector<8x8xf32>
    %384 = vector.extract_strided_slice %341 {offsets = [0, 8], sizes = [8, 8], strides = [1, 1]} : vector<8x32xf32> to vector<8x8xf32>
    %cst_159 = arith.constant dense<0.000000e+00> : vector<8x8xf32>
    %385 = tpu.matmul %383, %384, %cst_159 {dimension_numbers = #tpu.dot_dimension_numbers<[1], [0], [0], [1], [0, 0, 1, 1], [], []>} : vector<8x8xf32>, vector<8x8xf32>, vector<8x8xf32> -> vector<8x8xf32>
    %386 = vector.extract_strided_slice %343 {offsets = [8, 0], sizes = [8, 32], strides = [1, 1]} : vector<32x32xf32> to vector<8x32xf32>
    %cst_160 = arith.constant dense<0.000000e+00> : vector<8x32xf32>
    %387 = tpu.matmul %385, %386, %cst_160 {dimension_numbers = #tpu.dot_dimension_numbers<[1], [0], [0], [1], [0, 0, 1, 1], [], []>} : vector<8x8xf32>, vector<8x32xf32>, vector<8x32xf32> -> vector<8x32xf32>
    %388 = arith.addf %366, %387 : vector<8x32xf32>
    %389 = vector.extract_strided_slice %335 {offsets = [0, 16], sizes = [8, 8], strides = [1, 1]} : vector<8x32xf32> to vector<8x8xf32>
    %390 = vector.extract_strided_slice %340 {offsets = [0, 16], sizes = [8, 8], strides = [1, 1]} : vector<8x32xf32> to vector<8x8xf32>
    %391 = tpu.transpose %390, [1, 0] : vector<8x8xf32> -> vector<8x8xf32>
    %cst_161 = arith.constant dense<0.000000e+00> : vector<8x8xf32>
    %392 = tpu.matmul %389, %391, %cst_161 {dimension_numbers = #tpu.dot_dimension_numbers<[1], [0], [0], [1], [0, 0, 1, 1], [], []>} : vector<8x8xf32>, vector<8x8xf32>, vector<8x8xf32> -> vector<8x8xf32>
    %393 = vector.broadcast %1 : f32 to vector<8x8xf32>
    %394 = arith.mulf %392, %393 : vector<8x8xf32>
    %395 = arith.addf %394, %6 : vector<8x8xf32>
    %cst_162 = arith.constant dense<0xFF800000> : vector<8xf32>
    %396 = vector.multi_reduction <maximumf>, %395, %cst_162 [1] : vector<8x8xf32> to vector<8xf32>
    %397 = vector.shape_cast %396 : vector<8xf32> to vector<8x1xf32>
    %398 = vector.broadcast %397 : vector<8x1xf32> to vector<8x8xf32>
    %399 = arith.subf %395, %398 : vector<8x8xf32>
    %400 = math.exp %399 : vector<8x8xf32>
    %cst_163 = arith.constant dense<0.000000e+00> : vector<8xf32>
    %401 = vector.multi_reduction <add>, %400, %cst_163 [1] : vector<8x8xf32> to vector<8xf32>
    %402 = vector.shape_cast %401 : vector<8xf32> to vector<8x1xf32>
    %403 = tpu.reciprocal %402 {approx = true} : vector<8x1xf32> -> vector<8x1xf32>
    %404 = vector.broadcast %403 : vector<8x1xf32> to vector<8x8xf32>
    %405 = arith.mulf %400, %404 : vector<8x8xf32>
    %406 = vector.extract_strided_slice %341 {offsets = [0, 16], sizes = [8, 8], strides = [1, 1]} : vector<8x32xf32> to vector<8x8xf32>
    %cst_164 = arith.constant dense<0.000000e+00> : vector<8x8xf32>
    %407 = tpu.matmul %405, %406, %cst_164 {dimension_numbers = #tpu.dot_dimension_numbers<[1], [0], [0], [1], [0, 0, 1, 1], [], []>} : vector<8x8xf32>, vector<8x8xf32>, vector<8x8xf32> -> vector<8x8xf32>
    %408 = vector.extract_strided_slice %343 {offsets = [16, 0], sizes = [8, 32], strides = [1, 1]} : vector<32x32xf32> to vector<8x32xf32>
    %cst_165 = arith.constant dense<0.000000e+00> : vector<8x32xf32>
    %409 = tpu.matmul %407, %408, %cst_165 {dimension_numbers = #tpu.dot_dimension_numbers<[1], [0], [0], [1], [0, 0, 1, 1], [], []>} : vector<8x8xf32>, vector<8x32xf32>, vector<8x32xf32> -> vector<8x32xf32>
    %410 = arith.addf %388, %409 : vector<8x32xf32>
    %411 = vector.extract_strided_slice %335 {offsets = [0, 24], sizes = [8, 8], strides = [1, 1]} : vector<8x32xf32> to vector<8x8xf32>
    %412 = vector.extract_strided_slice %340 {offsets = [0, 24], sizes = [8, 8], strides = [1, 1]} : vector<8x32xf32> to vector<8x8xf32>
    %413 = tpu.transpose %412, [1, 0] : vector<8x8xf32> -> vector<8x8xf32>
    %cst_166 = arith.constant dense<0.000000e+00> : vector<8x8xf32>
    %414 = tpu.matmul %411, %413, %cst_166 {dimension_numbers = #tpu.dot_dimension_numbers<[1], [0], [0], [1], [0, 0, 1, 1], [], []>} : vector<8x8xf32>, vector<8x8xf32>, vector<8x8xf32> -> vector<8x8xf32>
    %415 = vector.broadcast %1 : f32 to vector<8x8xf32>
    %416 = arith.mulf %414, %415 : vector<8x8xf32>
    %417 = arith.addf %416, %6 : vector<8x8xf32>
    %cst_167 = arith.constant dense<0xFF800000> : vector<8xf32>
    %418 = vector.multi_reduction <maximumf>, %417, %cst_167 [1] : vector<8x8xf32> to vector<8xf32>
    %419 = vector.shape_cast %418 : vector<8xf32> to vector<8x1xf32>
    %420 = vector.broadcast %419 : vector<8x1xf32> to vector<8x8xf32>
    %421 = arith.subf %417, %420 : vector<8x8xf32>
    %422 = math.exp %421 : vector<8x8xf32>
    %cst_168 = arith.constant dense<0.000000e+00> : vector<8xf32>
    %423 = vector.multi_reduction <add>, %422, %cst_168 [1] : vector<8x8xf32> to vector<8xf32>
    %424 = vector.shape_cast %423 : vector<8xf32> to vector<8x1xf32>
    %425 = tpu.reciprocal %424 {approx = true} : vector<8x1xf32> -> vector<8x1xf32>
    %426 = vector.broadcast %425 : vector<8x1xf32> to vector<8x8xf32>
    %427 = arith.mulf %422, %426 : vector<8x8xf32>
    %428 = vector.extract_strided_slice %341 {offsets = [0, 24], sizes = [8, 8], strides = [1, 1]} : vector<8x32xf32> to vector<8x8xf32>
    %cst_169 = arith.constant dense<0.000000e+00> : vector<8x8xf32>
    %429 = tpu.matmul %427, %428, %cst_169 {dimension_numbers = #tpu.dot_dimension_numbers<[1], [0], [0], [1], [0, 0, 1, 1], [], []>} : vector<8x8xf32>, vector<8x8xf32>, vector<8x8xf32> -> vector<8x8xf32>
    %430 = vector.extract_strided_slice %343 {offsets = [24, 0], sizes = [8, 32], strides = [1, 1]} : vector<32x32xf32> to vector<8x32xf32>
    %cst_170 = arith.constant dense<0.000000e+00> : vector<8x32xf32>
    %431 = tpu.matmul %429, %430, %cst_170 {dimension_numbers = #tpu.dot_dimension_numbers<[1], [0], [0], [1], [0, 0, 1, 1], [], []>} : vector<8x8xf32>, vector<8x32xf32>, vector<8x32xf32> -> vector<8x32xf32>
    %432 = arith.addf %410, %431 : vector<8x32xf32>
    %c1_171 = arith.constant 1 : index
    %c0_172 = arith.constant 0 : index
    %c0_173 = arith.constant 0 : index
    %c0_174 = arith.constant 0 : index
    %433 = vector.load %arg5[%c1_171, %c0_172, %c0_173, %c0_174] : memref<2x2x1x32xf32, #tpu.memory_space<vmem>>, vector<1x1x1x32xf32>
    %434 = vector.shape_cast %433 : vector<1x1x1x32xf32> to vector<1x32xf32>
    %435 = vector.broadcast %434 : vector<1x32xf32> to vector<8x32xf32>
    %436 = arith.addf %432, %435 : vector<8x32xf32>
    %437 = arith.addf %323, %436 : vector<8x32xf32>
    %cst_175 = arith.constant dense<0.000000e+00> : vector<8xf32>
    %438 = vector.multi_reduction <add>, %437, %cst_175 [1] : vector<8x32xf32> to vector<8xf32>
    %439 = vector.shape_cast %438 : vector<8xf32> to vector<8x1xf32>
    %cst_176 = arith.constant 3.200000e+01 : f32
    %440 = vector.broadcast %cst_176 : f32 to vector<8x1xf32>
    %441 = arith.divf %439, %440 : vector<8x1xf32>
    %442 = vector.broadcast %441 : vector<8x1xf32> to vector<8x32xf32>
    %443 = arith.subf %437, %442 : vector<8x32xf32>
    %444 = arith.mulf %443, %443 : vector<8x32xf32>
    %cst_177 = arith.constant dense<0.000000e+00> : vector<8xf32>
    %445 = vector.multi_reduction <add>, %444, %cst_177 [1] : vector<8x32xf32> to vector<8xf32>
    %446 = vector.shape_cast %445 : vector<8xf32> to vector<8x1xf32>
    %cst_178 = arith.constant 3.200000e+01 : f32
    %447 = vector.broadcast %cst_178 : f32 to vector<8x1xf32>
    %448 = arith.divf %446, %447 : vector<8x1xf32>
    %cst_179 = arith.constant 9.99999974E-6 : f32
    %449 = vector.broadcast %cst_179 : f32 to vector<8x1xf32>
    %450 = arith.addf %448, %449 : vector<8x1xf32>
    %451 = math.rsqrt %450 : vector<8x1xf32>
    %452 = vector.broadcast %451 : vector<8x1xf32> to vector<8x32xf32>
    %453 = arith.mulf %443, %452 : vector<8x32xf32>
    %c1_180 = arith.constant 1 : index
    %c0_181 = arith.constant 0 : index
    %c0_182 = arith.constant 0 : index
    %c0_183 = arith.constant 0 : index
    %454 = vector.load %arg6[%c1_180, %c0_181, %c0_182, %c0_183] : memref<2x3x1x32xf32, #tpu.memory_space<vmem>>, vector<1x1x1x32xf32>
    %455 = vector.shape_cast %454 : vector<1x1x1x32xf32> to vector<1x32xf32>
    %456 = vector.broadcast %455 : vector<1x32xf32> to vector<8x32xf32>
    %457 = arith.mulf %453, %456 : vector<8x32xf32>
    %c1_184 = arith.constant 1 : index
    %c0_185 = arith.constant 0 : index
    %c0_186 = arith.constant 0 : index
    %c0_187 = arith.constant 0 : index
    %458 = vector.load %arg7[%c1_184, %c0_185, %c0_186, %c0_187] : memref<2x3x1x32xf32, #tpu.memory_space<vmem>>, vector<1x1x1x32xf32>
    %459 = vector.shape_cast %458 : vector<1x1x1x32xf32> to vector<1x32xf32>
    %460 = vector.broadcast %459 : vector<1x32xf32> to vector<8x32xf32>
    %461 = arith.addf %457, %460 : vector<8x32xf32>
    %c1_188 = arith.constant 1 : index
    %c1_189 = arith.constant 1 : index
    %c0_190 = arith.constant 0 : index
    %c0_191 = arith.constant 0 : index
    %462 = vector.load %arg2[%c1_188, %c1_189, %c0_190, %c0_191] : memref<2x2x32x160xf32, #tpu.memory_space<vmem>>, vector<1x1x32x160xf32>
    %463 = vector.shape_cast %462 : vector<1x1x32x160xf32> to vector<32x160xf32>
    %cst_192 = arith.constant dense<0.000000e+00> : vector<8x160xf32>
    %464 = tpu.matmul %461, %463, %cst_192 {dimension_numbers = #tpu.dot_dimension_numbers<[1], [0], [0], [1], [0, 0, 1, 1], [], []>} : vector<8x32xf32>, vector<32x160xf32>, vector<8x160xf32> -> vector<8x160xf32>
    %c1_193 = arith.constant 1 : index
    %c1_194 = arith.constant 1 : index
    %c0_195 = arith.constant 0 : index
    %c0_196 = arith.constant 0 : index
    %465 = vector.load %arg3[%c1_193, %c1_194, %c0_195, %c0_196] : memref<2x2x1x160xf32, #tpu.memory_space<vmem>>, vector<1x1x1x160xf32>
    %466 = vector.shape_cast %465 : vector<1x1x1x160xf32> to vector<1x160xf32>
    %467 = vector.broadcast %466 : vector<1x160xf32> to vector<8x160xf32>
    %468 = arith.addf %464, %467 : vector<8x160xf32>
    %469 = vector.extract_strided_slice %468 {offsets = [0, 0], sizes = [8, 32], strides = [1, 1]} : vector<8x160xf32> to vector<8x32xf32>
    %470 = arith.mulf %469, %4 : vector<8x32xf32>
    %471 = vector.extract_strided_slice %468 {offsets = [0, 32], sizes = [8, 32], strides = [1, 1]} : vector<8x160xf32> to vector<8x32xf32>
    %472 = arith.mulf %471, %5 : vector<8x32xf32>
    %473 = arith.addf %470, %472 : vector<8x32xf32>
    %474 = vector.extract_strided_slice %468 {offsets = [0, 64], sizes = [8, 32], strides = [1, 1]} : vector<8x160xf32> to vector<8x32xf32>
    %475 = arith.mulf %474, %4 : vector<8x32xf32>
    %476 = vector.extract_strided_slice %468 {offsets = [0, 96], sizes = [8, 32], strides = [1, 1]} : vector<8x160xf32> to vector<8x32xf32>
    %477 = arith.mulf %476, %5 : vector<8x32xf32>
    %478 = arith.addf %475, %477 : vector<8x32xf32>
    %479 = vector.extract_strided_slice %468 {offsets = [0, 128], sizes = [8, 32], strides = [1, 1]} : vector<8x160xf32> to vector<8x32xf32>
    %c1_197 = arith.constant 1 : index
    %c1_198 = arith.constant 1 : index
    %c0_199 = arith.constant 0 : index
    %c0_200 = arith.constant 0 : index
    %480 = vector.load %arg4[%c1_197, %c1_198, %c0_199, %c0_200] : memref<2x2x32x32xf32, #tpu.memory_space<vmem>>, vector<1x1x32x32xf32>
    %481 = vector.shape_cast %480 : vector<1x1x32x32xf32> to vector<32x32xf32>
    %cst_201 = arith.constant 0.000000e+00 : f32
    %482 = vector.broadcast %cst_201 : f32 to vector<8x32xf32>
    %483 = vector.extract_strided_slice %473 {offsets = [0, 0], sizes = [8, 8], strides = [1, 1]} : vector<8x32xf32> to vector<8x8xf32>
    %484 = vector.extract_strided_slice %478 {offsets = [0, 0], sizes = [8, 8], strides = [1, 1]} : vector<8x32xf32> to vector<8x8xf32>
    %485 = tpu.transpose %484, [1, 0] : vector<8x8xf32> -> vector<8x8xf32>
    %cst_202 = arith.constant dense<0.000000e+00> : vector<8x8xf32>
    %486 = tpu.matmul %483, %485, %cst_202 {dimension_numbers = #tpu.dot_dimension_numbers<[1], [0], [0], [1], [0, 0, 1, 1], [], []>} : vector<8x8xf32>, vector<8x8xf32>, vector<8x8xf32> -> vector<8x8xf32>
    %487 = vector.broadcast %1 : f32 to vector<8x8xf32>
    %488 = arith.mulf %486, %487 : vector<8x8xf32>
    %489 = arith.addf %488, %6 : vector<8x8xf32>
    %cst_203 = arith.constant dense<0xFF800000> : vector<8xf32>
    %490 = vector.multi_reduction <maximumf>, %489, %cst_203 [1] : vector<8x8xf32> to vector<8xf32>
    %491 = vector.shape_cast %490 : vector<8xf32> to vector<8x1xf32>
    %492 = vector.broadcast %491 : vector<8x1xf32> to vector<8x8xf32>
    %493 = arith.subf %489, %492 : vector<8x8xf32>
    %494 = math.exp %493 : vector<8x8xf32>
    %cst_204 = arith.constant dense<0.000000e+00> : vector<8xf32>
    %495 = vector.multi_reduction <add>, %494, %cst_204 [1] : vector<8x8xf32> to vector<8xf32>
    %496 = vector.shape_cast %495 : vector<8xf32> to vector<8x1xf32>
    %497 = tpu.reciprocal %496 {approx = true} : vector<8x1xf32> -> vector<8x1xf32>
    %498 = vector.broadcast %497 : vector<8x1xf32> to vector<8x8xf32>
    %499 = arith.mulf %494, %498 : vector<8x8xf32>
    %500 = vector.extract_strided_slice %479 {offsets = [0, 0], sizes = [8, 8], strides = [1, 1]} : vector<8x32xf32> to vector<8x8xf32>
    %cst_205 = arith.constant dense<0.000000e+00> : vector<8x8xf32>
    %501 = tpu.matmul %499, %500, %cst_205 {dimension_numbers = #tpu.dot_dimension_numbers<[1], [0], [0], [1], [0, 0, 1, 1], [], []>} : vector<8x8xf32>, vector<8x8xf32>, vector<8x8xf32> -> vector<8x8xf32>
    %502 = vector.extract_strided_slice %481 {offsets = [0, 0], sizes = [8, 32], strides = [1, 1]} : vector<32x32xf32> to vector<8x32xf32>
    %cst_206 = arith.constant dense<0.000000e+00> : vector<8x32xf32>
    %503 = tpu.matmul %501, %502, %cst_206 {dimension_numbers = #tpu.dot_dimension_numbers<[1], [0], [0], [1], [0, 0, 1, 1], [], []>} : vector<8x8xf32>, vector<8x32xf32>, vector<8x32xf32> -> vector<8x32xf32>
    %504 = arith.addf %482, %503 : vector<8x32xf32>
    %505 = vector.extract_strided_slice %473 {offsets = [0, 8], sizes = [8, 8], strides = [1, 1]} : vector<8x32xf32> to vector<8x8xf32>
    %506 = vector.extract_strided_slice %478 {offsets = [0, 8], sizes = [8, 8], strides = [1, 1]} : vector<8x32xf32> to vector<8x8xf32>
    %507 = tpu.transpose %506, [1, 0] : vector<8x8xf32> -> vector<8x8xf32>
    %cst_207 = arith.constant dense<0.000000e+00> : vector<8x8xf32>
    %508 = tpu.matmul %505, %507, %cst_207 {dimension_numbers = #tpu.dot_dimension_numbers<[1], [0], [0], [1], [0, 0, 1, 1], [], []>} : vector<8x8xf32>, vector<8x8xf32>, vector<8x8xf32> -> vector<8x8xf32>
    %509 = vector.broadcast %1 : f32 to vector<8x8xf32>
    %510 = arith.mulf %508, %509 : vector<8x8xf32>
    %511 = arith.addf %510, %6 : vector<8x8xf32>
    %cst_208 = arith.constant dense<0xFF800000> : vector<8xf32>
    %512 = vector.multi_reduction <maximumf>, %511, %cst_208 [1] : vector<8x8xf32> to vector<8xf32>
    %513 = vector.shape_cast %512 : vector<8xf32> to vector<8x1xf32>
    %514 = vector.broadcast %513 : vector<8x1xf32> to vector<8x8xf32>
    %515 = arith.subf %511, %514 : vector<8x8xf32>
    %516 = math.exp %515 : vector<8x8xf32>
    %cst_209 = arith.constant dense<0.000000e+00> : vector<8xf32>
    %517 = vector.multi_reduction <add>, %516, %cst_209 [1] : vector<8x8xf32> to vector<8xf32>
    %518 = vector.shape_cast %517 : vector<8xf32> to vector<8x1xf32>
    %519 = tpu.reciprocal %518 {approx = true} : vector<8x1xf32> -> vector<8x1xf32>
    %520 = vector.broadcast %519 : vector<8x1xf32> to vector<8x8xf32>
    %521 = arith.mulf %516, %520 : vector<8x8xf32>
    %522 = vector.extract_strided_slice %479 {offsets = [0, 8], sizes = [8, 8], strides = [1, 1]} : vector<8x32xf32> to vector<8x8xf32>
    %cst_210 = arith.constant dense<0.000000e+00> : vector<8x8xf32>
    %523 = tpu.matmul %521, %522, %cst_210 {dimension_numbers = #tpu.dot_dimension_numbers<[1], [0], [0], [1], [0, 0, 1, 1], [], []>} : vector<8x8xf32>, vector<8x8xf32>, vector<8x8xf32> -> vector<8x8xf32>
    %524 = vector.extract_strided_slice %481 {offsets = [8, 0], sizes = [8, 32], strides = [1, 1]} : vector<32x32xf32> to vector<8x32xf32>
    %cst_211 = arith.constant dense<0.000000e+00> : vector<8x32xf32>
    %525 = tpu.matmul %523, %524, %cst_211 {dimension_numbers = #tpu.dot_dimension_numbers<[1], [0], [0], [1], [0, 0, 1, 1], [], []>} : vector<8x8xf32>, vector<8x32xf32>, vector<8x32xf32> -> vector<8x32xf32>
    %526 = arith.addf %504, %525 : vector<8x32xf32>
    %527 = vector.extract_strided_slice %473 {offsets = [0, 16], sizes = [8, 8], strides = [1, 1]} : vector<8x32xf32> to vector<8x8xf32>
    %528 = vector.extract_strided_slice %478 {offsets = [0, 16], sizes = [8, 8], strides = [1, 1]} : vector<8x32xf32> to vector<8x8xf32>
    %529 = tpu.transpose %528, [1, 0] : vector<8x8xf32> -> vector<8x8xf32>
    %cst_212 = arith.constant dense<0.000000e+00> : vector<8x8xf32>
    %530 = tpu.matmul %527, %529, %cst_212 {dimension_numbers = #tpu.dot_dimension_numbers<[1], [0], [0], [1], [0, 0, 1, 1], [], []>} : vector<8x8xf32>, vector<8x8xf32>, vector<8x8xf32> -> vector<8x8xf32>
    %531 = vector.broadcast %1 : f32 to vector<8x8xf32>
    %532 = arith.mulf %530, %531 : vector<8x8xf32>
    %533 = arith.addf %532, %6 : vector<8x8xf32>
    %cst_213 = arith.constant dense<0xFF800000> : vector<8xf32>
    %534 = vector.multi_reduction <maximumf>, %533, %cst_213 [1] : vector<8x8xf32> to vector<8xf32>
    %535 = vector.shape_cast %534 : vector<8xf32> to vector<8x1xf32>
    %536 = vector.broadcast %535 : vector<8x1xf32> to vector<8x8xf32>
    %537 = arith.subf %533, %536 : vector<8x8xf32>
    %538 = math.exp %537 : vector<8x8xf32>
    %cst_214 = arith.constant dense<0.000000e+00> : vector<8xf32>
    %539 = vector.multi_reduction <add>, %538, %cst_214 [1] : vector<8x8xf32> to vector<8xf32>
    %540 = vector.shape_cast %539 : vector<8xf32> to vector<8x1xf32>
    %541 = tpu.reciprocal %540 {approx = true} : vector<8x1xf32> -> vector<8x1xf32>
    %542 = vector.broadcast %541 : vector<8x1xf32> to vector<8x8xf32>
    %543 = arith.mulf %538, %542 : vector<8x8xf32>
    %544 = vector.extract_strided_slice %479 {offsets = [0, 16], sizes = [8, 8], strides = [1, 1]} : vector<8x32xf32> to vector<8x8xf32>
    %cst_215 = arith.constant dense<0.000000e+00> : vector<8x8xf32>
    %545 = tpu.matmul %543, %544, %cst_215 {dimension_numbers = #tpu.dot_dimension_numbers<[1], [0], [0], [1], [0, 0, 1, 1], [], []>} : vector<8x8xf32>, vector<8x8xf32>, vector<8x8xf32> -> vector<8x8xf32>
    %546 = vector.extract_strided_slice %481 {offsets = [16, 0], sizes = [8, 32], strides = [1, 1]} : vector<32x32xf32> to vector<8x32xf32>
    %cst_216 = arith.constant dense<0.000000e+00> : vector<8x32xf32>
    %547 = tpu.matmul %545, %546, %cst_216 {dimension_numbers = #tpu.dot_dimension_numbers<[1], [0], [0], [1], [0, 0, 1, 1], [], []>} : vector<8x8xf32>, vector<8x32xf32>, vector<8x32xf32> -> vector<8x32xf32>
    %548 = arith.addf %526, %547 : vector<8x32xf32>
    %549 = vector.extract_strided_slice %473 {offsets = [0, 24], sizes = [8, 8], strides = [1, 1]} : vector<8x32xf32> to vector<8x8xf32>
    %550 = vector.extract_strided_slice %478 {offsets = [0, 24], sizes = [8, 8], strides = [1, 1]} : vector<8x32xf32> to vector<8x8xf32>
    %551 = tpu.transpose %550, [1, 0] : vector<8x8xf32> -> vector<8x8xf32>
    %cst_217 = arith.constant dense<0.000000e+00> : vector<8x8xf32>
    %552 = tpu.matmul %549, %551, %cst_217 {dimension_numbers = #tpu.dot_dimension_numbers<[1], [0], [0], [1], [0, 0, 1, 1], [], []>} : vector<8x8xf32>, vector<8x8xf32>, vector<8x8xf32> -> vector<8x8xf32>
    %553 = vector.broadcast %1 : f32 to vector<8x8xf32>
    %554 = arith.mulf %552, %553 : vector<8x8xf32>
    %555 = arith.addf %554, %6 : vector<8x8xf32>
    %cst_218 = arith.constant dense<0xFF800000> : vector<8xf32>
    %556 = vector.multi_reduction <maximumf>, %555, %cst_218 [1] : vector<8x8xf32> to vector<8xf32>
    %557 = vector.shape_cast %556 : vector<8xf32> to vector<8x1xf32>
    %558 = vector.broadcast %557 : vector<8x1xf32> to vector<8x8xf32>
    %559 = arith.subf %555, %558 : vector<8x8xf32>
    %560 = math.exp %559 : vector<8x8xf32>
    %cst_219 = arith.constant dense<0.000000e+00> : vector<8xf32>
    %561 = vector.multi_reduction <add>, %560, %cst_219 [1] : vector<8x8xf32> to vector<8xf32>
    %562 = vector.shape_cast %561 : vector<8xf32> to vector<8x1xf32>
    %563 = tpu.reciprocal %562 {approx = true} : vector<8x1xf32> -> vector<8x1xf32>
    %564 = vector.broadcast %563 : vector<8x1xf32> to vector<8x8xf32>
    %565 = arith.mulf %560, %564 : vector<8x8xf32>
    %566 = vector.extract_strided_slice %479 {offsets = [0, 24], sizes = [8, 8], strides = [1, 1]} : vector<8x32xf32> to vector<8x8xf32>
    %cst_220 = arith.constant dense<0.000000e+00> : vector<8x8xf32>
    %567 = tpu.matmul %565, %566, %cst_220 {dimension_numbers = #tpu.dot_dimension_numbers<[1], [0], [0], [1], [0, 0, 1, 1], [], []>} : vector<8x8xf32>, vector<8x8xf32>, vector<8x8xf32> -> vector<8x8xf32>
    %568 = vector.extract_strided_slice %481 {offsets = [24, 0], sizes = [8, 32], strides = [1, 1]} : vector<32x32xf32> to vector<8x32xf32>
    %cst_221 = arith.constant dense<0.000000e+00> : vector<8x32xf32>
    %569 = tpu.matmul %567, %568, %cst_221 {dimension_numbers = #tpu.dot_dimension_numbers<[1], [0], [0], [1], [0, 0, 1, 1], [], []>} : vector<8x8xf32>, vector<8x32xf32>, vector<8x32xf32> -> vector<8x32xf32>
    %570 = arith.addf %548, %569 : vector<8x32xf32>
    %c1_222 = arith.constant 1 : index
    %c1_223 = arith.constant 1 : index
    %c0_224 = arith.constant 0 : index
    %c0_225 = arith.constant 0 : index
    %571 = vector.load %arg5[%c1_222, %c1_223, %c0_224, %c0_225] : memref<2x2x1x32xf32, #tpu.memory_space<vmem>>, vector<1x1x1x32xf32>
    %572 = vector.shape_cast %571 : vector<1x1x1x32xf32> to vector<1x32xf32>
    %573 = vector.broadcast %572 : vector<1x32xf32> to vector<8x32xf32>
    %574 = arith.addf %570, %573 : vector<8x32xf32>
    %575 = arith.addf %461, %574 : vector<8x32xf32>
    %cst_226 = arith.constant dense<0.000000e+00> : vector<8xf32>
    %576 = vector.multi_reduction <add>, %575, %cst_226 [1] : vector<8x32xf32> to vector<8xf32>
    %577 = vector.shape_cast %576 : vector<8xf32> to vector<8x1xf32>
    %cst_227 = arith.constant 3.200000e+01 : f32
    %578 = vector.broadcast %cst_227 : f32 to vector<8x1xf32>
    %579 = arith.divf %577, %578 : vector<8x1xf32>
    %580 = vector.broadcast %579 : vector<8x1xf32> to vector<8x32xf32>
    %581 = arith.subf %575, %580 : vector<8x32xf32>
    %582 = arith.mulf %581, %581 : vector<8x32xf32>
    %cst_228 = arith.constant dense<0.000000e+00> : vector<8xf32>
    %583 = vector.multi_reduction <add>, %582, %cst_228 [1] : vector<8x32xf32> to vector<8xf32>
    %584 = vector.shape_cast %583 : vector<8xf32> to vector<8x1xf32>
    %cst_229 = arith.constant 3.200000e+01 : f32
    %585 = vector.broadcast %cst_229 : f32 to vector<8x1xf32>
    %586 = arith.divf %584, %585 : vector<8x1xf32>
    %cst_230 = arith.constant 9.99999974E-6 : f32
    %587 = vector.broadcast %cst_230 : f32 to vector<8x1xf32>
    %588 = arith.addf %586, %587 : vector<8x1xf32>
    %589 = math.rsqrt %588 : vector<8x1xf32>
    %590 = vector.broadcast %589 : vector<8x1xf32> to vector<8x32xf32>
    %591 = arith.mulf %581, %590 : vector<8x32xf32>
    %c1_231 = arith.constant 1 : index
    %c1_232 = arith.constant 1 : index
    %c0_233 = arith.constant 0 : index
    %c0_234 = arith.constant 0 : index
    %592 = vector.load %arg6[%c1_231, %c1_232, %c0_233, %c0_234] : memref<2x3x1x32xf32, #tpu.memory_space<vmem>>, vector<1x1x1x32xf32>
    %593 = vector.shape_cast %592 : vector<1x1x1x32xf32> to vector<1x32xf32>
    %594 = vector.broadcast %593 : vector<1x32xf32> to vector<8x32xf32>
    %595 = arith.mulf %591, %594 : vector<8x32xf32>
    %c1_235 = arith.constant 1 : index
    %c1_236 = arith.constant 1 : index
    %c0_237 = arith.constant 0 : index
    %c0_238 = arith.constant 0 : index
    %596 = vector.load %arg7[%c1_235, %c1_236, %c0_237, %c0_238] : memref<2x3x1x32xf32, #tpu.memory_space<vmem>>, vector<1x1x1x32xf32>
    %597 = vector.shape_cast %596 : vector<1x1x1x32xf32> to vector<1x32xf32>
    %598 = vector.broadcast %597 : vector<1x32xf32> to vector<8x32xf32>
    %599 = arith.addf %595, %598 : vector<8x32xf32>
    %c1_239 = arith.constant 1 : index
    %c0_240 = arith.constant 0 : index
    %c0_241 = arith.constant 0 : index
    %600 = vector.load %arg8[%c1_239, %c0_240, %c0_241] : memref<2x32x128xf32, #tpu.memory_space<vmem>>, vector<1x32x128xf32>
    %601 = vector.shape_cast %600 : vector<1x32x128xf32> to vector<32x128xf32>
    %cst_242 = arith.constant dense<0.000000e+00> : vector<8x128xf32>
    %602 = tpu.matmul %599, %601, %cst_242 {dimension_numbers = #tpu.dot_dimension_numbers<[1], [0], [0], [1], [0, 0, 1, 1], [], []>} : vector<8x32xf32>, vector<32x128xf32>, vector<8x128xf32> -> vector<8x128xf32>
    %c1_243 = arith.constant 1 : index
    %c0_244 = arith.constant 0 : index
    %c0_245 = arith.constant 0 : index
    %603 = vector.load %arg9[%c1_243, %c0_244, %c0_245] : memref<2x1x128xf32, #tpu.memory_space<vmem>>, vector<1x1x128xf32>
    %604 = vector.shape_cast %603 : vector<1x1x128xf32> to vector<1x128xf32>
    %605 = vector.broadcast %604 : vector<1x128xf32> to vector<8x128xf32>
    %606 = arith.addf %602, %605 : vector<8x128xf32>
    %cst_246 = arith.constant 0.000000e+00 : f32
    %607 = vector.broadcast %cst_246 : f32 to vector<8x128xf32>
    %608 = arith.maximumf %606, %607 : vector<8x128xf32>
    %c1_247 = arith.constant 1 : index
    %c0_248 = arith.constant 0 : index
    %c0_249 = arith.constant 0 : index
    %609 = vector.load %arg10[%c1_247, %c0_248, %c0_249] : memref<2x128x32xf32, #tpu.memory_space<vmem>>, vector<1x128x32xf32>
    %610 = vector.shape_cast %609 : vector<1x128x32xf32> to vector<128x32xf32>
    %cst_250 = arith.constant dense<0.000000e+00> : vector<8x32xf32>
    %611 = tpu.matmul %608, %610, %cst_250 {dimension_numbers = #tpu.dot_dimension_numbers<[1], [0], [0], [1], [0, 0, 1, 1], [], []>} : vector<8x128xf32>, vector<128x32xf32>, vector<8x32xf32> -> vector<8x32xf32>
    %c1_251 = arith.constant 1 : index
    %c0_252 = arith.constant 0 : index
    %c0_253 = arith.constant 0 : index
    %612 = vector.load %arg11[%c1_251, %c0_252, %c0_253] : memref<2x1x32xf32, #tpu.memory_space<vmem>>, vector<1x1x32xf32>
    %613 = vector.shape_cast %612 : vector<1x1x32xf32> to vector<1x32xf32>
    %614 = vector.broadcast %613 : vector<1x32xf32> to vector<8x32xf32>
    %615 = arith.addf %611, %614 : vector<8x32xf32>
    %616 = arith.addf %599, %615 : vector<8x32xf32>
    %cst_254 = arith.constant dense<0.000000e+00> : vector<8xf32>
    %617 = vector.multi_reduction <add>, %616, %cst_254 [1] : vector<8x32xf32> to vector<8xf32>
    %618 = vector.shape_cast %617 : vector<8xf32> to vector<8x1xf32>
    %cst_255 = arith.constant 3.200000e+01 : f32
    %619 = vector.broadcast %cst_255 : f32 to vector<8x1xf32>
    %620 = arith.divf %618, %619 : vector<8x1xf32>
    %621 = vector.broadcast %620 : vector<8x1xf32> to vector<8x32xf32>
    %622 = arith.subf %616, %621 : vector<8x32xf32>
    %623 = arith.mulf %622, %622 : vector<8x32xf32>
    %cst_256 = arith.constant dense<0.000000e+00> : vector<8xf32>
    %624 = vector.multi_reduction <add>, %623, %cst_256 [1] : vector<8x32xf32> to vector<8xf32>
    %625 = vector.shape_cast %624 : vector<8xf32> to vector<8x1xf32>
    %cst_257 = arith.constant 3.200000e+01 : f32
    %626 = vector.broadcast %cst_257 : f32 to vector<8x1xf32>
    %627 = arith.divf %625, %626 : vector<8x1xf32>
    %cst_258 = arith.constant 9.99999974E-6 : f32
    %628 = vector.broadcast %cst_258 : f32 to vector<8x1xf32>
    %629 = arith.addf %627, %628 : vector<8x1xf32>
    %630 = math.rsqrt %629 : vector<8x1xf32>
    %631 = vector.broadcast %630 : vector<8x1xf32> to vector<8x32xf32>
    %632 = arith.mulf %622, %631 : vector<8x32xf32>
    %c1_259 = arith.constant 1 : index
    %c2_260 = arith.constant 2 : index
    %c0_261 = arith.constant 0 : index
    %c0_262 = arith.constant 0 : index
    %633 = vector.load %arg6[%c1_259, %c2_260, %c0_261, %c0_262] : memref<2x3x1x32xf32, #tpu.memory_space<vmem>>, vector<1x1x1x32xf32>
    %634 = vector.shape_cast %633 : vector<1x1x1x32xf32> to vector<1x32xf32>
    %635 = vector.broadcast %634 : vector<1x32xf32> to vector<8x32xf32>
    %636 = arith.mulf %632, %635 : vector<8x32xf32>
    %c1_263 = arith.constant 1 : index
    %c2_264 = arith.constant 2 : index
    %c0_265 = arith.constant 0 : index
    %c0_266 = arith.constant 0 : index
    %637 = vector.load %arg7[%c1_263, %c2_264, %c0_265, %c0_266] : memref<2x3x1x32xf32, #tpu.memory_space<vmem>>, vector<1x1x1x32xf32>
    %638 = vector.shape_cast %637 : vector<1x1x1x32xf32> to vector<1x32xf32>
    %639 = vector.broadcast %638 : vector<1x32xf32> to vector<8x32xf32>
    %640 = arith.addf %636, %639 : vector<8x32xf32>
    %c0_267 = arith.constant 0 : index
    %c0_268 = arith.constant 0 : index
    %c0_269 = arith.constant 0 : index
    %641 = vector.load %arg15[%c0_267, %c0_268, %c0_269] : memref<1x8x32xf32, #tpu.memory_space<vmem>>, vector<1x8x32xf32>
    %642 = vector.shape_cast %641 : vector<1x8x32xf32> to vector<8x32xf32>
    %643 = vector.shape_cast %640 : vector<8x32xf32> to vector<1x8x32xf32>
    tpu.vector_store %arg15[%c0_267, %c0_268, %c0_269], %643 {strides = array<i32>} : memref<1x8x32xf32, #tpu.memory_space<vmem>>, vector<1x8x32xf32>,
    return
  }
  func.func @transform_0(%arg0: i32) -> (i32, i32, i32) {
    %c0_i32 = arith.constant 0 : i32
    %c0_i32_0 = arith.constant 0 : i32
    %c0_i32_1 = arith.constant 0 : i32
    return %arg0, %c0_i32, %c0_i32_0 : i32, i32, i32
  }
  func.func @transform_1(%arg0: i32) -> (i32, i32, i32, i32) {
    %c0_i32 = arith.constant 0 : i32
    %c0_i32_0 = arith.constant 0 : i32
    %c0_i32_1 = arith.constant 0 : i32
    %c0_i32_2 = arith.constant 0 : i32
    %c0_i32_3 = arith.constant 0 : i32
    return %c0_i32, %c0_i32_0, %c0_i32_1, %c0_i32_2 : i32, i32, i32, i32
  }
  func.func @transform_2(%arg0: i32) -> (i32, i32, i32, i32) {
    %c0_i32 = arith.constant 0 : i32
    %c0_i32_0 = arith.constant 0 : i32
    %c0_i32_1 = arith.constant 0 : i32
    %c0_i32_2 = arith.constant 0 : i32
    %c0_i32_3 = arith.constant 0 : i32
    return %c0_i32, %c0_i32_0, %c0_i32_1, %c0_i32_2 : i32, i32, i32, i32
  }
  func.func @transform_3(%arg0: i32) -> (i32, i32, i32, i32) {
    %c0_i32 = arith.constant 0 : i32
    %c0_i32_0 = arith.constant 0 : i32
    %c0_i32_1 = arith.constant 0 : i32
    %c0_i32_2 = arith.constant 0 : i32
    %c0_i32_3 = arith.constant 0 : i32
    return %c0_i32, %c0_i32_0, %c0_i32_1, %c0_i32_2 : i32, i32, i32, i32
  }
  func.func @transform_4(%arg0: i32) -> (i32, i32, i32, i32) {
    %c0_i32 = arith.constant 0 : i32
    %c0_i32_0 = arith.constant 0 : i32
    %c0_i32_1 = arith.constant 0 : i32
    %c0_i32_2 = arith.constant 0 : i32
    %c0_i32_3 = arith.constant 0 : i32
    return %c0_i32, %c0_i32_0, %c0_i32_1, %c0_i32_2 : i32, i32, i32, i32
  }
  func.func @transform_5(%arg0: i32) -> (i32, i32, i32, i32) {
    %c0_i32 = arith.constant 0 : i32
    %c0_i32_0 = arith.constant 0 : i32
    %c0_i32_1 = arith.constant 0 : i32
    %c0_i32_2 = arith.constant 0 : i32
    %c0_i32_3 = arith.constant 0 : i32
    return %c0_i32, %c0_i32_0, %c0_i32_1, %c0_i32_2 : i32, i32, i32, i32
  }
  func.func @transform_6(%arg0: i32) -> (i32, i32, i32, i32) {
    %c0_i32 = arith.constant 0 : i32
    %c0_i32_0 = arith.constant 0 : i32
    %c0_i32_1 = arith.constant 0 : i32
    %c0_i32_2 = arith.constant 0 : i32
    %c0_i32_3 = arith.constant 0 : i32
    return %c0_i32, %c0_i32_0, %c0_i32_1, %c0_i32_2 : i32, i32, i32, i32
  }
  func.func @transform_7(%arg0: i32) -> (i32, i32, i32) {
    %c0_i32 = arith.constant 0 : i32
    %c0_i32_0 = arith.constant 0 : i32
    %c0_i32_1 = arith.constant 0 : i32
    %c0_i32_2 = arith.constant 0 : i32
    return %c0_i32, %c0_i32_0, %c0_i32_1 : i32, i32, i32
  }
  func.func @transform_8(%arg0: i32) -> (i32, i32, i32) {
    %c0_i32 = arith.constant 0 : i32
    %c0_i32_0 = arith.constant 0 : i32
    %c0_i32_1 = arith.constant 0 : i32
    %c0_i32_2 = arith.constant 0 : i32
    return %c0_i32, %c0_i32_0, %c0_i32_1 : i32, i32, i32
  }
  func.func @transform_9(%arg0: i32) -> (i32, i32, i32) {
    %c0_i32 = arith.constant 0 : i32
    %c0_i32_0 = arith.constant 0 : i32
    %c0_i32_1 = arith.constant 0 : i32
    %c0_i32_2 = arith.constant 0 : i32
    return %c0_i32, %c0_i32_0, %c0_i32_1 : i32, i32, i32
  }
  func.func @transform_10(%arg0: i32) -> (i32, i32, i32) {
    %c0_i32 = arith.constant 0 : i32
    %c0_i32_0 = arith.constant 0 : i32
    %c0_i32_1 = arith.constant 0 : i32
    %c0_i32_2 = arith.constant 0 : i32
    return %c0_i32, %c0_i32_0, %c0_i32_1 : i32, i32, i32
  }
  func.func @transform_11(%arg0: i32) -> (i32, i32) {
    %c0_i32 = arith.constant 0 : i32
    %c0_i32_0 = arith.constant 0 : i32
    %c0_i32_1 = arith.constant 0 : i32
    return %c0_i32, %c0_i32_0 : i32, i32
  }
  func.func @transform_12(%arg0: i32) -> (i32, i32) {
    %c0_i32 = arith.constant 0 : i32
    %c0_i32_0 = arith.constant 0 : i32
    %c0_i32_1 = arith.constant 0 : i32
    return %c0_i32, %c0_i32_0 : i32, i32
  }
  func.func @transform_13(%arg0: i32) -> (i32, i32) {
    %c0_i32 = arith.constant 0 : i32
    %c0_i32_0 = arith.constant 0 : i32
    %c0_i32_1 = arith.constant 0 : i32
    return %c0_i32, %c0_i32_0 : i32, i32
  }
  func.func @transform_14(%arg0: i32) -> (i32, i32, i32) {
    %c0_i32 = arith.constant 0 : i32
    %c0_i32_0 = arith.constant 0 : i32
    %c0_i32_1 = arith.constant 0 : i32
    return %arg0, %c0_i32, %c0_i32_0 : i32, i32, i32
  }
}

</mosaic_0001>

<bundles_post_ra>
// kernel: tpu_custom_call.1
= control target key start
LH: loop header
LB: loop body
LE: loop exit
PB: predicated region body
PF: predicated region fallthrough
CT: control target
= control target key end

     0   :  { %s7893_s0 = inlined_call_operand.hbm [shape: f32[2,8,32], index: 0, kind: input, shape index: {}]   ;;  %s7894_s1 = inlined_call_operand.vmem [shape: f32[2,2,32,160], index: 1, kind: input, shape index: {}]   ;;  %s7895_s2 = inlined_call_operand.hbm [shape: f32[2,2,1,160], index: 2, kind: input, shape index: {}]   ;;  %s7896_s3 = inlined_call_operand.hbm [shape: f32[2,2,32,32], index: 3, kind: input, shape index: {}]   ;;  %s7897_s4 = inlined_call_operand.hbm [shape: f32[2,2,1,32], index: 4, kind: input, shape index: {}]   ;;  %s7898_s5 = inlined_call_operand.hbm [shape: f32[2,3,1,32], index: 5, kind: input, shape index: {}]   ;;  %s7899_s6 = inlined_call_operand.hbm [shape: f32[2,3,1,32], index: 6, kind: input, shape index: {}]   ;;  %s7900_s7 = inlined_call_operand.vmem [shape: f32[2,32,128], index: 7, kind: input, shape index: {}]   ;;  %s7901_s8 = inlined_call_operand.vmem [shape: f32[2,1,128], index: 8, kind: input, shape index: {}]   ;;  %s7902_s9 = inlined_call_operand.vmem [shape: f32[2,128,32], index: 9, kind: input, shape index: {}]   ;;  %s7903_s10 = inlined_call_operand.vmem [shape: f32[2,1,32], index: 10, kind: input, shape index: {}]   ;;  %s7904_s11 = inlined_call_operand.vmem [shape: f32[8,32], index: 11, kind: input, shape index: {}]   ;;  %s7905_s12 = inlined_call_operand.vmem [shape: f32[8,32], index: 12, kind: input, shape index: {}]   ;;  %s7906_s13 = inlined_call_operand.vmem [shape: f32[8,8], index: 13, kind: input, shape index: {}]   ;;  %s7907_s14 = inlined_call_operand.hbm [shape: f32[2,8,32], index: 14, kind: output, shape index: {}]  }
   0x1   :  { %7940 = sst [smem:[#allocation21_spill]] %s7893_s0 }
   0x2   :  { %7941 = sst [smem:[#allocation22_spill]] %s7895_s2 }
   0x3   :  { %7942 = sst [smem:[#allocation23_spill]] %s7896_s3 }
   0x4   :  { %7943 = sst [smem:[#allocation24_spill]] %s7897_s4 }
   0x5   :  { %7944 = sst [smem:[#allocation25_spill]] %s7898_s5 }
   0x6   :  { %7945 = sst [smem:[#allocation26_spill]] %s7899_s6 }
   0x7   :  { %7946 = sst [smem:[#allocation27_spill]] %s7900_s7 }
   0x8   :  { %7947 = sst [smem:[#allocation28_spill]] %s7901_s8 }
   0x9   :  { %7948 = sst [smem:[#allocation29_spill]] %s7902_s9 }
   0xa   :  { %7949 = sst [smem:[#allocation30_spill]] %s7903_s10 }
   0xb   :  { %7950 = sst [smem:[#allocation31_spill]] %s7904_s11 }
   0xc   :  { %7951 = sst [smem:[#allocation32_spill]] %s7905_s12 }
   0xd   :  { %7952 = sst [smem:[#allocation33_spill]] %s7906_s13 }
   0xe   :  { %7953 = sst [smem:[#allocation34_spill]] %s7907_s14 }
   0xf   :  { %19 = vsyncpa [#allocation3], 0 }
  0x10   :  { %21 = vsyncpa [#allocation3 + $0x1], 0 }
  0x11   :  { %22 = vsyncpa [#allocation6], 0 }
  0x12   :  { %23 = vsyncpa [#allocation9], 0 }
  0x13   :  { %24 = vsyncpa [#allocation12], 0 }
  0x14   :  { %25 = vsyncpa [#allocation4], 0 }
  0x15   :  { %27 = vsyncpa [#allocation4 + $0x1], 0  ;;  %s6854_s29 = smov 0   ;;  %s6856_s30 = smov 0  }
  0x16   :  { %s6858_s15 = smov 0   ;;  %s6860_s16 = smov 0  }
  0x17 LB: > { %7954 = sst [smem:[#allocation19_spill]] %s6748_s15  ;;  %s6754_s17 = smov [#allocation5]   ;;  %s6752_s16 = sphi %s6860_s16, %s8003_s16   ;;  %s6748_s15 = sphi %s6858_s15, %s8000_s15   ;;  %s6744_s30 = sphi %s6856_s30, %s8002_s30   ;;  %s6740_s29 = sphi %s6854_s29, %s8001_s29  }
  0x18   : > { %s378_s18 = sshll.u32 %s6754_s17, 4  ;;  %s6875_s19 = sadd.s32 4294967295, %s6752_s16   ;;  %s6880_s18 = int_to_ptr.vmem [resolvable:$true] %s378_s18 }
  0x19   : > { %p5590_p0 = scmp.ge.s32.totalorder %s6752_s16, 1  ;;  %p7914_p1 = scmp.eq.s32.totalorder %s6875_s19, 0 }
  0x1a   : > { %p363_p2 = scmp.lt.s32.totalorder %s6752_s16, 3  ;;  %s6755_s21 = smov [#allocation8]  }
  0x1b   : > { %s404_s22 = sshll.u32 %s6755_s21, 4  ;;  %s6756_s24 = smov [#allocation7]   ;;  %s6895_s22 = int_to_ptr.vmem [resolvable:$true] %s404_s22 }
  0x1c   : > { %p6882_p3 = pnand %p5590_p0, %p363_p2  ;;  %s6897_s25 = sshll.u32 %s6756_s24, 4  ;;  %s392_s25 = int_to_ptr.vmem [resolvable:$true] %s6897_s25 }
  0x1d   : > { %s7957_s2 = sld [smem:[#allocation22_spill]] }
  0x1e   : > { %s7955_s20 = scalar_select %p6882_p3, 1, 0 }
  0x1f   : > { %p6335_p5 = pneg %p6882_p3 }
  0x21   : > { %p6891_p6 = pnand %p6335_p5, %p7914_p1 }
  0x23   : > { %s6504_s28 = scalar_lea.hbm %s7957_s2, 128  ;;  %p6907_p8 = pneg %p6891_p6 }
  0x24   : > { %p6505_p7 = scmp.ne.s32.totalorder %s7957_s2, %s6504_s28  ;;  %p6511_p11 = scmp.lt.u32.totalorder %s6504_s28, %s7957_s2 }
  0x26   : > { %p6507_p9 = pnand %p6907_p8, %p6505_p7 }
  0x28   : > { %p6508_p10 = pneg %p6507_p9 }
  0x2a   : > { %p6513_p12 = pnand %p6511_p11, %p6508_p10 }
  0x2c   : > { %6516 = shalt.err (!%p6513_p12)
}
  0x2d   : > { %s6517_s14 = scalar_lea.vmem %s6880_s18, 128  ;;  %p6525_p5 = scmp.lt.s32.totalorder %s6880_s18, %s6880_s18 }
  0x2e   : > { %p6518_p13 = scmp.ne.s32.totalorder %s6880_s18, %s6517_s14  ;;  %p6526_p4 = scmp.lt.s32.totalorder %s6517_s14, %s6517_s14 }
  0x30   : > { %p6520_p0 = pnand %p6518_p13, %p6907_p8  ;;  %p6527_p7 = por %p6526_p4, %p6525_p5 }
  0x32   : > { %p6521_p2 = pneg %p6520_p0 }
  0x34   : > { %p6528_p9 = pnand %p6527_p7, %p6521_p2 }
  0x36   : > { %6531 = shalt.err (!%p6528_p9)
}
  0x37   : > { %s6757_s26 = smov 32   ;;  %s6758_s10 = smov 2  }
  0x38   : > { %6338 = dma.hbm_to_vmem [thread:$0]  (!%p6891_p6), %s7957_s2, 128, %s6880_s18, [#allocation6], %s6757_s26, %s6757_s26, %s6758_s10  }
  0x39   : > { %s7959_s4 = sld [smem:[#allocation24_spill]] }
  0x3f   : > { %s6532_s8 = scalar_lea.hbm %s7959_s4, 64 }
  0x40   : > { %p6533_p4 = scmp.ne.s32.totalorder %s7959_s4, %s6532_s8  ;;  %p6539_p12 = scmp.lt.u32.totalorder %s6532_s8, %s7959_s4 }
  0x42   : > { %p6535_p10 = pnand %p6533_p4, %p6907_p8 }
  0x44   : > { %p6536_p11 = pneg %p6535_p10 }
  0x46   : > { %p6541_p13 = pnand %p6539_p12, %p6536_p11 }
  0x48   : > { %6544 = shalt.err (!%p6541_p13)
}
  0x49   : > { %s6545_s18 = scalar_lea.vmem %s6895_s22, 64  ;;  %p6553_p7 = scmp.lt.s32.totalorder %s6895_s22, %s6895_s22 }
  0x4a   : > { %p6546_p0 = scmp.ne.s32.totalorder %s6895_s22, %s6545_s18  ;;  %p6554_p9 = scmp.lt.s32.totalorder %s6545_s18, %s6545_s18 }
  0x4c   : > { %p6548_p2 = pnand %p6546_p0, %p6907_p8  ;;  %p6555_p4 = por %p6554_p9, %p6553_p7 }
  0x4e   : > { %p6549_p5 = pneg %p6548_p2 }
  0x50   : > { %p6556_p10 = pnand %p6555_p4, %p6549_p5 }
  0x52   : > { %6559 = shalt.err (!%p6556_p10)
}
  0x53   : > { %s7916_s7 = smov 16   ;;  %s7918_s8 = smov 1  }
  0x54   : > { %6344 = dma.hbm_to_vmem [thread:$0]  (!%p6891_p6), %s7959_s4, 64, %s6895_s22, [#allocation9], %s7916_s7, %s7916_s7, %s7918_s8  }
  0x55   : > { %s7960_s3 = sld [smem:[#allocation23_spill]] }
  0x5b   : > { %s6560_s27 = scalar_lea.hbm %s7960_s3, 2048 }
  0x5c   : > { %p6561_p11 = scmp.ne.s32.totalorder %s7960_s3, %s6560_s27  ;;  %p6567_p0 = scmp.lt.u32.totalorder %s6560_s27, %s7960_s3 }
  0x5e   : > { %p6563_p12 = pnand %p6561_p11, %p6907_p8 }
  0x60   : > { %p6564_p13 = pneg %p6563_p12 }
  0x62   : > { %p6569_p2 = pnand %p6567_p0, %p6564_p13 }
  0x64   : > { %6572 = shalt.err (!%p6569_p2)
}
  0x65   : > { %s6573_s18 = scalar_lea.vmem %s392_s25, 2048  ;;  %p6581_p4 = scmp.lt.s32.totalorder %s392_s25, %s392_s25 }
  0x66   : > { %p6574_p5 = scmp.ne.s32.totalorder %s392_s25, %s6573_s18  ;;  %p6582_p10 = scmp.lt.s32.totalorder %s6573_s18, %s6573_s18 }
  0x68   : > { %p6576_p7 = pnand %p6574_p5, %p6907_p8  ;;  %p6583_p1 = por %p6582_p10, %p6581_p4 }
  0x6a   : > { %p6577_p9 = pneg %p6576_p7 }
  0x6c   : > { %p6584_p3 = pnand %p6583_p1, %p6577_p9 }
  0x6e   : > { %6587 = shalt.err (!%p6584_p3)
}
  0x6f   : > { %s6761_s22 = smov 128   ;;  %s6762_s9 = smov 8  }
  0x70   : > { %6341 = dma.hbm_to_vmem [thread:$0]  (!%p6891_p6), %s7960_s3, 2048, %s392_s25, [#allocation6], %s6761_s22, %s6761_s22, %s6762_s9  }
  0x71   : > { %s6763_s10 = smov [#allocation10]   ;;  %s6764_s28 = smov [#allocation11]  }
  0x72   : > { %s417_s27 = sshll.u32 %s6763_s10, 4  ;;  %s430_s17 = sshll.u32 %s6764_s28, 4  ;;  %s418_s27 = int_to_ptr.vmem [resolvable:$true] %s417_s27  ;;  %s431_s17 = int_to_ptr.vmem [resolvable:$true] %s430_s17 }
  0x73   : > { %s7961_s5 = sld [smem:[#allocation25_spill]] }
  0x79   : > { %s6588_s18 = scalar_lea.hbm %s7961_s5, 96 }
  0x7a   : > { %p6589_p1 = scmp.ne.s32.totalorder %s7961_s5, %s6588_s18  ;;  %p6595_p12 = scmp.lt.u32.totalorder %s6588_s18, %s7961_s5 }
  0x7c   : > { %p6591_p3 = pnand %p6589_p1, %p6907_p8 }
  0x7e   : > { %p6592_p11 = pneg %p6591_p3 }
  0x80   : > { %p6597_p13 = pnand %p6595_p12, %p6592_p11 }
  0x82   : > { %6600 = shalt.err (!%p6597_p13)
}
  0x83   : > { %s6601_s25 = scalar_lea.vmem %s418_s27, 96  ;;  %p6609_p7 = scmp.lt.s32.totalorder %s418_s27, %s418_s27 }
  0x84   : > { %p6602_p0 = scmp.ne.s32.totalorder %s418_s27, %s6601_s25  ;;  %p6610_p9 = scmp.lt.s32.totalorder %s6601_s25, %s6601_s25 }
  0x86   : > { %p6604_p2 = pnand %p6602_p0, %p6907_p8  ;;  %p6611_p4 = por %p6610_p9, %p6609_p7 }
  0x88   : > { %p6605_p5 = pneg %p6604_p2 }
  0x8a   : > { %p6612_p10 = pnand %p6611_p4, %p6605_p5 }
  0x8c   : > { %6615 = shalt.err (!%p6612_p10)
}
  0x8d   : > { %s7962_s7 = smov 1   ;;  %s7963_s8 = smov 16  }
  0x8e   : > { %6347 = dma.hbm_to_vmem [thread:$0]  (!%p6891_p6), %s7961_s5, 96, %s418_s27, [#allocation9], %s7963_s8, %s7963_s8, %s7962_s7  }
  0x8f   : > { %s7964_s6 = sld [smem:[#allocation26_spill]] }
  0x95   : > { %s6616_s13 = scalar_lea.hbm %s7964_s6, 96 }
  0x96   : > { %p6617_p1 = scmp.ne.s32.totalorder %s7964_s6, %s6616_s13  ;;  %p6623_p12 = scmp.lt.u32.totalorder %s6616_s13, %s7964_s6 }
  0x98   : > { %p6619_p3 = pnand %p6617_p1, %p6907_p8 }
  0x9a   : > { %p6620_p11 = pneg %p6619_p3 }
  0x9c   : > { %p6625_p13 = pnand %p6623_p12, %p6620_p11 }
  0x9e   : > { %6628 = shalt.err (!%p6625_p13)
}
  0x9f   : > { %s6629_s14 = scalar_lea.vmem %s431_s17, 96  ;;  %p6637_p7 = scmp.lt.s32.totalorder %s431_s17, %s431_s17 }
  0xa0   : > { %p6630_p0 = scmp.ne.s32.totalorder %s431_s17, %s6629_s14  ;;  %p6638_p9 = scmp.lt.s32.totalorder %s6629_s14, %s6629_s14 }
  0xa2   : > { %p6632_p2 = pnand %p6630_p0, %p6907_p8  ;;  %p6639_p4 = por %p6638_p9, %p6637_p7 }
  0xa4   : > { %p6633_p5 = pneg %p6632_p2 }
  0xa6   : > { %p6640_p10 = pnand %p6639_p4, %p6633_p5 }
  0xa8   : > { %6643 = shalt.err (!%p6640_p10)
}
  0xa9   : > { %6350 = dma.hbm_to_vmem [thread:$0]  (!%p6891_p6), %s7964_s6, 96, %s431_s17, [#allocation12], %s7963_s8, %s7963_s8, %s7962_s7  }
  0xaa   : > { %s5589_s23 = sadd.s32 4294967294, %s6752_s16   ;;  %s7017_s21 = sadd.s32 1, %s6752_s16  }
  0xab   : > { %s40_s25 = sadd.s32 1, %s6748_s15  ;;  %s37_s2 = ssub.s32 %s6752_s16, %s7017_s21 }
  0xac   : > { %p47_p8 = scmp.ne.s32.totalorder %s6748_s15, %s6744_s30  ;;  %p38_p1 = scmp.eq.s32.totalorder %s37_s2, 0 }
  0xad   : > { %p48_p3 = scmp.eq.s32.totalorder %s6752_s16, 0  ;;  %p53_p11 = scmp.ne.s32.totalorder %s6744_s30, %s6740_s29 }
  0xae   : > { %p350_p12 = scmp.eq.s32.totalorder %s6875_s19, 1  ;;  %p7966_p0 = scmp.eq.s32.totalorder %s6875_s19, 0 }
  0xaf   : > { %s7029_s4 = scalar_select %p38_p1, %s6748_s15, %s40_s25  }
  0xb0   : > { %p49_p13 = por %p48_p3, %p47_p8  ;;  %p7033_p2 = por %p7966_p0, %p53_p11 }
  0xb1   : > { %7965 = sst [smem:[#allocation20_spill]] %s7029_s4  ;;  %p7037_p6 = por %p350_p12, %p47_p8 }
  0xb2   : > { %p356_p5 = scmp.eq.s32.totalorder %s5589_s23, 1  ;;  %p6364_p7 = scmp.lt.s32.totalorder %s6752_s16, 2 }
  0xb3   : > { %s7968_s17 = scalar_select %p7037_p6, 1, 0 }
  0xb4   : > { %s465_s7 = sand.u32 1, %s6748_s15   ;;  %p7043_p9 = por %p356_p5, %p53_p11 }
  0xb5   : > { %s5597_s9 = sshll.u32 %s465_s7, 3  ;;  %s5598_s13 = sshll.u32 %s6752_s16, 7 }
  0xb6   : > { %s7969_s8 = scalar_select %p7043_p9, 1, 0 }
  0xb7   : > { %s7970_s0 = sld [smem:[#allocation21_spill]]  ;;  %s469_s24 = scalar_lea.vmem [#allocation2], %s5597_s9 }
  0xb8   : > { %s476_s14 = sshll.u32 %s469_s24, 4  ;;  %p7053_p4 = pnand %p6364_p7, %p49_p13  ;;  %s7057_s14 = int_to_ptr.vmem [resolvable:$true] %s476_s14 }
  0xb9   : > { %s466_s18 = scalar_lea.sflag [#allocation3], %s465_s7 }
  0xba   : > { %p6646_p8 = pneg %p7053_p4 }
  0xbd   : > { %s7051_s28 = scalar_lea.hbm %s7970_s0, %s5598_s13  ;;  %s6649_s9 = scalar_lea.hbm %s7970_s0, 256 }
  0xbe   : > { %s6644_s23 = scalar_lea.hbm %s7051_s28, 128  ;;  %p6650_p11 = scmp.lt.u32.totalorder %s7051_s28, %s7970_s0 }
  0xbf   : > { %p6645_p10 = scmp.ne.s32.totalorder %s7051_s28, %s6644_s23  ;;  %p6651_p12 = scmp.lt.u32.totalorder %s6649_s9, %s6644_s23 }
  0xc0   : > { %p6653_p0 = scmp.lt.u32.totalorder %s6644_s23, %s7051_s28 }
  0xc1   : > { %p6647_p1 = pnand %p6646_p8, %p6645_p10  ;;  %p6652_p13 = por %p6651_p12, %p6650_p11 }
  0xc3   : > { %p6648_p3 = pneg %p6647_p1  ;;  %p6654_p5 = por %p6653_p0, %p6652_p13 }
  0xc5   : > { %p6655_p7 = pnand %p6654_p5, %p6648_p3 }
  0xc7   : > { %6658 = shalt.err (!%p6655_p7)
}
  0xc8   : > { %s6659_s7 = scalar_lea.vmem %s7057_s14, 128  ;;  %s6765_s10 = smov [#allocation2]  }
  0xc9   : > { %p6660_p10 = scmp.ne.s32.totalorder %s7057_s14, %s6659_s7  ;;  %s6664_s24 = sshll.u32 %s6765_s10, 4  ;;  %s6665_s24 = int_to_ptr.vmem [resolvable:$false] %s6664_s24 }
  0xca   : > { %s6666_s25 = scalar_lea.vmem %s6665_s24, 256  ;;  %p6667_p6 = scmp.lt.s32.totalorder %s7057_s14, %s6665_s24 }
  0xcb   : > { %p6662_p1 = pnand %p6660_p10, %p6646_p8  ;;  %p6668_p11 = scmp.lt.s32.totalorder %s6666_s25, %s6659_s7 }
  0xcd   : > { %p6663_p9 = pneg %p6662_p1  ;;  %p6669_p12 = por %p6668_p11, %p6667_p6 }
  0xcf   : > { %p6670_p13 = pnand %p6669_p12, %p6663_p9 }
  0xd1   : > { %6673 = shalt.err (!%p6670_p13)
}
  0xd2   : > { %6354 = dma.hbm_to_vmem [thread:$0]  (!%p7053_p4), %s7051_s28, 128, %s7057_s14, %s466_s18  }
  0xd3   : > { %p7972_p3 = scmp.ne.s32.totalorder %s7955_s20, 0 }
  0xd4   : > { %s7087_s23 = sand.u32 (!%p7972_p3), 1, %s6744_s30  }
  0xd5   : > { %485 = sbr.rel (%p7972_p3) target bundleno = 14843 (0x39fb), region = 76  ;;  %s7921_s2 = sshll.u32 (!%p7972_p3), %s7087_s23, 3 }
  0xd6   : > { %s488_s9 = scalar_lea.sflag (!%p7972_p3), [#allocation3], %s7087_s23  ;;  %s7093_s13 = scalar_lea.vmem (!%p7972_p3), [#allocation2], %s7921_s2 }
  0xdc   : > { %6719 = dma.done.wait (%p7033_p2), %s488_s9, 128  }
  0xdd   : > { %6721 = vsyncadd (%p7033_p2), %s488_s9, 4294967168  ;;  %p7973_p6 = scmp.eq.s32.totalorder %s6875_s19, 0 }
  0xdf   : > { %6723 = dma.done.wait (%p7973_p6), [#allocation6], 2176   ;;  %p7974_p9 = pmov %p7973_p6 }
  0xe0   : > { %p7975_p4 = pmov %p7973_p6 }
  0xe1   : > { %6725 = vsyncadd (%p7974_p9), [#allocation6], 4294965120 }
  0xe2   : > { %6727 = dma.done.wait (%p7975_p4), [#allocation9], 160   ;;  %p7976_p8 = pmov %p7975_p4 }
  0xe3   : > { %p7977_p0 = pmov %p7975_p4 }
  0xe4   : > { %6729 = vsyncadd (%p7976_p8), [#allocation9], 4294967136 }
  0xe5   : > { %6731 = dma.done.wait (%p7977_p0), [#allocation12], 96   ;;  %p7978_p5 = pmov %p7977_p0 }
  0xe6   : > { %v6766_v0 = vmov 0.0   ;;  %v561_v1 = vld [vmem:[%s7894_s1 + $0x8] sm:$0xff]  ;;  %v563_v2 = vld [vmem:[%s7894_s1 + $0x18] sm:$0xff]  ;;  %v560_v3 = vld [vmem:[%s7894_s1] sm:$0xff]  ;;  %s7979_s12 = sld [smem:[#allocation32_spill]]  ;;  %s7936_s26 = smov 96   ;;  %v570_v16 = vlaneseq }
  0xe7   : > { %6733 = vsyncadd (%p7978_p5), [#allocation12], 4294967200  ;;  %648 = vmatprep.mubr.f32.mxu0 %v6766_v0  ;;  %5912 = vmatprep.subr.mxu1 %v6766_v0  ;;  %v6219_v4 = vpack.c.bf16 %v563_v2, %v561_v1  ;;  %v562_v5 = vld [vmem:[%s7894_s1 + $0x10] sm:$0xff]  ;;  %v565_v6 = vld [vmem:[%s7894_s1 + $0x28] sm:$0xff]  ;;  %s7980_s11 = sld [smem:[#allocation31_spill]]  ;;  %vm580_vm0 = vcmask 261120  }
  0xe8   : > { %v567_v7 = vld [vmem:[%s7894_s1 + $0x38] sm:$0xff]  ;;  %v6221_v8 = vpack.c.bf16 %v562_v5, %v560_v3  ;;  %v564_v10 = vld [vmem:[%s7894_s1 + $0x20] sm:$0xff]  ;;  %v566_v11 = vld [vmem:[%s7894_s1 + $0x30] sm:$0xff]  ;;  %s7934_s24 = smov 64   ;;  %v571_v17 = vshrl.u32 %v570_v16, 7  ;;  %vm6770_vm1 = vmmov 0  }
  0xe9   : > { %v6223_v9 = vpack.c.bf16 %v567_v7, %v565_v6  ;;  %6220 = vmatprep.subr.bf16.mxu0 %v6219_v4  ;;  %v6225_v13 = vpack.c.bf16 %v566_v11, %v564_v10  ;;  %v7147_v15 = vld [vmem:[%s7093_s13] sm:$0xff]  ;;  %v568_v19 = vld [vmem:[#allocation5] sm:$0x3]  ;;  %s6769_s13 = smov 32   ;;  %5914 = vmatprep.mubr.msk.f32.mxu1 %vm6770_vm1, %v6766_v0  ;;  %vm687_vm2 = vcmask 64512   ;;  %s7981_s20 = sld [smem:[#allocation33_spill]] }
  0xea   : > { %6222 = vmatpush1.bf16.msra.mxu0 %v6221_v8  ;;  %v7154_v18 = vsub.s32 0, %v571_v17  ;;  %v7176_v32 = vsub.s32 1, %v571_v17  ;;  %s7930_s22 = smov 56   ;;  %s7932_s28 = smov 120   ;;  %v680_v55 = vld [vmem:[#allocation7] sm:$0xff]  ;;  %v681_v11 = vld [vmem:[#allocation7 + $0x8] sm:$0xff] }
  0xeb   : > { %6224 = vmatprep.subr.bf16.mxu0 %v6223_v9  ;;  %5913 = vmatpush3.msra.mxu1 %v680_v55  ;;  %s7928_s14 = smov 112   ;;  %s7926_s27 = smov 48  }
  0xec   : > { %v558_v12 = vld [vmem:[%s7979_s12] sm:$0xff]  ;;  %v573_v20 = vrot.slane %v568_v19, %v7154_v18  ;;  %v577_v34 = vrot.slane %v568_v19, %v7176_v32  ;;  %5922 = vmatprep.subr.mxu1 %v6766_v0  ;;  %s7924_s18 = smov 40   ;;  %s7922_s7 = smov 104  }
  0xed   : > { %671 = vrot.lane.b32.xlu0 %v558_v12, %s7936_s26  ;;  %v7144_v14 = vld [vmem:[%s7980_s11] sm:$0xff]  ;;  %s7986_s10 = smov 104   ;;  %s7987_s9 = sld [smem:[#allocation27_spill]] }
  0xee   : > { %6226 = vmatpush1.bf16.msra.mxu0 %v6225_v13  ;;  %s7988_s2 = sld [smem:[#allocation29_spill]]  ;;  %s7989_s25 = sld [smem:[#allocation28_spill]] }
  0xef   : > { %5887 = vmatprep.subr.mxu0 %v6766_v0  ;;  %v7195_v40 = vld [vmem:[%s7981_s20] sm:$0xff]  ;;  %s7990_s0 = sld [smem:[#allocation30_spill]]  ;;  %s7991_s12 = smov 96  }
  0xf0   : > { %s7992_s4 = smov 64   ;;  %s7995_s6 = sld [smem:[#allocation34_spill]] }
  0xf1   : > { %667 = vrot.lane.b32.xlu0 %v7144_v14, %s7934_s24  ;;  %5607 = vmatmul.mubr.msk.f32.vlgmr.msra.gmra.mrb[0].mxu0 %vm580_vm0, %v7147_v15  ;;  %p7996_p7 = scmp.ne.s32.totalorder %s7968_s17, 0 }
  0xf2   : > { %5889 = vmatprep.mubr.msk.f32.mxu0 %vm6770_vm1, %v6766_v0 }
 0x15f   : > { %v7157_v24 = vpop.permute.xlu0 %671 }
 0x163   : > { %v7165_v26 = vpop.permute.xlu0 %667 }
 0x1c4   : > { %v650_v21 = vpop.f32.mrb[0].mxu0 }
 0x1c5   : > { %v651_v22 = vadd.f32 %v650_v21, %v573_v20  ;;  %v652_v23 = vpop.f32.mrb[1].mxu0 }
 0x1c6   : > { %v7184_v38 = vadd.f32 %v652_v23, %v577_v34 }
 0x1c7   : > { %v674_v25 = vmul.f32 %v7157_v24, %v651_v22  ;;  %v670_v27 = vmul.f32 %v7165_v26, %v651_v22  ;;  %v655_v35 = vmul.f32 %v651_v22, %v7144_v14 }
 0x1c9   : > { %676 = vrot.lane.b32.xlu1 %v674_v25, %s7936_s26 }
 0x1cd   : > { %657 = vrot.lane.b32.xlu1 %v558_v12, %s6769_s13  ;;  %s7993_s13 = smov 120  }
 0x23b   : > { %v677_v28 = vpop.permute.xlu1 %676 }
 0x23c   : > { %v7168_v29 = vadd.f32 %v677_v28, %v670_v27 }
 0x23e   : > { %685 = vrot.lane.b32.xlu0 %v7168_v29, %s7934_s24 }
 0x23f   : > { %v7172_v30 = vpop.permute.xlu1 %657 }
 0x240   : > { %v660_v31 = vmul.f32 %v7172_v30, %v651_v22 }
 0x242   : > { %662 = vrot.lane.b32.xlu1 %v660_v31, %s7936_s26 }
 0x2b0   : > { %v686_v33 = vpop.permute.xlu0 %685 }
 0x2b1   : > { %5888 = vmatpush3.xpose.msk.msra.mxu0 %vm687_vm2, %v686_v33 }
 0x2b2   : > { %5892 = vmatprep.subr.mxu0 %v6766_v0 }
 0x2b4   : > { %v663_v36 = vpop.permute.xlu1 %662 }
 0x2b5   : > { %v7182_v37 = vadd.f32 %v663_v36, %v655_v35 }
 0x2b7   : > { %5890 = vmatmul.mubr.msk.f32.vlgmr.msra.gmra.mrb[2].mxu0 %vm687_vm2, %v7182_v37 }
 0x2b8   : > { %5893 = vmatpush3.msra.mxu0 %v7184_v38  ;;  %5894 = vmatprep.mubr.msk.f32.mxu0 %vm6770_vm1, %v6766_v0 }
 0x2b9   : > { %5897 = vmatprep.subr.mxu0 %v6766_v0 }
 0x38a   : > { %v759_v39 = vpop.f32.mrb[2].mxu0 }
 0x38b   : > { %v763_v41 = vmul.f32 0.17677669, %v759_v39  ;;  %v5891_v42 = vpop.f32.mrb[3].mxu0 }
 0x38d   : > { %v764_v43 = vadd.f32 %v763_v41, %v7195_v40 }
 0x38f   : > { %v765_v44 = vsel %vm687_vm2, %v764_v43, -inf }
 0x390   : > { %766 = vmax.xlane.f32.xlu0 %v765_v44  ;;  %v682_v44 = vld [vmem:[#allocation7 + $0x10] sm:$0xff] }
 0x3a6   : > { %851 = vrot.lane.b32.xlu0 %v7168_v29, %s7930_s22  ;;  %s7982_s22 = smov 56  }
 0x41d   : > { %v767_v45 = vpop.xlane.xlu0 %766 }
 0x41e   : > { %v768_v46 = vsub.f32 %v764_v43, %v767_v45 }
 0x420   : > { %v769_v47 = vmul.f32 1.442695, %v768_v46 }
 0x421   : > { %v852_v53 = vpop.permute.xlu0 %851 }
 0x422   : > { %6426 = vpow2.f32 %v769_v47 }
 0x42c   : > { %v6427_v48 = vpop.eup %6426 }
 0x42d   : > { %v771_v49 = vsel %vm687_vm2, %v6427_v48, 0.0 }
 0x42e   : > { %772 = vadd.xlane.f32.xlu1 %v771_v49 }
 0x43f   : > { %849 = vrot.lane.b32.xlu1 %v7182_v37, %s7932_s28 }
 0x4bb   : > { %v773_v50 = vpop.xlane.xlu1 %772 }
 0x4bc   : > { %6428 = vrcp.f32 %v773_v50 }
 0x4bf   : > { %v850_v54 = vpop.permute.xlu1 %849 }
 0x4c6   : > { %v6429_v51 = vpop.eup %6428 }
 0x4c7   : > { %v775_v52 = vmul.f32 %v6429_v51, %v6427_v48 }
 0x4c9   : > { %5895 = vmatmul.mubr.msk.f32.vlgmr.msra.gmra.mrb[4].mxu0 %vm687_vm2, %v775_v52 }
 0x4ca   : > { %5898 = vmatpush3.xpose.msk.msra.mxu0 %vm687_vm2, %v852_v53  ;;  %5899 = vmatprep.mubr.msk.f32.mxu0 %vm6770_vm1, %v6766_v0 }
 0x4cb   : > { %5902 = vmatprep.subr.mxu0 %v6766_v0 }
 0x4cd   : > { %5900 = vmatmul.mubr.msk.f32.vlgmr.msra.gmra.mrb[6].mxu0 %vm687_vm2, %v850_v54 }
 0x4ce   : > { %5904 = vmatprep.mubr.msk.f32.mxu0 %vm6770_vm1, %v6766_v0 }
 0x59c   : > { %v845_v56 = vpop.f32.mrb[4].mxu0 }
 0x59d   : > { %v5896_v57 = vpop.f32.mrb[5].mxu0  ;;  %5915 = vmatmul.mubr.msk.f32.vlgmr.msra.gmra.mrb[0].mxu1 %vm687_vm2, %v845_v56 }
 0x59e   : > { %5924 = vmatprep.mubr.msk.f32.mxu1 %vm6770_vm1, %v6766_v0 }
 0x5a0   : > { %v923_v58 = vpop.f32.mrb[6].mxu0 }
 0x5a1   : > { %v927_v59 = vmul.f32 0.17677669, %v923_v58  ;;  %v5901_v60 = vpop.f32.mrb[7].mxu0  ;;  %v683_v58 = vld [vmem:[#allocation7 + $0x18] sm:$0xff] }
 0x5a3   : > { %v928_v61 = vadd.f32 %v927_v59, %v7195_v40 }
 0x5a5   : > { %v929_v62 = vsel %vm687_vm2, %v928_v61, -inf }
 0x5a6   : > { %930 = vmax.xlane.f32.xlu0 %v929_v62 }
 0x5bc   : > { %941 = vrot.lane.b32.xlu0 %v7184_v38, %s7932_s28 }
 0x5c0   : > { %1163 = vrot.lane.b32.xlu0 %v7182_v37, %s7928_s14 }
 0x633   : > { %v931_v63 = vpop.xlane.xlu0 %930 }
 0x634   : > { %v932_v1 = vsub.f32 %v928_v61, %v931_v63 }
 0x636   : > { %v933_v2 = vmul.f32 1.442695, %v932_v1 }
 0x637   : > { %v942_v3 = vpop.permute.xlu0 %941 }
 0x638   : > { %6430 = vpow2.f32 %v933_v2  ;;  %5903 = vmatpush3.msra.mxu0 %v942_v3 }
 0x639   : > { %5907 = vmatprep.subr.mxu0 %v6766_v0 }
 0x63b   : > { %v1164_v17 = vpop.permute.xlu0 %1163 }
 0x642   : > { %v6431_v4 = vpop.eup %6430 }
 0x643   : > { %v935_v5 = vsel %vm687_vm2, %v6431_v4, 0.0 }
 0x644   : > { %936 = vadd.xlane.f32.xlu1 %v935_v5 }
 0x655   : > { %1165 = vrot.lane.b32.xlu1 %v7168_v29, %s7926_s27  ;;  %s7984_s27 = smov 48  }
 0x670   : > { %v1159_v6 = vpop.f32.mrb[0].mxu1 }
 0x671   : > { %v5916_v7 = vpop.f32.mrb[1].mxu1 }
 0x6d1   : > { %v937_v8 = vpop.xlane.xlu1 %936 }
 0x6d2   : > { %6432 = vrcp.f32 %v937_v8 }
 0x6d5   : > { %v1166_v13 = vpop.permute.xlu1 %1165 }
 0x6dc   : > { %v6433_v9 = vpop.eup %6432 }
 0x6dd   : > { %v939_v10 = vmul.f32 %v6433_v9, %v6431_v4  ;;  %v5624_v4 = vld [vmem:[#allocation8] ss:$0 sm:$0xff] }
 0x6df   : > { %5905 = vmatmul.mubr.msk.f32.vlgmr.msra.gmra.mrb[8].mxu0 %vm687_vm2, %v939_v10 }
 0x6e0   : > { %5908 = vmatpush3.msra.mxu0 %v681_v11  ;;  %5909 = vmatprep.mubr.msk.f32.mxu0 %vm6770_vm1, %v6766_v0 }
 0x6e1   : > { %5917 = vmatprep.subr.mxu0 %v6766_v0 }
 0x7b2   : > { %v1013_v12 = vpop.f32.mrb[8].mxu0 }
 0x7b3   : > { %v5906_v16 = vpop.f32.mrb[9].mxu0  ;;  %5910 = vmatmul.mubr.msk.f32.vlgmr.msra.gmra.mrb[10].mxu0 %vm687_vm2, %v1013_v12 }
 0x7b4   : > { %5918 = vmatpush3.xpose.msk.msra.mxu0 %vm687_vm2, %v1166_v13  ;;  %5919 = vmatprep.mubr.msk.f32.mxu0 %vm6770_vm1, %v6766_v0 }
 0x7b5   : > { %5927 = vmatprep.subr.mxu0 %v6766_v0 }
 0x7b7   : > { %5920 = vmatmul.mubr.msk.f32.vlgmr.msra.gmra.mrb[12].mxu0 %vm687_vm2, %v1164_v17  ;;  %v5628_v17 = vld [vmem:[%s7894_s1 + $0x48] sm:$0xff] }
 0x7b8   : > { %5929 = vmatprep.mubr.msk.f32.mxu0 %vm6770_vm1, %v6766_v0  ;;  %5928 = vmatpush3.msra.mxu0 %v682_v44  ;;  %v1694_v44 = vld [vmem:[#allocation5 + $0x2] sm:$0x3] }
 0x7b9   : > { %5937 = vmatprep.subr.mxu0 %v6766_v0 }
 0x886   : > { %v1086_v19 = vpop.f32.mrb[10].mxu0 }
 0x887   : > { %v1160_v20 = vadd.f32 %v1159_v6, %v1086_v19  ;;  %v5911_v21 = vpop.f32.mrb[11].mxu0  ;;  %v5630_v19 = vld [vmem:[%s7894_s1 + $0x58] sm:$0xff] }
 0x888   : > { %v5629_v21 = vld [vmem:[%s7894_s1 + $0x50] sm:$0xff] }
 0x88a   : > { %v1237_v22 = vpop.f32.mrb[12].mxu0 }
 0x88b   : > { %v1241_v23 = vmul.f32 0.17677669, %v1237_v22  ;;  %v5921_v25 = vpop.f32.mrb[13].mxu0 }
 0x88c   : > { %v5634_v25 = vld [vmem:[%s7894_s1 + $0x78] sm:$0xff] }
 0x88d   : > { %v1242_v27 = vadd.f32 %v1241_v23, %v7195_v40  ;;  %v5632_v23 = vld [vmem:[%s7894_s1 + $0x68] sm:$0xff] }
 0x88f   : > { %v1243_v28 = vsel %vm687_vm2, %v1242_v27, -inf }
 0x890   : > { %1244 = vmax.xlane.f32.xlu1 %v1243_v28  ;;  %v6231_v28 = vpack.c.bf16 %v5634_v25, %v5632_v23 }
 0x8a1   : > { %1406 = vrot.lane.b32.xlu1 %v7168_v29, %s7924_s18  ;;  %s7985_s18 = smov 40  }
 0x8a5   : > { %1404 = vrot.lane.b32.xlu1 %v7182_v37, %s7922_s7 }
 0x91d   : > { %v1245_v31 = vpop.xlane.xlu1 %1244 }
 0x91e   : > { %v1246_v33 = vsub.f32 %v1242_v27, %v1245_v31  ;;  %v5631_v27 = vld [vmem:[%s7894_s1 + $0x60] sm:$0xff]  ;;  %v5633_v31 = vld [vmem:[%s7894_s1 + $0x70] sm:$0xff] }
 0x920   : > { %v1247_v34 = vmul.f32 1.442695, %v1246_v33  ;;  %v6233_v33 = vpack.c.bf16 %v5633_v31, %v5631_v27  ;;  %v1795_v31 = vld [vmem:[#allocation7 + $0x20] sm:$0xff] }
 0x921   : > { %v1407_v42 = vpop.permute.xlu1 %1406 }
 0x922   : > { %6434 = vpow2.f32 %v1247_v34 }
 0x925   : > { %v1405_v43 = vpop.permute.xlu1 %1404 }
 0x92c   : > { %v6435_v35 = vpop.eup %6434 }
 0x92d   : > { %v1249_v36 = vsel %vm687_vm2, %v6435_v35, 0.0 }
 0x92e   : > { %1250 = vadd.xlane.f32.xlu0 %v1249_v36 }
 0x944   : > { %1254 = vrot.lane.b32.xlu0 %v7184_v38, %s7928_s14  ;;  %s7983_s14 = smov 112  }
 0x9bb   : > { %v1251_v39 = vpop.xlane.xlu0 %1250 }
 0x9bc   : > { %6436 = vrcp.f32 %v1251_v39 }
 0x9bf   : > { %v1255_v41 = vpop.permute.xlu0 %1254 }
 0x9c0   : > { %5923 = vmatpush3.msra.mxu1 %v1255_v41  ;;  %v5625_v41 = vld [vmem:[#allocation10] ss:$0 sm:$0xff] }
 0x9c1   : > { %5932 = vmatprep.subr.mxu1 %v6766_v0 }
 0x9c6   : > { %v6437_v29 = vpop.eup %6436 }
 0x9c7   : > { %v1253_v37 = vmul.f32 %v6437_v29, %v6435_v35 }
 0x9c9   : > { %5925 = vmatmul.mubr.msk.f32.vlgmr.msra.gmra.mrb[2].mxu1 %vm687_vm2, %v1253_v37 }
 0x9ca   : > { %5933 = vmatpush3.xpose.msk.msra.mxu1 %vm687_vm2, %v1407_v42  ;;  %5934 = vmatprep.mubr.msk.f32.mxu1 %vm6770_vm1, %v6766_v0  ;;  %v5626_v42 = vld [vmem:[#allocation11] ss:$0 sm:$0xff] }
 0x9cb   : > { %5942 = vmatprep.subr.mxu1 %v6766_v0 }
 0x9cd   : > { %5935 = vmatmul.mubr.msk.f32.vlgmr.msra.gmra.mrb[4].mxu1 %vm687_vm2, %v1405_v43 }
 0x9ce   : > { %5944 = vmatprep.mubr.msk.f32.mxu1 %vm6770_vm1, %v6766_v0  ;;  %5943 = vmatpush3.msra.mxu1 %v683_v58 }
 0x9cf   : > { %5947 = vmatprep.subr.mxu1 %v6766_v0 }
 0xa9c   : > { %v1326_v45 = vpop.f32.mrb[2].mxu1 }
 0xa9d   : > { %v5926_v46 = vpop.f32.mrb[3].mxu1  ;;  %5930 = vmatmul.mubr.msk.f32.vlgmr.msra.gmra.mrb[14].mxu0 %vm687_vm2, %v1326_v45  ;;  %v1699_v45 = vrot.slane %v1694_v44, %v7154_v18 }
 0xa9e   : > { %5939 = vmatprep.mubr.msk.f32.mxu0 %vm6770_vm1, %v6766_v0 }
 0xaa0   : > { %v1478_v47 = vpop.f32.mrb[4].mxu1 }
 0xaa1   : > { %v1482_v48 = vmul.f32 0.17677669, %v1478_v47  ;;  %v5936_v49 = vpop.f32.mrb[5].mxu1 }
 0xaa3   : > { %v1483_v50 = vadd.f32 %v1482_v48, %v7195_v40 }
 0xaa5   : > { %v1484_v51 = vsel %vm687_vm2, %v1483_v50, -inf }
 0xaa6   : > { %1485 = vmax.xlane.f32.xlu0 %v1484_v51 }
 0xabc   : > { %1495 = vrot.lane.b32.xlu0 %v7184_v38, %s7922_s7 }
 0xb33   : > { %v1486_v52 = vpop.xlane.xlu0 %1485 }
 0xb34   : > { %v1487_v53 = vsub.f32 %v1483_v50, %v1486_v52 }
 0xb36   : > { %v1488_v54 = vmul.f32 1.442695, %v1487_v53 }
 0xb37   : > { %v1496_v55 = vpop.permute.xlu0 %1495 }
 0xb38   : > { %6438 = vpow2.f32 %v1488_v54  ;;  %5938 = vmatpush3.msra.mxu0 %v1496_v55 }
 0xb42   : > { %v6439_v56 = vpop.eup %6438 }
 0xb43   : > { %v1490_v57 = vsel %vm687_vm2, %v6439_v56, 0.0 }
 0xb44   : > { %1491 = vadd.xlane.f32.xlu1 %v1490_v57  ;;  %v1703_v57 = vrot.slane %v1694_v44, %v7176_v32 }
 0xb70   : > { %v1399_v59 = vpop.f32.mrb[14].mxu0 }
 0xb71   : > { %v1403_v60 = vadd.f32 %v1399_v59, %v1160_v20  ;;  %v5931_v61 = vpop.f32.mrb[15].mxu0  ;;  %v6227_v20 = vpack.c.bf16 %v5630_v19, %v5628_v17 }
 0xb73   : > { %6228 = vmatprep.subr.bf16.mxu0 %v6227_v20  ;;  %v1796_v20 = vld [vmem:[#allocation7 + $0x28] sm:$0xff] }
 0xbd1   : > { %v1492_v62 = vpop.xlane.xlu1 %1491 }
 0xbd2   : > { %6440 = vrcp.f32 %v1492_v62 }
 0xbdc   : > { %v6441_v38 = vpop.eup %6440 }
 0xbdd   : > { %v1494_v63 = vmul.f32 %v6441_v38, %v6439_v56 }
 0xbdf   : > { %5940 = vmatmul.mubr.msk.f32.vlgmr.msra.gmra.mrb[16].mxu0 %vm687_vm2, %v1494_v63 }
 0xbe0   : > { %1773 = vmatprep.mubr.f32.mxu0 %v6766_v0 }
 0xcb2   : > { %v1567_v1 = vpop.f32.mrb[16].mxu0 }
 0xcb3   : > { %v5941_v2 = vpop.f32.mrb[17].mxu0  ;;  %5945 = vmatmul.mubr.msk.f32.vlgmr.msra.gmra.mrb[6].mxu1 %vm687_vm2, %v1567_v1 }
 0xcb4   : > { %5949 = vmatprep.mubr.msk.f32.mxu1 %vm6770_vm1, %v6766_v0 }
 0xd86   : > { %v1640_v3 = vpop.f32.mrb[6].mxu1 }
 0xd87   : > { %v1644_v5 = vadd.f32 %v1640_v3, %v1403_v60  ;;  %v5946_v6 = vpop.f32.mrb[7].mxu1 }
 0xd89   : > { %v1652_v7 = vadd.f32 %v5624_v4, %v1644_v5 }
 0xd8b   : > { %v1653_v8 = vadd.f32 %v1652_v7, %v7147_v15  ;;  %v5627_v15 = vld [vmem:[%s7894_s1 + $0x40] sm:$0xff] }
 0xd8c   : > { %v6229_v22 = vpack.c.bf16 %v5629_v21, %v5627_v15 }
 0xd8d   : > { %v1654_v9 = vsel %vm580_vm0, %v1653_v8, 0.0 }
 0xd8e   : > { %1655 = vadd.xlane.f32.xlu1 %v1654_v9  ;;  %6230 = vmatpush1.bf16.msra.mxu0 %v6229_v22 }
 0xd8f   : > { %6232 = vmatprep.subr.bf16.mxu0 %v6231_v28 }
 0xd92   : > { %6234 = vmatpush1.bf16.msra.mxu0 %v6233_v33 }
 0xd93   : > { %5957 = vmatprep.subr.mxu0 %v6766_v0 }
 0xe1b   : > { %v1656_v10 = vpop.xlane.xlu1 %1655 }
 0xe1c   : > { %v1658_v11 = vmul.f32 0.03125, %v1656_v10 }
 0xe1e   : > { %v1659_v12 = vsub.f32 %v1653_v8, %v1658_v11 }
 0xe20   : > { %v1660_v13 = vmul.f32 %v1659_v12, %v1659_v12 }
 0xe22   : > { %v1661_v16 = vsel %vm580_vm0, %v1660_v13, 0.0 }
 0xe23   : > { %1662 = vadd.xlane.f32.xlu1 %v1661_v16 }
 0xeb0   : > { %v1663_v34 = vpop.xlane.xlu1 %1662 }
 0xeb1   : > { %v1664_v35 = vmul.f32 0.03125, %v1663_v34 }
 0xeb3   : > { %v1665_v36 = vadd.f32 1e-05, %v1664_v35 }
 0xeb5   : > { %6442 = vrsqrt.f32 %v1665_v36 }
 0xebf   : > { %v6443_v39 = vpop.eup %6442 }
 0xec0   : > { %v1667_v29 = vmul.f32 %v6443_v39, %v1659_v12 }
 0xec2   : > { %v1675_v37 = vmul.f32 %v5625_v41, %v1667_v29 }
 0xec4   : > { %v7299_v43 = vadd.f32 %v5626_v42, %v1675_v37 }
 0xec6   : > { %5635 = vmatmul.mubr.msk.f32.vlgmr.msra.gmra.mrb[18].mxu0 %vm580_vm0, %v7299_v43 }
 0xec7   : > { %5959 = vmatprep.mubr.msk.f32.mxu0 %vm6770_vm1, %v6766_v0 }
 0xf99   : > { %v1775_v46 = vpop.f32.mrb[18].mxu0 }
 0xf9a   : > { %v1776_v47 = vadd.f32 %v1775_v46, %v1699_v45  ;;  %v1777_v48 = vpop.f32.mrb[19].mxu0 }
 0xf9c   : > { %v1788_v49 = vmul.f32 %v1776_v47, %v7157_v24  ;;  %v1781_v50 = vmul.f32 %v1776_v47, %v7172_v30  ;;  %v1787_v51 = vmul.f32 %v1776_v47, %v7165_v26  ;;  %v1780_v52 = vmul.f32 %v1776_v47, %v7144_v14 }
 0xf9d   : > { %v7325_v14 = vadd.f32 %v1777_v48, %v1703_v57 }
 0xf9e   : > { %1790 = vrot.lane.b32.xlu1 %v1788_v49, %s7936_s26  ;;  %1783 = vrot.lane.b32.xlu0 %v1781_v50, %s7936_s26 }
0x1010   : > { %v1791_v53 = vpop.permute.xlu1 %1790  ;;  %v1784_v54 = vpop.permute.xlu0 %1783 }
0x1011   : > { %v7312_v55 = vadd.f32 %v1791_v53, %v1787_v51  ;;  %v7314_v56 = vadd.f32 %v1784_v54, %v1780_v52 }
0x1013   : > { %1800 = vrot.lane.b32.xlu0 %v7312_v55, %s7934_s24  ;;  %1963 = vrot.lane.b32.xlu1 %v7314_v56, %s7932_s28  ;;  %s5458_s24 = scalar_lea.sflag [#allocation4], %s7087_s23 }
0x1017   : > { %1965 = vrot.lane.b32.xlu0 %v7312_v55, %s7982_s22 }
0x1085   : > { %v1801_v58 = vpop.permute.xlu0 %1800  ;;  %v1964_v60 = vpop.permute.xlu1 %1963 }
0x1086   : > { %5948 = vmatpush3.xpose.msk.msra.mxu1 %vm687_vm2, %v1801_v58 }
0x1087   : > { %5952 = vmatprep.subr.mxu1 %v6766_v0 }
0x1089   : > { %v1966_v59 = vpop.permute.xlu0 %1965  ;;  %5950 = vmatmul.mubr.msk.f32.vlgmr.msra.gmra.mrb[8].mxu1 %vm687_vm2, %v7314_v56 }
0x108a   : > { %5953 = vmatpush3.msra.mxu1 %v7325_v14  ;;  %5958 = vmatpush3.xpose.msk.msra.mxu0 %vm687_vm2, %v1966_v59 }
0x108b   : > { %5954 = vmatprep.mubr.msk.f32.mxu1 %vm6770_vm1, %v6766_v0  ;;  %5962 = vmatprep.subr.mxu1 %v6766_v0 }
0x108c   : > { %5967 = vmatprep.subr.mxu0 %v6766_v0 }
0x108d   : > { %5960 = vmatmul.mubr.msk.f32.vlgmr.msra.gmra.mrb[20].mxu0 %vm687_vm2, %v1964_v60 }
0x108e   : > { %5969 = vmatprep.mubr.msk.f32.mxu0 %vm6770_vm1, %v6766_v0  ;;  %5968 = vmatpush3.msra.mxu0 %v1796_v20 }
0x108f   : > { %5977 = vmatprep.subr.mxu0 %v6766_v0 }
0x115c   : > { %v1873_v61 = vpop.f32.mrb[8].mxu1 }
0x115d   : > { %v1877_v62 = vmul.f32 0.17677669, %v1873_v61  ;;  %v5951_v38 = vpop.f32.mrb[9].mxu1 }
0x115f   : > { %v1878_v63 = vadd.f32 %v1877_v62, %v7195_v40  ;;  %v1797_v62 = vld [vmem:[#allocation7 + $0x30] sm:$0xff] }
0x1160   : > { %v2037_v1 = vpop.f32.mrb[20].mxu0 }
0x1161   : > { %v2041_v2 = vmul.f32 0.17677669, %v2037_v1  ;;  %v5961_v3 = vpop.f32.mrb[21].mxu0  ;;  %v1879_v4 = vsel %vm687_vm2, %v1878_v63, -inf }
0x1162   : > { %1880 = vmax.xlane.f32.xlu0 %v1879_v4 }
0x1163   : > { %v2042_v5 = vadd.f32 %v2041_v2, %v7195_v40 }
0x1165   : > { %v2043_v6 = vsel %vm687_vm2, %v2042_v5, -inf }
0x1166   : > { %2044 = vmax.xlane.f32.xlu1 %v2043_v6 }
0x1177   : > { %2055 = vrot.lane.b32.xlu1 %v7325_v14, %s7932_s28 }
0x117b   : > { %2277 = vrot.lane.b32.xlu1 %v7314_v56, %s7983_s14 }
0x11ef   : > { %v1881_v7 = vpop.xlane.xlu0 %1880 }
0x11f0   : > { %v1882_v8 = vsub.f32 %v1878_v63, %v1881_v7 }
0x11f2   : > { %v1883_v9 = vmul.f32 1.442695, %v1882_v8 }
0x11f3   : > { %v2045_v10 = vpop.xlane.xlu1 %2044 }
0x11f4   : > { %6444 = vpow2.f32 %v1883_v9  ;;  %v2046_v11 = vsub.f32 %v2042_v5, %v2045_v10 }
0x11f6   : > { %v2047_v12 = vmul.f32 1.442695, %v2046_v11 }
0x11f7   : > { %v2056_v25 = vpop.permute.xlu1 %2055 }
0x11f8   : > { %6446 = vpow2.f32 %v2047_v12  ;;  %v1798_v12 = vld [vmem:[#allocation7 + $0x38] sm:$0xff] }
0x11fb   : > { %v2278_v41 = vpop.permute.xlu1 %2277 }
0x11fe   : > { %v6445_v13 = vpop.eup %6444 }
0x11ff   : > { %v1885_v16 = vsel %vm687_vm2, %v6445_v13, 0.0 }
0x1200   : > { %1886 = vadd.xlane.f32.xlu0 %v1885_v16 }
0x1202   : > { %v6447_v17 = vpop.eup %6446 }
0x1203   : > { %v2049_v19 = vsel %vm687_vm2, %v6447_v17, 0.0 }
0x1204   : > { %2050 = vadd.xlane.f32.xlu0 %v2049_v19 }
0x121a   : > { %2279 = vrot.lane.b32.xlu0 %v7312_v55, %s7984_s27 }
0x128d   : > { %v1887_v15 = vpop.xlane.xlu0 %1886 }
0x128e   : > { %6448 = vrcp.f32 %v1887_v15 }
0x1291   : > { %v2051_v21 = vpop.xlane.xlu0 %2050 }
0x1292   : > { %6450 = vrcp.f32 %v2051_v21 }
0x1295   : > { %v2280_v36 = vpop.permute.xlu0 %2279 }
0x1298   : > { %v6449_v22 = vpop.eup %6448 }
0x1299   : > { %v1889_v23 = vmul.f32 %v6449_v22, %v6445_v13  ;;  %v5652_v22 = vld [vmem:[#allocation8 + $0x1] ss:$0 sm:$0xff] }
0x129b   : > { %5955 = vmatmul.mubr.msk.f32.vlgmr.msra.gmra.mrb[10].mxu1 %vm687_vm2, %v1889_v23 }
0x129c   : > { %v6451_v27 = vpop.eup %6450  ;;  %5963 = vmatpush3.msra.mxu1 %v2056_v25  ;;  %5964 = vmatprep.mubr.msk.f32.mxu1 %vm6770_vm1, %v6766_v0 }
0x129d   : > { %v2053_v28 = vmul.f32 %v6451_v27, %v6447_v17  ;;  %5972 = vmatprep.subr.mxu1 %v6766_v0 }
0x129f   : > { %5965 = vmatmul.mubr.msk.f32.vlgmr.msra.gmra.mrb[12].mxu1 %vm687_vm2, %v2053_v28 }
0x12a0   : > { %5974 = vmatprep.mubr.msk.f32.mxu1 %vm6770_vm1, %v6766_v0  ;;  %5973 = vmatpush3.msra.mxu1 %v1795_v31 }
0x12a1   : > { %5982 = vmatprep.subr.mxu1 %v6766_v0 }
0x136e   : > { %v1959_v33 = vpop.f32.mrb[10].mxu1 }
0x136f   : > { %v5956_v34 = vpop.f32.mrb[11].mxu1  ;;  %5975 = vmatmul.mubr.msk.f32.vlgmr.msra.gmra.mrb[14].mxu1 %vm687_vm2, %v1959_v33 }
0x1370   : > { %5984 = vmatprep.mubr.msk.f32.mxu1 %vm6770_vm1, %v6766_v0 }
0x1372   : > { %v2127_v35 = vpop.f32.mrb[12].mxu1 }
0x1373   : > { %v5966_v39 = vpop.f32.mrb[13].mxu1  ;;  %5970 = vmatmul.mubr.msk.f32.vlgmr.msra.gmra.mrb[22].mxu0 %vm687_vm2, %v2127_v35 }
0x1374   : > { %5978 = vmatpush3.xpose.msk.msra.mxu0 %vm687_vm2, %v2280_v36  ;;  %5979 = vmatprep.mubr.msk.f32.mxu0 %vm6770_vm1, %v6766_v0 }
0x1375   : > { %5987 = vmatprep.subr.mxu0 %v6766_v0 }
0x1377   : > { %5980 = vmatmul.mubr.msk.f32.vlgmr.msra.gmra.mrb[24].mxu0 %vm687_vm2, %v2278_v41  ;;  %v2800_v41 = vld [vmem:[%s7987_s9] sm:$0xff] }
0x1378   : > { %5989 = vmatprep.mubr.msk.f32.mxu0 %vm6770_vm1, %v6766_v0  ;;  %5988 = vmatpush3.msra.mxu0 %v1797_v62  ;;  %v2896_v62 = vld [vmem:[%s7988_s2 + $0x58] sm:$0xff] }
0x1379   : > { %5997 = vmatprep.subr.mxu0 %v6766_v0 }
0x1442   : > { %v2273_v29 = vpop.f32.mrb[14].mxu1 }
0x1443   : > { %v5976_v42 = vpop.f32.mrb[15].mxu1 }
0x1446   : > { %v2200_v37 = vpop.f32.mrb[22].mxu0 }
0x1447   : > { %v2274_v44 = vadd.f32 %v2273_v29, %v2200_v37  ;;  %v5971_v45 = vpop.f32.mrb[23].mxu0  ;;  %v2801_v29 = vld [vmem:[%s7987_s9 + $0x8] sm:$0xff]  ;;  %v2802_v37 = vld [vmem:[%s7987_s9 + $0x10] sm:$0xff] }
0x1448   : > { %v6236_v42 = vpack.c.bf16 %v2801_v29, %v2800_v41  ;;  %v5660_v29 = vld [vmem:[%s7894_s1 + $0x80] sm:$0xff] }
0x144a   : > { %v2351_v46 = vpop.f32.mrb[24].mxu0 }
0x144b   : > { %v2355_v47 = vmul.f32 0.17677669, %v2351_v46  ;;  %v5981_v48 = vpop.f32.mrb[25].mxu0  ;;  %v2885_v46 = vld [vmem:[%s7988_s2] sm:$0xff] }
0x144c   : > { %v2887_v48 = vld [vmem:[%s7988_s2 + $0x10] sm:$0xff] }
0x144d   : > { %v2356_v49 = vadd.f32 %v2355_v47, %v7195_v40  ;;  %v2886_v47 = vld [vmem:[%s7988_s2 + $0x8] sm:$0xff] }
0x144f   : > { %v2357_v50 = vsel %vm687_vm2, %v2356_v49, -inf }
0x1450   : > { %2358 = vmax.xlane.f32.xlu1 %v2357_v50  ;;  %v2888_v50 = vld [vmem:[%s7988_s2 + $0x18] sm:$0xff] }
0x1461   : > { %2520 = vrot.lane.b32.xlu1 %v7312_v55, %s7985_s18 }
0x1465   : > { %2518 = vrot.lane.b32.xlu1 %v7314_v56, %s7986_s10 }
0x14dd   : > { %v2359_v51 = vpop.xlane.xlu1 %2358 }
0x14de   : > { %v2360_v52 = vsub.f32 %v2356_v49, %v2359_v51  ;;  %v6242_v49 = vpack.c.bf16 %v2886_v47, %v2885_v46  ;;  %v6245_v51 = vpack.c.bf16 %v2888_v50, %v2887_v48  ;;  %v5664_v46 = vld [vmem:[%s7894_s1 + $0xa0] sm:$0xff]  ;;  %v5666_v48 = vld [vmem:[%s7894_s1 + $0xb0] sm:$0xff] }
0x14e0   : > { %v2361_v53 = vmul.f32 1.442695, %v2360_v52  ;;  %v2889_v52 = vld [vmem:[%s7988_s2 + $0x20] sm:$0xff] }
0x14e1   : > { %v2521_v60 = vpop.permute.xlu1 %2520 }
0x14e2   : > { %6452 = vpow2.f32 %v2361_v53  ;;  %v2890_v53 = vld [vmem:[%s7988_s2 + $0x28] sm:$0xff] }
0x14e5   : > { %v2519_v61 = vpop.permute.xlu1 %2518 }
0x14ec   : > { %v6453_v54 = vpop.eup %6452 }
0x14ed   : > { %v2363_v57 = vsel %vm687_vm2, %v6453_v54, 0.0 }
0x14ee   : > { %2364 = vadd.xlane.f32.xlu0 %v2363_v57  ;;  %v2891_v57 = vld [vmem:[%s7988_s2 + $0x30] sm:$0xff] }
0x1504   : > { %2368 = vrot.lane.b32.xlu0 %v7325_v14, %s7983_s14 }
0x157b   : > { %v2365_v58 = vpop.xlane.xlu0 %2364 }
0x157c   : > { %6454 = vrcp.f32 %v2365_v58  ;;  %v2892_v58 = vld [vmem:[%s7988_s2 + $0x38] sm:$0xff] }
0x157f   : > { %v2369_v59 = vpop.permute.xlu0 %2368 }
0x1580   : > { %5983 = vmatpush3.msra.mxu1 %v2369_v59  ;;  %v6251_v59 = vpack.c.bf16 %v2892_v58, %v2891_v57  ;;  %v5659_v58 = vld [vmem:[#allocation11 + $0x2] ss:$0 sm:$0xff] }
0x1581   : > { %5992 = vmatprep.subr.mxu1 %v6766_v0 }
0x1586   : > { %v6455_v55 = vpop.eup %6454 }
0x1587   : > { %v2367_v56 = vmul.f32 %v6455_v55, %v6453_v54  ;;  %v6248_v54 = vpack.c.bf16 %v2890_v53, %v2889_v52  ;;  %v2893_v55 = vld [vmem:[%s7988_s2 + $0x40] sm:$0xff] }
0x1589   : > { %5985 = vmatmul.mubr.msk.f32.vlgmr.msra.gmra.mrb[16].mxu1 %vm687_vm2, %v2367_v56 }
0x158a   : > { %5993 = vmatpush3.xpose.msk.msra.mxu1 %vm687_vm2, %v2521_v60  ;;  %5994 = vmatprep.mubr.msk.f32.mxu1 %vm6770_vm1, %v6766_v0  ;;  %v2894_v60 = vld [vmem:[%s7988_s2 + $0x48] sm:$0xff] }
0x158b   : > { %6002 = vmatprep.subr.mxu1 %v6766_v0  ;;  %v6254_v56 = vpack.c.bf16 %v2894_v60, %v2893_v55  ;;  %v3020_v60 = vld [vmem:[#allocation5 + $0x4] sm:$0x3] }
0x158d   : > { %5995 = vmatmul.mubr.msk.f32.vlgmr.msra.gmra.mrb[18].mxu1 %vm687_vm2, %v2519_v61  ;;  %v2895_v61 = vld [vmem:[%s7988_s2 + $0x50] sm:$0xff] }
0x158e   : > { %6004 = vmatprep.mubr.msk.f32.mxu1 %vm6770_vm1, %v6766_v0  ;;  %6003 = vmatpush3.msra.mxu1 %v1798_v12  ;;  %v2899_v12 = vld [vmem:[%s7988_s2 + $0x70] sm:$0xff] }
0x165c   : > { %v2440_v38 = vpop.f32.mrb[16].mxu1 }
0x165d   : > { %v5986_v63 = vpop.f32.mrb[17].mxu1  ;;  %5990 = vmatmul.mubr.msk.f32.vlgmr.msra.gmra.mrb[26].mxu0 %vm687_vm2, %v2440_v38  ;;  %v6257_v38 = vpack.c.bf16 %v2896_v62, %v2895_v61 }
0x165e   : > { %5999 = vmatprep.mubr.msk.f32.mxu0 %vm6770_vm1, %v6766_v0  ;;  %v2897_v63 = vld [vmem:[%s7988_s2 + $0x60] sm:$0xff] }
0x1660   : > { %v2592_v1 = vpop.f32.mrb[18].mxu1 }
0x1661   : > { %v2596_v2 = vmul.f32 0.17677669, %v2592_v1  ;;  %v5996_v3 = vpop.f32.mrb[19].mxu1  ;;  %v2898_v1 = vld [vmem:[%s7988_s2 + $0x68] sm:$0xff] }
0x1663   : > { %v2597_v4 = vadd.f32 %v2596_v2, %v7195_v40  ;;  %v6260_v2 = vpack.c.bf16 %v2898_v1, %v2897_v63 }
0x1665   : > { %v2598_v5 = vsel %vm687_vm2, %v2597_v4, -inf }
0x1666   : > { %2599 = vmax.xlane.f32.xlu0 %v2598_v5 }
0x167c   : > { %2609 = vrot.lane.b32.xlu0 %v7325_v14, %s7986_s10 }
0x16f3   : > { %v2600_v6 = vpop.xlane.xlu0 %2599 }
0x16f4   : > { %v2601_v7 = vsub.f32 %v2597_v4, %v2600_v6 }
0x16f6   : > { %v2602_v8 = vmul.f32 1.442695, %v2601_v7  ;;  %v5653_v7 = vld [vmem:[#allocation10 + $0x1] ss:$0 sm:$0xff] }
0x16f7   : > { %v2610_v9 = vpop.permute.xlu0 %2609 }
0x16f8   : > { %6456 = vpow2.f32 %v2602_v8  ;;  %5998 = vmatpush3.msra.mxu0 %v2610_v9  ;;  %v5654_v9 = vld [vmem:[#allocation11 + $0x1] ss:$0 sm:$0xff] }
0x1702   : > { %v6457_v10 = vpop.eup %6456 }
0x1703   : > { %v2604_v11 = vsel %vm687_vm2, %v6457_v10, 0.0 }
0x1704   : > { %2605 = vadd.xlane.f32.xlu1 %v2604_v11 }
0x1730   : > { %v2513_v13 = vpop.f32.mrb[26].mxu0 }
0x1731   : > { %v2517_v40 = vadd.f32 %v2513_v13, %v2274_v44  ;;  %v5991_v16 = vpop.f32.mrb[27].mxu0  ;;  %v2803_v44 = vld [vmem:[%s7987_s9 + $0x18] sm:$0xff] }
0x1732   : > { %v6239_v45 = vpack.c.bf16 %v2803_v44, %v2802_v37  ;;  %v2900_v13 = vld [vmem:[%s7988_s2 + $0x78] sm:$0xff]  ;;  %v5655_v16 = vld [vmem:[%s7989_s25] ss:$0 sm:$0xff]  ;;  %v5665_v44 = vld [vmem:[%s7894_s1 + $0xa8] sm:$0xff] }
0x1791   : > { %v2606_v17 = vpop.xlane.xlu1 %2605 }
0x1792   : > { %6458 = vrcp.f32 %v2606_v17 }
0x179c   : > { %v6459_v19 = vpop.eup %6458 }
0x179d   : > { %v2608_v20 = vmul.f32 %v6459_v19, %v6457_v10 }
0x179f   : > { %6000 = vmatmul.mubr.msk.f32.vlgmr.msra.gmra.mrb[28].mxu0 %vm687_vm2, %v2608_v20 }
0x17a0   : > { %6015 = vmatprep.mubr.msk.f32.mxu0 %vm6770_vm1, %v6766_v0 }
0x1872   : > { %v2681_v14 = vpop.f32.mrb[28].mxu0 }
0x1873   : > { %v6001_v15 = vpop.f32.mrb[29].mxu0  ;;  %6005 = vmatmul.mubr.msk.f32.vlgmr.msra.gmra.mrb[20].mxu1 %vm687_vm2, %v2681_v14 }
0x1874   : > { %6050 = vmatprep.mubr.msk.f32.mxu1 %vm6770_vm1, %v6766_v0  ;;  %v5657_v15 = vld [vmem:[%s7990_s0] ss:$0 sm:$0xff] }
0x1946   : > { %v2754_v21 = vpop.f32.mrb[20].mxu1 }
0x1947   : > { %v2758_v23 = vadd.f32 %v2754_v21, %v2517_v40  ;;  %v6006_v25 = vpop.f32.mrb[21].mxu1  ;;  %v6263_v40 = vpack.c.bf16 %v2900_v13, %v2899_v12 }
0x1949   : > { %v2767_v27 = vadd.f32 %v5652_v22, %v2758_v23 }
0x194b   : > { %v2768_v28 = vadd.f32 %v2767_v27, %v7299_v43  ;;  %v6777_v43 = vmov 0.0|0.0  }
0x194c   : > { %6235 = vmatprep.subr.bf16.mxu0 %v6777_v43  ;;  %6241 = vmatprep.subr.bf16.mxu1 %v6777_v43 }
0x194d   : > { %v2769_v31 = vsel %vm580_vm0, %v2768_v28, 0.0  ;;  %6237 = vmatpush3.bf16.msra.mxu0 %v6236_v42  ;;  %6243 = vmatpush3.bf16.msra.mxu1 %v6242_v49  ;;  %v5662_v42 = vld [vmem:[%s7894_s1 + $0x90] sm:$0xff]  ;;  %v6271_v49 = vpack.c.bf16 %v5666_v48, %v5664_v46 }
0x194e   : > { %2770 = vadd.xlane.f32.xlu1 %v2769_v31  ;;  %6238 = vmatprep.subr.bf16.mxu0 %v6777_v43  ;;  %v6267_v37 = vpack.c.bf16 %v5662_v42, %v5660_v29 }
0x194f   : > { %6244 = vmatprep.subr.bf16.mxu1 %v6777_v43 }
0x1951   : > { %6240 = vmatpush3.bf16.msra.mxu0 %v6239_v45  ;;  %6246 = vmatpush3.bf16.msra.mxu1 %v6245_v51  ;;  %v5667_v45 = vld [vmem:[%s7894_s1 + $0xb8] sm:$0xff] }
0x1952   : > { %6247 = vmatprep.subr.bf16.mxu1 %v6777_v43  ;;  %v6269_v47 = vpack.c.bf16 %v5667_v45, %v5665_v44 }
0x1955   : > { %6249 = vmatpush3.bf16.msra.mxu1 %v6248_v54  ;;  %v5658_v54 = vld [vmem:[#allocation10 + $0x2] ss:$0 sm:$0xff] }
0x1956   : > { %6250 = vmatprep.subr.bf16.mxu1 %v6777_v43 }
0x1959   : > { %6252 = vmatpush3.bf16.msra.mxu1 %v6251_v59 }
0x195a   : > { %6253 = vmatprep.subr.bf16.mxu1 %v6777_v43 }
0x195d   : > { %6255 = vmatpush3.bf16.msra.mxu1 %v6254_v56  ;;  %v3025_v56 = vrot.slane %v3020_v60, %v7154_v18 }
0x195e   : > { %6256 = vmatprep.subr.bf16.mxu1 %v6777_v43 }
0x1961   : > { %6258 = vmatpush3.bf16.msra.mxu1 %v6257_v38 }
0x1962   : > { %6259 = vmatprep.subr.bf16.mxu1 %v6777_v43 }
0x1965   : > { %6261 = vmatpush3.bf16.msra.mxu1 %v6260_v2 }
0x1966   : > { %6262 = vmatprep.subr.bf16.mxu1 %v6777_v43 }
0x1969   : > { %6264 = vmatpush3.bf16.msra.mxu1 %v6263_v40 }
0x196a   : > { %6078 = vmatprep.subr.mxu1 %v6766_v0 }
0x19db   : > { %v2771_v33 = vpop.xlane.xlu1 %2770 }
0x19dc   : > { %v2772_v34 = vmul.f32 0.03125, %v2771_v33 }
0x19de   : > { %v2773_v35 = vsub.f32 %v2768_v28, %v2772_v34 }
0x19e0   : > { %v2774_v36 = vmul.f32 %v2773_v35, %v2773_v35 }
0x19e2   : > { %v2775_v39 = vsel %vm580_vm0, %v2774_v36, 0.0  ;;  %v5661_v36 = vld [vmem:[%s7894_s1 + $0x88] sm:$0xff] }
0x19e3   : > { %2776 = vadd.xlane.f32.xlu1 %v2775_v39  ;;  %v5663_v39 = vld [vmem:[%s7894_s1 + $0x98] sm:$0xff] }
0x19e4   : > { %v6265_v41 = vpack.c.bf16 %v5663_v39, %v5661_v36 }
0x19e6   : > { %6266 = vmatprep.subr.bf16.mxu0 %v6265_v41 }
0x1a70   : > { %v2777_v3 = vpop.xlane.xlu1 %2776 }
0x1a71   : > { %v2778_v4 = vmul.f32 0.03125, %v2777_v3 }
0x1a73   : > { %v2779_v5 = vadd.f32 1e-05, %v2778_v4 }
0x1a75   : > { %6460 = vrsqrt.f32 %v2779_v5 }
0x1a7f   : > { %v6461_v6 = vpop.eup %6460 }
0x1a80   : > { %v2781_v8 = vmul.f32 %v6461_v6, %v2773_v35  ;;  %v3029_v6 = vrot.slane %v3020_v60, %v7176_v32 }
0x1a82   : > { %v2790_v10 = vmul.f32 %v5653_v7, %v2781_v8  ;;  %v7536_v7 = vld [vmem:[%s7980_s11] sm:$0xff] }
0x1a84   : > { %v2799_v11 = vadd.f32 %v5654_v9, %v2790_v10 }
0x1a86   : > { %6016 = vmatmul.mubr.msk.f32.vlgmr.msra.gmra.mrb[30].mxu0 %vm580_vm0, %v2799_v11 }
0x1a87   : > { %3099 = vmatprep.mubr.f32.mxu0 %v6766_v0  ;;  %6268 = vmatpush1.bf16.msra.mxu0 %v6267_v37 }
0x1a88   : > { %6270 = vmatprep.subr.bf16.mxu0 %v6269_v47 }
0x1a8b   : > { %6272 = vmatpush1.bf16.msra.mxu0 %v6271_v49 }
0x1a8c   : > { %6053 = vmatprep.subr.mxu0 %v6766_v0 }
0x1b59   : > { %v2880_v17 = vpop.f32.mrb[30].mxu0 }
0x1b5a   : > { %v2881_v19 = vadd.f32 %v5655_v16, %v2880_v17  ;;  %v6017_v20 = vpop.f32.mrb[31].mxu0  ;;  %v7552_v16 = vld [vmem:[%s7981_s20] sm:$0xff] }
0x1b5c   : > { %v2884_v14 = vmax.f32 %v2881_v19, 0.0 }
0x1b5e   : > { %6051 = vmatmul.mubr.f32.vlgmr.msra.gmra.mrb[22].mxu1 %v2884_v14 }
0x1b5f   : > { %6080 = vmatprep.mubr.msk.f32.mxu1 %vm6770_vm1, %v6766_v0 }
0x1c31   : > { %v2974_v21 = vpop.f32.mrb[22].mxu1 }
0x1c32   : > { %v2975_v22 = vadd.f32 %v5657_v15, %v2974_v21  ;;  %v6052_v23 = vpop.f32.mrb[23].mxu1 }
0x1c34   : > { %v2978_v25 = vadd.f32 %v2975_v22, %v2799_v11 }
0x1c36   : > { %v2979_v27 = vsel %vm580_vm0, %v2978_v25, 0.0 }
0x1c37   : > { %2980 = vadd.xlane.f32.xlu1 %v2979_v27 }
0x1cc4   : > { %v2981_v28 = vpop.xlane.xlu1 %2980 }
0x1cc5   : > { %v2982_v31 = vmul.f32 0.03125, %v2981_v28 }
0x1cc7   : > { %v2983_v33 = vsub.f32 %v2978_v25, %v2982_v31 }
0x1cc9   : > { %v2984_v34 = vmul.f32 %v2983_v33, %v2983_v33 }
0x1ccb   : > { %v2985_v35 = vsel %vm580_vm0, %v2984_v34, 0.0 }
0x1ccc   : > { %2986 = vadd.xlane.f32.xlu1 %v2985_v35 }
0x1d59   : > { %v2987_v50 = vpop.xlane.xlu1 %2986 }
0x1d5a   : > { %v2988_v51 = vmul.f32 0.03125, %v2987_v50 }
0x1d5c   : > { %v2989_v52 = vadd.f32 1e-05, %v2988_v51 }
0x1d5e   : > { %6462 = vrsqrt.f32 %v2989_v52 }
0x1d68   : > { %v6463_v53 = vpop.eup %6462 }
0x1d69   : > { %v2991_v57 = vmul.f32 %v6463_v53, %v2983_v33  ;;  %v3121_v33 = vld [vmem:[#allocation7 + $0x40] sm:$0xff] }
0x1d6a   : > { %6079 = vmatpush3.msra.mxu1 %v3121_v33 }
0x1d6b   : > { %v3000_v59 = vmul.f32 %v5658_v54, %v2991_v57  ;;  %6088 = vmatprep.subr.mxu1 %v6766_v0  ;;  %v3122_v54 = vld [vmem:[#allocation7 + $0x48] sm:$0xff] }
0x1d6d   : > { %v7514_v55 = vadd.f32 %v5659_v58, %v3000_v59 }
0x1d6f   : > { %5668 = vmatmul.mubr.msk.f32.vlgmr.msra.gmra.mrb[32].mxu0 %vm580_vm0, %v7514_v55 }
0x1d70   : > { %6055 = vmatprep.mubr.msk.f32.mxu0 %vm6770_vm1, %v6766_v0 }
0x1e42   : > { %v3101_v61 = vpop.f32.mrb[32].mxu0 }
0x1e43   : > { %v3102_v62 = vadd.f32 %v3101_v61, %v3025_v56  ;;  %v3103_v38 = vpop.f32.mrb[33].mxu0 }
0x1e44   : > { %v7541_v11 = vadd.f32 %v3103_v38, %v3029_v6 }
0x1e45   : > { %v3114_v63 = vmul.f32 %v3102_v62, %v7157_v24  ;;  %v3113_v1 = vmul.f32 %v3102_v62, %v7165_v26  ;;  %v3107_v4 = vmul.f32 %v3102_v62, %v7172_v30  ;;  %v3106_v8 = vmul.f32 %v7536_v7, %v3102_v62 }
0x1e47   : > { %3116 = vrot.lane.b32.xlu1 %v3114_v63, %s7991_s12 }
0x1eb9   : > { %v3117_v2 = vpop.permute.xlu1 %3116 }
0x1eba   : > { %v7524_v3 = vadd.f32 %v3117_v2, %v3113_v1 }
0x1ebc   : > { %3126 = vrot.lane.b32.xlu0 %v7524_v3, %s7992_s4 }
0x1ec0   : > { %3109 = vrot.lane.b32.xlu0 %v3107_v4, %s7991_s12 }
0x1f2e   : > { %v3127_v5 = vpop.permute.xlu0 %3126 }
0x1f2f   : > { %6054 = vmatpush3.xpose.msk.msra.mxu0 %vm687_vm2, %v3127_v5 }
0x1f30   : > { %6058 = vmatprep.subr.mxu0 %v6766_v0 }
0x1f32   : > { %v3110_v9 = vpop.permute.xlu0 %3109 }
0x1f33   : > { %v7539_v10 = vadd.f32 %v3110_v9, %v3106_v8 }
0x1f35   : > { %6056 = vmatmul.mubr.msk.f32.vlgmr.msra.gmra.mrb[34].mxu0 %vm687_vm2, %v7539_v10 }
0x1f36   : > { %6059 = vmatpush3.msra.mxu0 %v7541_v11  ;;  %6060 = vmatprep.mubr.msk.f32.mxu0 %vm6770_vm1, %v6766_v0 }
0x1f37   : > { %6063 = vmatprep.subr.mxu0 %v6766_v0 }
0x2008   : > { %v3199_v12 = vpop.f32.mrb[34].mxu0 }
0x2009   : > { %v3203_v13 = vmul.f32 0.17677669, %v3199_v12  ;;  %v6057_v40 = vpop.f32.mrb[35].mxu0 }
0x200b   : > { %v3204_v17 = vadd.f32 %v7552_v16, %v3203_v13 }
0x200d   : > { %v3205_v19 = vsel %vm687_vm2, %v3204_v17, -inf }
0x200e   : > { %3206 = vmax.xlane.f32.xlu0 %v3205_v19 }
0x2024   : > { %3291 = vrot.lane.b32.xlu0 %v7524_v3, %s7982_s22 }
0x209b   : > { %v3207_v20 = vpop.xlane.xlu0 %3206 }
0x209c   : > { %v3208_v14 = vsub.f32 %v3204_v17, %v3207_v20 }
0x209e   : > { %v3209_v15 = vmul.f32 1.442695, %v3208_v14 }
0x209f   : > { %v3292_v28 = vpop.permute.xlu0 %3291 }
0x20a0   : > { %6464 = vpow2.f32 %v3209_v15 }
0x20aa   : > { %v6465_v21 = vpop.eup %6464 }
0x20ab   : > { %v3211_v22 = vsel %vm687_vm2, %v6465_v21, 0.0 }
0x20ac   : > { %3212 = vadd.xlane.f32.xlu1 %v3211_v22 }
0x20bd   : > { %3289 = vrot.lane.b32.xlu1 %v7539_v10, %s7993_s13 }
0x2139   : > { %v3213_v23 = vpop.xlane.xlu1 %3212 }
0x213a   : > { %6466 = vrcp.f32 %v3213_v23 }
0x213d   : > { %v3290_v31 = vpop.permute.xlu1 %3289 }
0x2144   : > { %v6467_v25 = vpop.eup %6466 }
0x2145   : > { %v3215_v27 = vmul.f32 %v6467_v25, %v6465_v21 }
0x2147   : > { %6061 = vmatmul.mubr.msk.f32.vlgmr.msra.gmra.mrb[36].mxu0 %vm687_vm2, %v3215_v27 }
0x2148   : > { %6064 = vmatpush3.xpose.msk.msra.mxu0 %vm687_vm2, %v3292_v28  ;;  %6065 = vmatprep.mubr.msk.f32.mxu0 %vm6770_vm1, %v6766_v0 }
0x2149   : > { %6068 = vmatprep.subr.mxu0 %v6766_v0 }
0x214b   : > { %6066 = vmatmul.mubr.msk.f32.vlgmr.msra.gmra.mrb[38].mxu0 %vm687_vm2, %v3290_v31 }
0x214c   : > { %6070 = vmatprep.mubr.msk.f32.mxu0 %vm6770_vm1, %v6766_v0 }
0x221a   : > { %v3285_v34 = vpop.f32.mrb[36].mxu0 }
0x221b   : > { %v6062_v35 = vpop.f32.mrb[37].mxu0  ;;  %6081 = vmatmul.mubr.msk.f32.vlgmr.msra.gmra.mrb[24].mxu1 %vm687_vm2, %v3285_v34 }
0x221c   : > { %6090 = vmatprep.mubr.msk.f32.mxu1 %vm6770_vm1, %v6766_v0 }
0x221e   : > { %v3363_v36 = vpop.f32.mrb[38].mxu0 }
0x221f   : > { %v3367_v39 = vmul.f32 0.17677669, %v3363_v36  ;;  %v6067_v41 = vpop.f32.mrb[39].mxu0 }
0x2221   : > { %v3368_v29 = vadd.f32 %v7552_v16, %v3367_v39  ;;  %v3124_v39 = vld [vmem:[#allocation7 + $0x58] sm:$0xff] }
0x2223   : > { %v3369_v42 = vsel %vm687_vm2, %v3368_v29, -inf }
0x2224   : > { %3370 = vmax.xlane.f32.xlu0 %v3369_v42 }
0x223a   : > { %3381 = vrot.lane.b32.xlu0 %v7541_v11, %s7993_s13 }
0x223e   : > { %3603 = vrot.lane.b32.xlu0 %v7539_v10, %s7983_s14 }
0x22b1   : > { %v3371_v37 = vpop.xlane.xlu0 %3370 }
0x22b2   : > { %v3372_v44 = vsub.f32 %v3368_v29, %v3371_v37 }
0x22b4   : > { %v3373_v45 = vmul.f32 1.442695, %v3372_v44 }
0x22b5   : > { %v3382_v46 = vpop.permute.xlu0 %3381 }
0x22b6   : > { %6468 = vpow2.f32 %v3373_v45  ;;  %6069 = vmatpush3.msra.mxu0 %v3382_v46 }
0x22b7   : > { %6073 = vmatprep.subr.mxu0 %v6766_v0 }
0x22b9   : > { %v3604_v60 = vpop.permute.xlu0 %3603 }
0x22c0   : > { %v6469_v47 = vpop.eup %6468 }
0x22c1   : > { %v3375_v48 = vsel %vm687_vm2, %v6469_v47, 0.0 }
0x22c2   : > { %3376 = vadd.xlane.f32.xlu1 %v3375_v48  ;;  %v5685_v48 = vld [vmem:[#allocation8 + $0x2] ss:$0 sm:$0xff] }
0x22d3   : > { %3605 = vrot.lane.b32.xlu1 %v7524_v3, %s7984_s27 }
0x22ee   : > { %v3599_v49 = vpop.f32.mrb[24].mxu1 }
0x22ef   : > { %v6082_v50 = vpop.f32.mrb[25].mxu1 }
0x234f   : > { %v3377_v51 = vpop.xlane.xlu1 %3376 }
0x2350   : > { %6470 = vrcp.f32 %v3377_v51 }
0x2353   : > { %v3606_v58 = vpop.permute.xlu1 %3605 }
0x235a   : > { %v6471_v52 = vpop.eup %6470 }
0x235b   : > { %v3379_v53 = vmul.f32 %v6471_v52, %v6469_v47 }
0x235d   : > { %6071 = vmatmul.mubr.msk.f32.vlgmr.msra.gmra.mrb[40].mxu0 %vm687_vm2, %v3379_v53 }
0x235e   : > { %6074 = vmatpush3.msra.mxu0 %v3122_v54  ;;  %6075 = vmatprep.mubr.msk.f32.mxu0 %vm6770_vm1, %v6766_v0 }
0x235f   : > { %6083 = vmatprep.subr.mxu0 %v6766_v0 }
0x2430   : > { %v3453_v57 = vpop.f32.mrb[40].mxu0 }
0x2431   : > { %v6072_v59 = vpop.f32.mrb[41].mxu0  ;;  %6076 = vmatmul.mubr.msk.f32.vlgmr.msra.gmra.mrb[42].mxu0 %vm687_vm2, %v3453_v57 }
0x2432   : > { %6084 = vmatpush3.xpose.msk.msra.mxu0 %vm687_vm2, %v3606_v58  ;;  %6085 = vmatprep.mubr.msk.f32.mxu0 %vm6770_vm1, %v6766_v0 }
0x2433   : > { %6093 = vmatprep.subr.mxu0 %v6766_v0 }
0x2435   : > { %6086 = vmatmul.mubr.msk.f32.vlgmr.msra.gmra.mrb[44].mxu0 %vm687_vm2, %v3604_v60 }
0x2436   : > { %6095 = vmatprep.mubr.msk.f32.mxu0 %vm6770_vm1, %v6766_v0 }
0x2504   : > { %v3526_v56 = vpop.f32.mrb[42].mxu0 }
0x2505   : > { %v3600_v61 = vadd.f32 %v3599_v49, %v3526_v56  ;;  %v6077_v62 = vpop.f32.mrb[43].mxu0  ;;  %v5689_v56 = vld [vmem:[%s7894_s1 + $0xc8] sm:$0xff] }
0x2508   : > { %v3677_v38 = vpop.f32.mrb[44].mxu0 }
0x2509   : > { %v3681_v63 = vmul.f32 0.17677669, %v3677_v38  ;;  %v6087_v1 = vpop.f32.mrb[45].mxu0  ;;  %v5690_v38 = vld [vmem:[%s7894_s1 + $0xd0] sm:$0xff] }
0x250a   : > { %v5693_v1 = vld [vmem:[%s7894_s1 + $0xe8] sm:$0xff] }
0x250b   : > { %v3682_v2 = vadd.f32 %v7552_v16, %v3681_v63 }
0x250d   : > { %v3683_v4 = vsel %vm687_vm2, %v3682_v2, -inf }
0x250e   : > { %3684 = vmax.xlane.f32.xlu0 %v3683_v4  ;;  %v5692_v4 = vld [vmem:[%s7894_s1 + $0xe0] sm:$0xff] }
0x2524   : > { %3694 = vrot.lane.b32.xlu0 %v7541_v11, %s7983_s14 }
0x2528   : > { %3844 = vrot.lane.b32.xlu0 %v7539_v10, %s7986_s10 }
0x259b   : > { %v3685_v5 = vpop.xlane.xlu0 %3684 }
0x259c   : > { %v3686_v6 = vsub.f32 %v3682_v2, %v3685_v5  ;;  %v5695_v2 = vld [vmem:[%s7894_s1 + $0xf8] sm:$0xff] }
0x259d   : > { %v6277_v5 = vpack.c.bf16 %v5695_v2, %v5693_v1  ;;  %v4237_v1 = vld [vmem:[#allocation7 + $0x60] sm:$0xff] }
0x259e   : > { %v3687_v8 = vmul.f32 1.442695, %v3686_v6  ;;  %v5694_v6 = vld [vmem:[%s7894_s1 + $0xf0] sm:$0xff] }
0x259f   : > { %v3695_v9 = vpop.permute.xlu0 %3694 }
0x25a0   : > { %6472 = vpow2.f32 %v3687_v8  ;;  %6089 = vmatpush3.msra.mxu1 %v3695_v9  ;;  %v6279_v8 = vpack.c.bf16 %v5694_v6, %v5692_v4 }
0x25a1   : > { %6098 = vmatprep.subr.mxu1 %v6766_v0 }
0x25a3   : > { %v3845_v20 = vpop.permute.xlu0 %3844 }
0x25aa   : > { %v6473_v12 = vpop.eup %6472 }
0x25ab   : > { %v3689_v13 = vsel %vm687_vm2, %v6473_v12, 0.0 }
0x25ac   : > { %3690 = vadd.xlane.f32.xlu1 %v3689_v13 }
0x25bd   : > { %3846 = vrot.lane.b32.xlu1 %v7524_v3, %s7985_s18  ;;  %v3123_v3 = vld [vmem:[#allocation7 + $0x50] sm:$0xff] }
0x25be   : > { %6094 = vmatpush3.msra.mxu0 %v3123_v3 }
0x25bf   : > { %6103 = vmatprep.subr.mxu0 %v6766_v0 }
0x2639   : > { %v3691_v40 = vpop.xlane.xlu1 %3690 }
0x263a   : > { %6474 = vrcp.f32 %v3691_v40 }
0x263d   : > { %v3847_v10 = vpop.permute.xlu1 %3846 }
0x2644   : > { %v6475_v17 = vpop.eup %6474 }
0x2645   : > { %v3693_v19 = vmul.f32 %v6475_v17, %v6473_v12  ;;  %v5686_v17 = vld [vmem:[#allocation10 + $0x3] ss:$0 sm:$0xff] }
0x2647   : > { %6091 = vmatmul.mubr.msk.f32.vlgmr.msra.gmra.mrb[26].mxu1 %vm687_vm2, %v3693_v19 }
0x2648   : > { %6099 = vmatpush3.xpose.msk.msra.mxu1 %vm687_vm2, %v3847_v10  ;;  %6100 = vmatprep.mubr.msk.f32.mxu1 %vm6770_vm1, %v6766_v0  ;;  %v5687_v10 = vld [vmem:[#allocation11 + $0x3] ss:$0 sm:$0xff] }
0x2649   : > { %6108 = vmatprep.subr.mxu1 %v6766_v0 }
0x264b   : > { %6101 = vmatmul.mubr.msk.f32.vlgmr.msra.gmra.mrb[28].mxu1 %vm687_vm2, %v3845_v20 }
0x264c   : > { %6110 = vmatprep.mubr.msk.f32.mxu1 %vm6770_vm1, %v6766_v0  ;;  %6109 = vmatpush3.msra.mxu1 %v3124_v39 }
0x264d   : > { %6113 = vmatprep.subr.mxu1 %v6766_v0 }
0x271a   : > { %v3766_v14 = vpop.f32.mrb[26].mxu1 }
0x271b   : > { %v6092_v15 = vpop.f32.mrb[27].mxu1  ;;  %6096 = vmatmul.mubr.msk.f32.vlgmr.msra.gmra.mrb[46].mxu0 %vm687_vm2, %v3766_v14  ;;  %v4136_v14 = vld [vmem:[#allocation5 + $0x6] sm:$0x3] }
0x271c   : > { %6105 = vmatprep.mubr.msk.f32.mxu0 %vm6770_vm1, %v6766_v0  ;;  %v4141_v15 = vrot.slane %v4136_v14, %v7154_v18 }
0x271e   : > { %v3918_v21 = vpop.f32.mrb[28].mxu1 }
0x271f   : > { %v3922_v22 = vmul.f32 0.17677669, %v3918_v21  ;;  %v6102_v23 = vpop.f32.mrb[29].mxu1 }
0x2721   : > { %v3923_v25 = vadd.f32 %v7552_v16, %v3922_v22 }
0x2723   : > { %v3924_v27 = vsel %vm687_vm2, %v3923_v25, -inf }
0x2724   : > { %3925 = vmax.xlane.f32.xlu0 %v3924_v27 }
0x273a   : > { %3935 = vrot.lane.b32.xlu0 %v7541_v11, %s7986_s10 }
0x27b1   : > { %v3926_v28 = vpop.xlane.xlu0 %3925 }
0x27b2   : > { %v3927_v31 = vsub.f32 %v3923_v25, %v3926_v28 }
0x27b4   : > { %v3928_v33 = vmul.f32 1.442695, %v3927_v31 }
0x27b5   : > { %v3936_v34 = vpop.permute.xlu0 %3935 }
0x27b6   : > { %6476 = vpow2.f32 %v3928_v33  ;;  %6104 = vmatpush3.msra.mxu0 %v3936_v34 }
0x27c0   : > { %v6477_v35 = vpop.eup %6476 }
0x27c1   : > { %v3930_v36 = vsel %vm687_vm2, %v6477_v35, 0.0 }
0x27c2   : > { %3931 = vadd.xlane.f32.xlu1 %v3930_v36 }
0x27ee   : > { %v3839_v41 = vpop.f32.mrb[46].mxu0 }
0x27ef   : > { %v3843_v29 = vadd.f32 %v3839_v41, %v3600_v61  ;;  %v6097_v42 = vpop.f32.mrb[47].mxu0  ;;  %v5691_v61 = vld [vmem:[%s7894_s1 + $0xd8] sm:$0xff] }
0x27f0   : > { %v6273_v62 = vpack.c.bf16 %v5691_v61, %v5689_v56 }
0x27f2   : > { %6274 = vmatprep.subr.bf16.mxu0 %v6273_v62 }
0x284f   : > { %v3932_v37 = vpop.xlane.xlu1 %3931 }
0x2850   : > { %6478 = vrcp.f32 %v3932_v37 }
0x285a   : > { %v6479_v11 = vpop.eup %6478 }
0x285b   : > { %v3934_v44 = vmul.f32 %v6479_v11, %v6477_v35 }
0x285d   : > { %6106 = vmatmul.mubr.msk.f32.vlgmr.msra.gmra.mrb[48].mxu0 %vm687_vm2, %v3934_v44 }
0x285e   : > { %4215 = vmatprep.mubr.f32.mxu0 %v6766_v0 }
0x2930   : > { %v4007_v45 = vpop.f32.mrb[48].mxu0 }
0x2931   : > { %v6107_v46 = vpop.f32.mrb[49].mxu0  ;;  %6111 = vmatmul.mubr.msk.f32.vlgmr.msra.gmra.mrb[30].mxu1 %vm687_vm2, %v4007_v45 }
0x2932   : > { %6115 = vmatprep.mubr.msk.f32.mxu1 %vm6770_vm1, %v6766_v0 }
0x2a04   : > { %v4080_v47 = vpop.f32.mrb[30].mxu1 }
0x2a05   : > { %v4084_v49 = vadd.f32 %v4080_v47, %v3843_v29  ;;  %v6112_v50 = vpop.f32.mrb[31].mxu1 }
0x2a07   : > { %v4093_v51 = vadd.f32 %v5685_v48, %v4084_v49 }
0x2a09   : > { %v4094_v52 = vadd.f32 %v4093_v51, %v7514_v55  ;;  %v5688_v55 = vld [vmem:[%s7894_s1 + $0xc0] sm:$0xff] }
0x2a0a   : > { %v6275_v63 = vpack.c.bf16 %v5690_v38, %v5688_v55 }
0x2a0b   : > { %v4095_v53 = vsel %vm580_vm0, %v4094_v52, 0.0 }
0x2a0c   : > { %4096 = vadd.xlane.f32.xlu1 %v4095_v53  ;;  %6276 = vmatpush1.bf16.msra.mxu0 %v6275_v63 }
0x2a0d   : > { %6278 = vmatprep.subr.bf16.mxu0 %v6277_v5 }
0x2a10   : > { %6280 = vmatpush1.bf16.msra.mxu0 %v6279_v8 }
0x2a11   : > { %6123 = vmatprep.subr.mxu0 %v6766_v0 }
0x2a99   : > { %v4097_v54 = vpop.xlane.xlu1 %4096 }
0x2a9a   : > { %v4098_v57 = vmul.f32 0.03125, %v4097_v54 }
0x2a9c   : > { %v4099_v58 = vsub.f32 %v4094_v52, %v4098_v57 }
0x2a9e   : > { %v4100_v59 = vmul.f32 %v4099_v58, %v4099_v58 }
0x2aa0   : > { %v4101_v60 = vsel %vm580_vm0, %v4100_v59, 0.0  ;;  %v4238_v59 = vld [vmem:[#allocation7 + $0x68] sm:$0xff] }
0x2aa1   : > { %4102 = vadd.xlane.f32.xlu1 %v4101_v60 }
0x2b2e   : > { %v4103_v9 = vpop.xlane.xlu1 %4102 }
0x2b2f   : > { %v4104_v12 = vmul.f32 0.03125, %v4103_v9 }
0x2b31   : > { %v4105_v13 = vadd.f32 1e-05, %v4104_v12 }
0x2b33   : > { %6480 = vrsqrt.f32 %v4105_v13 }
0x2b3d   : > { %v6481_v40 = vpop.eup %6480 }
0x2b3e   : > { %v4107_v19 = vmul.f32 %v6481_v40, %v4099_v58 }
0x2b40   : > { %v4116_v20 = vmul.f32 %v5686_v17, %v4107_v19 }
0x2b42   : > { %v7656_v3 = vadd.f32 %v5687_v10, %v4116_v20 }
0x2b44   : > { %5696 = vmatmul.mubr.msk.f32.vlgmr.msra.gmra.mrb[50].mxu0 %vm580_vm0, %v7656_v3 }
0x2b45   : > { %6125 = vmatprep.mubr.msk.f32.mxu0 %vm6770_vm1, %v6766_v0 }
0x2c17   : > { %v4217_v21 = vpop.f32.mrb[50].mxu0 }
0x2c18   : > { %v4218_v22 = vadd.f32 %v4217_v21, %v4141_v15  ;;  %v4219_v23 = vpop.f32.mrb[51].mxu0 }
0x2c1a   : > { %v4230_v25 = vmul.f32 %v4218_v22, %v7157_v24  ;;  %v4223_v27 = vmul.f32 %v4218_v22, %v7172_v30  ;;  %v4229_v28 = vmul.f32 %v4218_v22, %v7165_v26  ;;  %v4222_v31 = vmul.f32 %v7536_v7, %v4218_v22 }
0x2c1b   : > { %v4145_v24 = vrot.slane %v4136_v14, %v7176_v32 }
0x2c1c   : > { %4232 = vrot.lane.b32.xlu1 %v4230_v25, %s7991_s12  ;;  %4225 = vrot.lane.b32.xlu0 %v4223_v27, %s7991_s12  ;;  %s5744_s12 = sshll.u32 %s6875_s19, 7  ;;  %s6778_s19 = smov [#allocation13]  }
0x2c1d   : > { %v7682_v30 = vadd.f32 %v4219_v23, %v4145_v24  ;;  %s7848_s7 = scalar_lea.hbm %s7995_s6, %s5744_s12  ;;  %s6678_s11 = sshll.u32 %s6778_s19, 4  ;;  %s6679_s11 = int_to_ptr.vmem [resolvable:$false] %s6678_s11 }
0x2c1e   : > { %s6680_s15 = scalar_lea.vmem %s6679_s11, 256 }
0x2c8e   : > { %v4233_v33 = vpop.permute.xlu1 %4232  ;;  %v4226_v34 = vpop.permute.xlu0 %4225 }
0x2c8f   : > { %v7669_v35 = vadd.f32 %v4233_v33, %v4229_v28  ;;  %v7671_v18 = vadd.f32 %v4226_v34, %v4222_v31 }
0x2c91   : > { %4242 = vrot.lane.b32.xlu0 %v7669_v35, %s7992_s4  ;;  %4405 = vrot.lane.b32.xlu1 %v7671_v18, %s7993_s13  ;;  %s7994_s4 = sshll.u32 %s7087_s23, 3 }
0x2c95   : > { %4407 = vrot.lane.b32.xlu0 %v7669_v35, %s7982_s22 }
0x2d03   : > { %v4243_v26 = vpop.permute.xlu0 %4242  ;;  %v4406_v32 = vpop.permute.xlu1 %4405 }
0x2d04   : > { %6114 = vmatpush3.xpose.msk.msra.mxu1 %vm687_vm2, %v4243_v26  ;;  %v4239_v26 = vld [vmem:[#allocation7 + $0x70] sm:$0xff] }
0x2d05   : > { %6118 = vmatprep.subr.mxu1 %v6766_v0 }
0x2d07   : > { %v4408_v7 = vpop.permute.xlu0 %4407  ;;  %6116 = vmatmul.mubr.msk.f32.vlgmr.msra.gmra.mrb[32].mxu1 %vm687_vm2, %v7671_v18 }
0x2d08   : > { %6119 = vmatpush3.msra.mxu1 %v7682_v30  ;;  %6124 = vmatpush3.xpose.msk.msra.mxu0 %vm687_vm2, %v4408_v7 }
0x2d09   : > { %6120 = vmatprep.mubr.msk.f32.mxu1 %vm6770_vm1, %v6766_v0  ;;  %6128 = vmatprep.subr.mxu1 %v6766_v0 }
0x2d0a   : > { %6133 = vmatprep.subr.mxu0 %v6766_v0 }
0x2d0b   : > { %6126 = vmatmul.mubr.msk.f32.vlgmr.msra.gmra.mrb[52].mxu0 %vm687_vm2, %v4406_v32 }
0x2d0c   : > { %6135 = vmatprep.mubr.msk.f32.mxu0 %vm6770_vm1, %v6766_v0  ;;  %6134 = vmatpush3.msra.mxu0 %v4238_v59 }
0x2d0d   : > { %6143 = vmatprep.subr.mxu0 %v6766_v0 }
0x2dda   : > { %v4315_v36 = vpop.f32.mrb[32].mxu1 }
0x2ddb   : > { %v4319_v39 = vmul.f32 0.17677669, %v4315_v36  ;;  %v6117_v41 = vpop.f32.mrb[33].mxu1 }
0x2ddd   : > { %v4320_v29 = vadd.f32 %v7552_v16, %v4319_v39 }
0x2dde   : > { %v4479_v42 = vpop.f32.mrb[52].mxu0 }
0x2ddf   : > { %v4483_v37 = vmul.f32 0.17677669, %v4479_v42  ;;  %v6127_v11 = vpop.f32.mrb[53].mxu0  ;;  %v4321_v44 = vsel %vm687_vm2, %v4320_v29, -inf }
0x2de0   : > { %4322 = vmax.xlane.f32.xlu0 %v4321_v44 }
0x2de1   : > { %v4484_v45 = vadd.f32 %v7552_v16, %v4483_v37 }
0x2de3   : > { %v4485_v46 = vsel %vm687_vm2, %v4484_v45, -inf }
0x2de4   : > { %4486 = vmax.xlane.f32.xlu1 %v4485_v46 }
0x2df5   : > { %4497 = vrot.lane.b32.xlu1 %v7682_v30, %s7993_s13  ;;  %s555_s13 = scalar_lea.vmem [#allocation13], %s7994_s4 }
0x2df6   : > { %s5471_s28 = sshll.u32 %s555_s13, 4  ;;  %s7850_s28 = int_to_ptr.vmem [resolvable:$true] %s5471_s28 }
0x2df7   : > { %s6674_s26 = scalar_lea.vmem %s7850_s28, 128  ;;  %p6681_p11 = scmp.lt.s32.totalorder %s7850_s28, %s6679_s11 }
0x2df8   : > { %p6675_p2 = scmp.ne.s32.totalorder %s7850_s28, %s6674_s26  ;;  %p6682_p12 = scmp.lt.s32.totalorder %s6680_s15, %s6674_s26 }
0x2df9   : > { %4719 = vrot.lane.b32.xlu1 %v7671_v18, %s7983_s14 }
0x2dfa   : > { %p6676_p10 = pnand %p6675_p2, %p7996_p7  ;;  %p6683_p13 = por %p6682_p12, %p6681_p11 }
0x2dfc   : > { %p6677_p1 = pneg %p6676_p10 }
0x2dfe   : > { %p6684_p3 = pnand %p6683_p13, %p6677_p1 }
0x2e6d   : > { %v4323_v47 = vpop.xlane.xlu0 %4322 }
0x2e6e   : > { %v4324_v48 = vsub.f32 %v4320_v29, %v4323_v47 }
0x2e70   : > { %v4325_v49 = vmul.f32 1.442695, %v4324_v48  ;;  %v4240_v48 = vld [vmem:[#allocation7 + $0x78] sm:$0xff] }
0x2e71   : > { %v4487_v50 = vpop.xlane.xlu1 %4486 }
0x2e72   : > { %6482 = vpow2.f32 %v4325_v49  ;;  %v4488_v51 = vsub.f32 %v4484_v45, %v4487_v50 }
0x2e74   : > { %v4489_v52 = vmul.f32 1.442695, %v4488_v51 }
0x2e75   : > { %v4498_v55 = vpop.permute.xlu1 %4497 }
0x2e76   : > { %6484 = vpow2.f32 %v4489_v52 }
0x2e79   : > { %v4720_v9 = vpop.permute.xlu1 %4719 }
0x2e7c   : > { %v6483_v53 = vpop.eup %6482 }
0x2e7d   : > { %v4327_v54 = vsel %vm687_vm2, %v6483_v53, 0.0 }
0x2e7e   : > { %4328 = vadd.xlane.f32.xlu0 %v4327_v54 }
0x2e80   : > { %v6485_v57 = vpop.eup %6484 }
0x2e81   : > { %v4491_v58 = vsel %vm687_vm2, %v6485_v57, 0.0 }
0x2e82   : > { %4492 = vadd.xlane.f32.xlu0 %v4491_v58  ;;  %v5713_v58 = vld [vmem:[#allocation8 + $0x3] ss:$0 sm:$0xff] }
0x2e98   : > { %4721 = vrot.lane.b32.xlu0 %v7669_v35, %s7984_s27 }
0x2f0b   : > { %v4329_v60 = vpop.xlane.xlu0 %4328 }
0x2f0c   : > { %6486 = vrcp.f32 %v4329_v60 }
0x2f0f   : > { %v4493_v56 = vpop.xlane.xlu0 %4492 }
0x2f10   : > { %6488 = vrcp.f32 %v4493_v56 }
0x2f13   : > { %v4722_v6 = vpop.permute.xlu0 %4721 }
0x2f16   : > { %v6487_v61 = vpop.eup %6486 }
0x2f17   : > { %v4331_v62 = vmul.f32 %v6487_v61, %v6483_v53 }
0x2f19   : > { %6121 = vmatmul.mubr.msk.f32.vlgmr.msra.gmra.mrb[34].mxu1 %vm687_vm2, %v4331_v62 }
0x2f1a   : > { %v6489_v38 = vpop.eup %6488  ;;  %6129 = vmatpush3.msra.mxu1 %v4498_v55  ;;  %6130 = vmatprep.mubr.msk.f32.mxu1 %vm6770_vm1, %v6766_v0 }
0x2f1b   : > { %v4495_v63 = vmul.f32 %v6489_v38, %v6485_v57  ;;  %6138 = vmatprep.subr.mxu1 %v6766_v0 }
0x2f1d   : > { %6131 = vmatmul.mubr.msk.f32.vlgmr.msra.gmra.mrb[36].mxu1 %vm687_vm2, %v4495_v63 }
0x2f1e   : > { %6140 = vmatprep.mubr.msk.f32.mxu1 %vm6770_vm1, %v6766_v0  ;;  %6139 = vmatpush3.msra.mxu1 %v4237_v1 }
0x2f1f   : > { %6148 = vmatprep.subr.mxu1 %v6766_v0 }
0x2fec   : > { %v4401_v2 = vpop.f32.mrb[34].mxu1 }
0x2fed   : > { %v6122_v4 = vpop.f32.mrb[35].mxu1  ;;  %6141 = vmatmul.mubr.msk.f32.vlgmr.msra.gmra.mrb[38].mxu1 %vm687_vm2, %v4401_v2 }
0x2fee   : > { %6150 = vmatprep.mubr.msk.f32.mxu1 %vm6770_vm1, %v6766_v0  ;;  %v5717_v4 = vld [vmem:[%s7987_s9 + $0x28] sm:$0xff] }
0x2ff0   : > { %v4569_v5 = vpop.f32.mrb[36].mxu1 }
0x2ff1   : > { %v6132_v8 = vpop.f32.mrb[37].mxu1  ;;  %6136 = vmatmul.mubr.msk.f32.vlgmr.msra.gmra.mrb[54].mxu0 %vm687_vm2, %v4569_v5 }
0x2ff2   : > { %6144 = vmatpush3.xpose.msk.msra.mxu0 %vm687_vm2, %v4722_v6  ;;  %6145 = vmatprep.mubr.msk.f32.mxu0 %vm6770_vm1, %v6766_v0  ;;  %v5719_v6 = vld [vmem:[%s7987_s9 + $0x38] sm:$0xff] }
0x2ff3   : > { %6153 = vmatprep.subr.mxu0 %v6766_v0 }
0x2ff5   : > { %6146 = vmatmul.mubr.msk.f32.vlgmr.msra.gmra.mrb[56].mxu0 %vm687_vm2, %v4720_v9  ;;  %v5723_v9 = vld [vmem:[%s7988_s2 + $0x80] sm:$0xff] }
0x2ff6   : > { %6155 = vmatprep.mubr.msk.f32.mxu0 %vm6770_vm1, %v6766_v0  ;;  %6154 = vmatpush3.msra.mxu0 %v4239_v26 }
0x2ff7   : > { %6163 = vmatprep.subr.mxu0 %v6766_v0 }
0x30c0   : > { %v4715_v12 = vpop.f32.mrb[38].mxu1 }
0x30c1   : > { %v6142_v13 = vpop.f32.mrb[39].mxu1 }
0x30c2   : > { %v5725_v13 = vld [vmem:[%s7988_s2 + $0x90] sm:$0xff] }
0x30c4   : > { %v4642_v40 = vpop.f32.mrb[54].mxu0 }
0x30c5   : > { %v4716_v17 = vadd.f32 %v4715_v12, %v4642_v40  ;;  %v6137_v19 = vpop.f32.mrb[55].mxu0  ;;  %v5724_v12 = vld [vmem:[%s7988_s2 + $0x88] sm:$0xff] }
0x30c6   : > { %v6288_v40 = vpack.c.bf16 %v5724_v12, %v5723_v9 }
0x30c8   : > { %v4793_v10 = vpop.f32.mrb[56].mxu0 }
0x30c9   : > { %v4797_v20 = vmul.f32 0.17677669, %v4793_v10  ;;  %v6147_v14 = vpop.f32.mrb[57].mxu0  ;;  %v5727_v10 = vld [vmem:[%s7988_s2 + $0xa0] sm:$0xff] }
0x30cb   : > { %v4798_v15 = vadd.f32 %v7552_v16, %v4797_v20  ;;  %v5728_v20 = vld [vmem:[%s7988_s2 + $0xa8] sm:$0xff] }
0x30cc   : > { %v6294_v14 = vpack.c.bf16 %v5728_v20, %v5727_v10 }
0x30cd   : > { %v4799_v21 = vsel %vm687_vm2, %v4798_v15, -inf }
0x30ce   : > { %4800 = vmax.xlane.f32.xlu1 %v4799_v21  ;;  %v5730_v21 = vld [vmem:[%s7988_s2 + $0xb8] sm:$0xff] }
0x30df   : > { %4962 = vrot.lane.b32.xlu1 %v7669_v35, %s7985_s18 }
0x30e3   : > { %4960 = vrot.lane.b32.xlu1 %v7671_v18, %s7986_s10 }
0x315b   : > { %v4801_v22 = vpop.xlane.xlu1 %4800 }
0x315c   : > { %v4802_v23 = vsub.f32 %v4798_v15, %v4801_v22  ;;  %v5729_v15 = vld [vmem:[%s7988_s2 + $0xb0] sm:$0xff] }
0x315d   : > { %v6297_v22 = vpack.c.bf16 %v5730_v21, %v5729_v15 }
0x315e   : > { %v4803_v25 = vmul.f32 1.442695, %v4802_v23  ;;  %v5731_v23 = vld [vmem:[%s7988_s2 + $0xc0] sm:$0xff] }
0x315f   : > { %v4963_v35 = vpop.permute.xlu1 %4962 }
0x3160   : > { %6490 = vpow2.f32 %v4803_v25  ;;  %v5732_v25 = vld [vmem:[%s7988_s2 + $0xc8] sm:$0xff] }
0x3163   : > { %v4961_v24 = vpop.permute.xlu1 %4960 }
0x316a   : > { %v6491_v27 = vpop.eup %6490 }
0x316b   : > { %v4805_v28 = vsel %vm687_vm2, %v6491_v27, 0.0 }
0x316c   : > { %4806 = vadd.xlane.f32.xlu0 %v4805_v28  ;;  %v5733_v28 = vld [vmem:[%s7988_s2 + $0xd0] sm:$0xff] }
0x3182   : > { %4810 = vrot.lane.b32.xlu0 %v7682_v30, %s7983_s14 }
0x31f9   : > { %v4807_v31 = vpop.xlane.xlu0 %4806 }
0x31fa   : > { %6492 = vrcp.f32 %v4807_v31  ;;  %v5734_v31 = vld [vmem:[%s7988_s2 + $0xd8] sm:$0xff] }
0x31fd   : > { %v4811_v33 = vpop.permute.xlu0 %4810 }
0x31fe   : > { %6149 = vmatpush3.msra.mxu1 %v4811_v33  ;;  %v6303_v33 = vpack.c.bf16 %v5734_v31, %v5733_v28 }
0x31ff   : > { %6158 = vmatprep.subr.mxu1 %v6766_v0 }
0x3204   : > { %v6493_v34 = vpop.eup %6492 }
0x3205   : > { %v4809_v18 = vmul.f32 %v6493_v34, %v6491_v27  ;;  %v6300_v27 = vpack.c.bf16 %v5732_v25, %v5731_v23  ;;  %v5735_v34 = vld [vmem:[%s7988_s2 + $0xe0] sm:$0xff] }
0x3207   : > { %6151 = vmatmul.mubr.msk.f32.vlgmr.msra.gmra.mrb[40].mxu1 %vm687_vm2, %v4809_v18 }
0x3208   : > { %6159 = vmatpush3.xpose.msk.msra.mxu1 %vm687_vm2, %v4963_v35  ;;  %6160 = vmatprep.mubr.msk.f32.mxu1 %vm6770_vm1, %v6766_v0  ;;  %v5736_v35 = vld [vmem:[%s7988_s2 + $0xe8] sm:$0xff] }
0x3209   : > { %6168 = vmatprep.subr.mxu1 %v6766_v0  ;;  %v6306_v18 = vpack.c.bf16 %v5736_v35, %v5735_v34 }
0x320b   : > { %6161 = vmatmul.mubr.msk.f32.vlgmr.msra.gmra.mrb[42].mxu1 %vm687_vm2, %v4961_v24 }
0x320c   : > { %6170 = vmatprep.mubr.msk.f32.mxu1 %vm6770_vm1, %v6766_v0  ;;  %6169 = vmatpush3.msra.mxu1 %v4240_v48 }
0x320d   : > { %6287 = vmatprep.subr.bf16.mxu1 %v6777_v43 }
0x32da   : > { %v4882_v7 = vpop.f32.mrb[40].mxu1 }
0x32db   : > { %v6152_v32 = vpop.f32.mrb[41].mxu1  ;;  %6156 = vmatmul.mubr.msk.f32.vlgmr.msra.gmra.mrb[58].mxu0 %vm687_vm2, %v4882_v7 }
0x32dc   : > { %6165 = vmatprep.mubr.msk.f32.mxu0 %vm6770_vm1, %v6766_v0 }
0x32de   : > { %v5034_v36 = vpop.f32.mrb[42].mxu1 }
0x32df   : > { %v5038_v39 = vmul.f32 0.17677669, %v5034_v36  ;;  %v6162_v41 = vpop.f32.mrb[43].mxu1  ;;  %v5714_v36 = vld [vmem:[#allocation10 + $0x4] ss:$0 sm:$0xff] }
0x32e0   : > { %v5715_v41 = vld [vmem:[#allocation11 + $0x4] ss:$0 sm:$0xff] }
0x32e1   : > { %v5039_v29 = vadd.f32 %v7552_v16, %v5038_v39 }
0x32e3   : > { %v5040_v42 = vsel %vm687_vm2, %v5039_v29, -inf }
0x32e4   : > { %5041 = vmax.xlane.f32.xlu0 %v5040_v42 }
0x32fa   : > { %5051 = vrot.lane.b32.xlu0 %v7682_v30, %s7986_s10 }
0x3371   : > { %v5042_v37 = vpop.xlane.xlu0 %5041 }
0x3372   : > { %v5043_v11 = vsub.f32 %v5039_v29, %v5042_v37  ;;  %v5737_v37 = vld [vmem:[%s7988_s2 + $0xf0] sm:$0xff] }
0x3374   : > { %v5044_v44 = vmul.f32 1.442695, %v5043_v11 }
0x3375   : > { %v5052_v45 = vpop.permute.xlu0 %5051 }
0x3376   : > { %6494 = vpow2.f32 %v5044_v44  ;;  %6164 = vmatpush3.msra.mxu0 %v5052_v45  ;;  %v5721_v44 = vld [vmem:[%s7989_s25 + $0x1] ss:$0 sm:$0xff] }
0x3377   : > { %6281 = vmatprep.subr.bf16.mxu0 %v6777_v43 }
0x3380   : > { %v6495_v46 = vpop.eup %6494 }
0x3381   : > { %v5046_v47 = vsel %vm687_vm2, %v6495_v46, 0.0 }
0x3382   : > { %5047 = vadd.xlane.f32.xlu1 %v5046_v47 }
0x33ae   : > { %v4955_v16 = vpop.f32.mrb[58].mxu0 }
0x33af   : > { %v4959_v49 = vadd.f32 %v4955_v16, %v4716_v17  ;;  %v6157_v50 = vpop.f32.mrb[59].mxu0  ;;  %v5726_v17 = vld [vmem:[%s7988_s2 + $0x98] sm:$0xff]  ;;  %v5740_v16 = vld [vmem:[%s7990_s0 + $0x1] ss:$0 sm:$0xff] }
0x33b0   : > { %v6291_v19 = vpack.c.bf16 %v5726_v17, %v5725_v13 }
0x340f   : > { %v5048_v30 = vpop.xlane.xlu1 %5047 }
0x3410   : > { %6496 = vrcp.f32 %v5048_v30 }
0x341a   : > { %v6497_v51 = vpop.eup %6496 }
0x341b   : > { %v5050_v52 = vmul.f32 %v6497_v51, %v6495_v46 }
0x341d   : > { %6166 = vmatmul.mubr.msk.f32.vlgmr.msra.gmra.mrb[60].mxu0 %vm687_vm2, %v5050_v52 }
0x341e   : > { %6181 = vmatprep.mubr.msk.f32.mxu0 %vm6770_vm1, %v6766_v0 }
0x34f0   : > { %v5123_v53 = vpop.f32.mrb[60].mxu0 }
0x34f1   : > { %v6167_v54 = vpop.f32.mrb[61].mxu0  ;;  %6171 = vmatmul.mubr.msk.f32.vlgmr.msra.gmra.mrb[44].mxu1 %vm687_vm2, %v5123_v53 }
0x34f2   : > { %6216 = vmatprep.mubr.msk.f32.mxu1 %vm6770_vm1, %v6766_v0  ;;  %v5716_v0 = vld [vmem:[%s7987_s9 + $0x20] sm:$0xff]  ;;  %6289 = vmatpush3.bf16.msra.mxu1 %v6288_v40 }
0x34f3   : > { %v6282_v5 = vpack.c.bf16 %v5717_v4, %v5716_v0  ;;  %6290 = vmatprep.subr.bf16.mxu1 %v6777_v43 }
0x34f5   : > { %6283 = vmatpush3.bf16.msra.mxu0 %v6282_v5 }
0x34f6   : > { %6284 = vmatprep.subr.bf16.mxu0 %v6777_v43  ;;  %6292 = vmatpush3.bf16.msra.mxu1 %v6291_v19 }
0x34f7   : > { %6293 = vmatprep.subr.bf16.mxu1 %v6777_v43 }
0x34fa   : > { %6295 = vmatpush3.bf16.msra.mxu1 %v6294_v14 }
0x34fb   : > { %6296 = vmatprep.subr.bf16.mxu1 %v6777_v43 }
0x34fe   : > { %6298 = vmatpush3.bf16.msra.mxu1 %v6297_v22 }
0x34ff   : > { %6299 = vmatprep.subr.bf16.mxu1 %v6777_v43 }
0x3502   : > { %6301 = vmatpush3.bf16.msra.mxu1 %v6300_v27 }
0x3503   : > { %6302 = vmatprep.subr.bf16.mxu1 %v6777_v43 }
0x3506   : > { %6304 = vmatpush3.bf16.msra.mxu1 %v6303_v33 }
0x3507   : > { %6305 = vmatprep.subr.bf16.mxu1 %v6777_v43 }
0x350a   : > { %6307 = vmatpush3.bf16.msra.mxu1 %v6306_v18 }
0x350b   : > { %6308 = vmatprep.subr.bf16.mxu1 %v6777_v43  ;;  %v5738_v43 = vld [vmem:[%s7988_s2 + $0xf8] sm:$0xff] }
0x350c   : > { %v6309_v11 = vpack.c.bf16 %v5738_v43, %v5737_v37 }
0x350e   : > { %6310 = vmatpush3.bf16.msra.mxu1 %v6309_v11 }
0x35c4   : > { %v5196_v57 = vpop.f32.mrb[44].mxu1 }
0x35c5   : > { %v5200_v59 = vadd.f32 %v5196_v57, %v4959_v49  ;;  %v6172_v60 = vpop.f32.mrb[45].mxu1 }
0x35c7   : > { %v5209_v56 = vadd.f32 %v5713_v58, %v5200_v59 }
0x35c9   : > { %v5210_v61 = vadd.f32 %v5209_v56, %v7656_v3  ;;  %v5718_v3 = vld [vmem:[%s7987_s9 + $0x30] sm:$0xff] }
0x35ca   : > { %v6285_v8 = vpack.c.bf16 %v5719_v6, %v5718_v3 }
0x35cb   : > { %v5211_v62 = vsel %vm580_vm0, %v5210_v61, 0.0 }
0x35cc   : > { %5212 = vadd.xlane.f32.xlu1 %v5211_v62  ;;  %6286 = vmatpush3.bf16.msra.mxu0 %v6285_v8 }
0x3659   : > { %v5213_v55 = vpop.xlane.xlu1 %5212 }
0x365a   : > { %v5214_v38 = vmul.f32 0.03125, %v5213_v55  ;;  %v5741_v55 = vld [vmem:[#allocation10 + $0x5] ss:$0 sm:$0xff] }
0x365c   : > { %v5215_v63 = vsub.f32 %v5210_v61, %v5214_v38 }
0x365e   : > { %v5216_v1 = vmul.f32 %v5215_v63, %v5215_v63 }
0x3660   : > { %v5217_v2 = vsel %vm580_vm0, %v5216_v1, 0.0 }
0x3661   : > { %5218 = vadd.xlane.f32.xlu1 %v5217_v2 }
0x36ee   : > { %v5219_v24 = vpop.xlane.xlu1 %5218 }
0x36ef   : > { %v5220_v26 = vmul.f32 0.03125, %v5219_v24 }
0x36f1   : > { %v5221_v7 = vadd.f32 1e-05, %v5220_v26 }
0x36f3   : > { %6498 = vrsqrt.f32 %v5221_v7 }
0x36fd   : > { %v6499_v32 = vpop.eup %6498 }
0x36fe   : > { %v5223_v39 = vmul.f32 %v6499_v32, %v5215_v63  ;;  %v5742_v63 = vld [vmem:[#allocation11 + $0x5] ss:$0 sm:$0xff] }
0x3700   : > { %v5232_v29 = vmul.f32 %v5714_v36, %v5223_v39 }
0x3702   : > { %v5241_v42 = vadd.f32 %v5715_v41, %v5232_v29 }
0x3704   : > { %6182 = vmatmul.mubr.msk.f32.vlgmr.msra.gmra.mrb[62].mxu0 %vm580_vm0, %v5241_v42 }
0x37d7   : > { %v5324_v45 = vpop.f32.mrb[62].mxu0 }
0x37d8   : > { %v5325_v46 = vadd.f32 %v5721_v44, %v5324_v45  ;;  %v6183_v47 = vpop.f32.mrb[63].mxu0 }
0x37da   : > { %v5328_v48 = vmax.f32 %v5325_v46, 0.0 }
0x37dc   : > { %6217 = vmatmul.mubr.f32.vlgmr.msra.gmra.mrb[46].mxu1 %v5328_v48 }
0x38af   : > { %v5420_v49 = vpop.f32.mrb[46].mxu1 }
0x38b0   : > { %v5421_v50 = vadd.f32 %v5740_v16, %v5420_v49  ;;  %v6218_v30 = vpop.f32.mrb[47].mxu1 }
0x38b2   : > { %v5424_v51 = vadd.f32 %v5421_v50, %v5241_v42 }
0x38b4   : > { %v5425_v52 = vsel %vm580_vm0, %v5424_v51, 0.0 }
0x38b5   : > { %5426 = vadd.xlane.f32.xlu1 %v5425_v52 }
0x3942   : > { %v5427_v53 = vpop.xlane.xlu1 %5426 }
0x3943   : > { %v5428_v54 = vmul.f32 0.03125, %v5427_v53 }
0x3945   : > { %v5429_v57 = vsub.f32 %v5424_v51, %v5428_v54 }
0x3947   : > { %v5430_v58 = vmul.f32 %v5429_v57, %v5429_v57 }
0x3949   : > { %v5431_v59 = vsel %vm580_vm0, %v5430_v58, 0.0 }
0x394a   : > { %5432 = vadd.xlane.f32.xlu1 %v5431_v59 }
0x39d7   : > { %v5433_v60 = vpop.xlane.xlu1 %5432 }
0x39d8   : > { %v5434_v56 = vmul.f32 0.03125, %v5433_v60 }
0x39da   : > { %v5435_v61 = vadd.f32 1e-05, %v5434_v56 }
0x39dc   : > { %6500 = vrsqrt.f32 %v5435_v61 }
0x39e6   : > { %v6501_v62 = vpop.eup %6500 }
0x39e7   : > { %v5437_v38 = vmul.f32 %v6501_v62, %v5429_v57 }
0x39e9   : > { %v5446_v1 = vmul.f32 %v5741_v55, %v5437_v38 }
0x39eb   : > { %v5455_v2 = vadd.f32 %v5742_v63, %v5446_v1 }
0x39ed   : > { %5456 = vst.msk [vmem:[%s555_s13] sm:$0xff] %vm580_vm0, %v5455_v2 }
0x39ee   : > { %6687 = shalt.err (!%p6684_p3)
}
0x39ef   : > { %s6688_s23 = scalar_lea.hbm %s7848_s7, 128  ;;  %s6692_s14 = scalar_lea.hbm %s7995_s6, 256 }
0x39f0   : > { %p6689_p6 = scmp.ne.s32.totalorder %s7848_s7, %s6688_s23  ;;  %p6693_p8 = scmp.lt.u32.totalorder %s7848_s7, %s7995_s6 }
0x39f1   : > { %p6694_p0 = scmp.lt.u32.totalorder %s6692_s14, %s6688_s23  ;;  %p6696_p2 = scmp.lt.u32.totalorder %s6688_s23, %s7848_s7 }
0x39f2   : > { %p6690_p9 = pnand %p6689_p6, %p7996_p7 }
0x39f3   : > { %p6695_p5 = por %p6694_p0, %p6693_p8 }
0x39f4   : > { %p6691_p4 = pneg %p6690_p9 }
0x39f5   : > { %p6697_p10 = por %p6696_p2, %p6695_p5 }
0x39f7   : > { %p6698_p1 = pnand %p6697_p10, %p6691_p4 }
0x39f9   : > { %6701 = shalt.err (!%p6698_p1)
}
0x39fa   : > { %6333 = dma.vmem_to_hbm [thread:$0]  (%p7996_p7), %s7850_s28, 128, %s7848_s7, %s5458_s24  }
0x39fb PF: > { %s5483_s10 = sand.u32 1, %s6740_s29   ;;  %p7997_p11 = scmp.ne.s32.totalorder %s7969_s8, 0 }
0x39fc   : > { %p7998_p12 = scmp.ge.s32.totalorder %s6752_s16, 2  ;;  %s5484_s12 = scalar_lea.sflag [#allocation4], %s5483_s10 }
0x39fe   : > { %p6356_p13 = pnand %p7998_p12, %p7997_p11 }
0x3a00   : > { %6735 = dma.done.wait (!%p6356_p13), %s5484_s12, 128  }
0x3a01   : > { %6737 = vsyncadd (!%p6356_p13), %s5484_s12, 4294967168  ;;  %s7999_s4 = sld [smem:[#allocation19_spill]]  ;;  %s8000_s15 = sld [smem:[#allocation20_spill]] }
0x3a02   : > { %p30_p3 = scmp.ge.s32.totalorder %s7017_s21, 4   ;;  %s8001_s29 = smov %s6744_s30 }
0x3a03   : > { %s8003_s16 = smov %s7017_s21 }
0x3a04   :  { %32 = sbr.rel (!%p30_p3) target bundleno = 23 (0x17), region = 167 }
0x3a07   : > { %s8002_s30 = smov %s7999_s4 }
0x3a0b   :  { %5489 = vsyncpa [#allocation3], 1 }
0x3a0c   :  { %5491 = vsyncpa [#allocation3 + $0x1], 1 }
0x3a0d   :  { %5492 = vsyncpa [#allocation6], 1 }
0x3a0e   :  { %5493 = vsyncpa [#allocation9], 1 }
0x3a0f   :  { %5494 = vsyncpa [#allocation12], 1 }
0x3a10   :  { %5495 = vsyncpa [#allocation4], 1 }
0x3a11   :  { %5497 = vsyncpa [#allocation4 + $0x1], 1 }

</bundles_post_ra>
